<compile_context>
chip_gen: v6e
topology: v6e:2x2x1
jax: 0.10.0
libtpu: 0.0.40
codegen_flags: <defaults>
</compile_context>

<pallas_src>
import functools
import math

import jax
import jax.numpy as jnp
from jax.experimental import pallas as pl
from jax.experimental.pallas import tpu as pltpu


def _cdiv(a, b):
    return -(-a // b)


# --------------------------------------------------------------------------- #
# Kernel                                                                       #
# --------------------------------------------------------------------------- #

def _layer_norm_f32(x, w, b, eps=1e-5):
    """torch LayerNorm semantics: f32 compute, biased variance, eps=1e-5."""
    mu = jnp.mean(x, axis=-1, keepdims=True)
    var = jnp.mean(jnp.square(x - mu), axis=-1, keepdims=True)
    return (x - mu) * jax.lax.rsqrt(var + eps) * w + b


def _resblock_kernel(*refs, n_head, has_mask):
    """One fused ResidualAttentionBlock for a (block_b, L, D) batch slab.

    refs = (x, [mask], ln1_w, ln1_b, wqkv, bqkv, wo, bo,
            ln2_w, ln2_b, wfc, bfc, wproj, bproj, out)
    Weights are bf16, pre-transposed to (in, out); biases / LN params are f32
    rows of shape (1, dim).  The 1/sqrt(head_dim) scale is pre-folded into the
    Q columns of wqkv / bqkv.
    """
    if has_mask:
        x_ref, mask_ref = refs[0], refs[1]
        (ln1_w, ln1_b, wqkv, bqkv, wo, bo,
         ln2_w, ln2_b, wfc, bfc, wproj, bproj) = refs[2:-1]
    else:
        x_ref, mask_ref = refs[0], None
        (ln1_w, ln1_b, wqkv, bqkv, wo, bo,
         ln2_w, ln2_b, wfc, bfc, wproj, bproj) = refs[1:-1]
    out_ref = refs[-1]

    H = n_head
    B, L, D = x_ref.shape
    hd = D // H
    M = B * L                                        # matmul rows for this step

    x = x_ref[...].astype(jnp.float32).reshape(M, D)

    # ---- attention: x = x + out_proj(MHA(ln_1(x))) -------------------------
    h = _layer_norm_f32(x, ln1_w[...], ln1_b[...])
    qkv = jnp.dot(h.astype(jnp.bfloat16), wqkv[...],
                  preferred_element_type=jnp.float32) + bqkv[...]       # (M, 3D)
    qkv = qkv.astype(jnp.bfloat16)                   # one cast of the whole slab

    # Head-batched layout with a single leading batch dim (B*H, L, hd):
    # leading-batch 3-D dot_general is the known-good Mosaic lowering.
    # TODO(synk): the (B,L,H,hd)<->(B,H,L,hd) relayouts cost XLU slots; switch to
    # non-leading-batch einsums ('bqhd,bkhd->bhqk') once that lowering is solid.
    def to_heads(t):                                                    # (M, D)
        return jnp.transpose(t.reshape(B, L, H, hd), (0, 2, 1, 3)).reshape(B * H, L, hd)

    q = to_heads(qkv[:, 0 * D:1 * D])
    k = to_heads(qkv[:, 1 * D:2 * D])
    v = to_heads(qkv[:, 2 * D:3 * D])

    s = jnp.einsum('bqd,bkd->bqk', q, k,
                   preferred_element_type=jnp.float32)                  # (BH, L, L)
    if mask_ref is not None:
        s = s + mask_ref[...][None, :, :]
    s = s - jnp.max(s, axis=-1, keepdims=True)
    p = jnp.exp(s)
    p = p * pl.reciprocal(jnp.sum(p, axis=-1, keepdims=True), approx=True)

    o = jnp.einsum('bqk,bkd->bqd', p.astype(jnp.bfloat16), v,
                   preferred_element_type=jnp.float32)                  # (BH, L, hd)
    attn = jnp.transpose(o.reshape(B, H, L, hd), (0, 2, 1, 3)).reshape(M, D)
    attn = jnp.dot(attn.astype(jnp.bfloat16), wo[...],
                   preferred_element_type=jnp.float32) + bo[...]
    x = x + attn

    # ---- MLP: x = x + c_proj(QuickGELU(c_fc(ln_2(x)))) ---------------------
    # TODO(synk): for D >= ~1280 on 64 MiB-VMEM parts, tile the 4D hidden axis
    # and accumulate c_proj partials instead of materializing (M, 4D) in f32.
    h2 = _layer_norm_f32(x, ln2_w[...], ln2_b[...])
    f = jnp.dot(h2.astype(jnp.bfloat16), wfc[...],
                preferred_element_type=jnp.float32) + bfc[...]          # (M, 4D)
    f = f * jax.nn.sigmoid(1.702 * f)                                   # QuickGELU
    m = jnp.dot(f.astype(jnp.bfloat16), wproj[...],
                preferred_element_type=jnp.float32) + bproj[...]
    x = x + m

    out_ref[...] = x.reshape(B, L, D).astype(out_ref.dtype)


# --------------------------------------------------------------------------- #
# VMEM sizing & batch-block selection                                          #
# --------------------------------------------------------------------------- #

def _vmem_capacity_bytes():
    try:
        cap = getattr(pltpu.get_tpu_info(), "vmem_capacity_bytes", None)
        if cap:
            return int(cap)
    except Exception:
        pass
    return 64 << 20                      # conservative default (v7x per-core VMEM)


def _vmem_ceiling_bytes():
    cap = _vmem_capacity_bytes()
    headroom = max(cap // 8, 8 << 20)    # leave room for Mosaic internal scratch
    return max(cap - headroom, 16 << 20)


def _vmem_budget_bytes(B, L, D, H, weight_buffers):
    """Estimate the tile plan's VMEM footprint for a (B, L, D) batch slab."""
    bf16, f32 = 2, 4
    M = B * L
    hd = D // H
    weights = 12 * D * D * bf16                       # wqkv + wo + wfc + wproj
    small = 16 * D * f32                              # LN params + biases
    io = 2 * 2 * M * D * f32                          # x + out blocks, double-buffered
    acts = (M * 3 * D * (f32 + bf16)                  # qkv (f32 acc + bf16 copy)
            + 3 * B * H * L * hd * bf16               # head-batched q / k / v
            + 2 * B * H * L * L * f32                 # scores / probs
            + 2 * M * 4 * D * f32                     # MLP hidden (pre/post GELU)
            + 4 * M * D * f32)                        # residual temporaries
    est = weight_buffers * weights + small + io + acts
    return est + est // 3 + (2 << 20)                 # headroom for compiler temps


def _pick_block_b(N, L, D, H, vmem_ceiling, weight_buffers):
    """Largest batch block that fits VMEM, reaches ~512 matmul rows, and keeps
    at least a few grid steps for DMA pipelining / megacore sharding."""
    target_rows = 512
    block_b = 1
    for b in range(1, N + 1):
        if _vmem_budget_bytes(b, L, D, H, weight_buffers) > vmem_ceiling:
            break
        block_b = b
        if b * L >= target_rows:
            break
    min_steps = min(4, N)
    while block_b > 1 and _cdiv(N, block_b) < min_steps:
        block_b -= 1
    return block_b


# --------------------------------------------------------------------------- #
# pallas_call wrapper                                                          #
# --------------------------------------------------------------------------- #

def _resblock(x_nld, mask, p, *, n_head, block_b, single_buffer_weights):
    N, L, D = x_nld.shape
    assert N % block_b == 0
    grid = (N // block_b,)

    kernel = functools.partial(_resblock_kernel, n_head=n_head,
                               has_mask=mask is not None)

    weight_order = ('ln1_w', 'ln1_b', 'wqkv_t', 'bqkv', 'wo_t', 'bo',
                    'ln2_w', 'ln2_b', 'wfc_t', 'bfc', 'wproj_t', 'bproj')
    weights = [p[k] for k in weight_order]

    const_kwargs = {}
    if single_buffer_weights:
        # Constant-index blocks stay VMEM-resident; no need to double-buffer.
        const_kwargs['pipeline_mode'] = pl.Buffered(1)

    def const_spec(arr):
        return pl.BlockSpec(arr.shape, lambda n: (0,) * arr.ndim, **const_kwargs)

    tok_spec = pl.BlockSpec((block_b, L, D), lambda n: (n, 0, 0))

    in_specs = [tok_spec]
    operands = [x_nld]
    if mask is not None:
        in_specs.append(const_spec(mask))
        operands.append(mask)
    in_specs += [const_spec(w) for w in weights]
    operands += weights

    weight_buffers = 1 if single_buffer_weights else 2
    vmem_limit = min(
        max(_vmem_budget_bytes(block_b, L, D, n_head, weight_buffers), 16 << 20),
        _vmem_ceiling_bytes())

    return pl.pallas_call(
        kernel,
        out_shape=jax.ShapeDtypeStruct(x_nld.shape, x_nld.dtype),
        grid_spec=pltpu.PrefetchScalarGridSpec(
            num_scalar_prefetch=0,
            grid=grid,
            in_specs=in_specs,
            out_specs=tok_spec),
        input_output_aliases={0: 0},              # residual stream updated in place
        compiler_params=pltpu.CompilerParams(
            dimension_semantics=("parallel",),    # shard batch blocks across TCs
            vmem_limit_bytes=int(vmem_limit)),
    )(*operands)


def transformer_forward(x, params, *, n_head, attn_mask=None,
                        single_buffer_weights=True, block_b=None):
    """x: (L, N, D) float32, LND layout (same as the PyTorch Transformer)."""
    L, N, D = x.shape
    mask = None if attn_mask is None else attn_mask.astype(jnp.float32)

    weight_buffers = 1 if single_buffer_weights else 2
    if block_b is None:
        block_b = _pick_block_b(N, L, D, n_head, _vmem_ceiling_bytes(),
                                weight_buffers)

    x_nld = jnp.transpose(x, (1, 0, 2))               # batch-major (N, L, D)
    n_pad = _cdiv(N, block_b) * block_b
    if n_pad != N:
        x_nld = jnp.pad(x_nld, ((0, n_pad - N), (0, 0), (0, 0)))

    # TODO(synk): hide each layer's weight DMA behind the previous layer's
    # compute with a cross-pallas_call prefetch (async copy + semaphore output);
    # weights are currently fetched before grid step 0 of every layer.
    for p in params:
        x_nld = _resblock(x_nld, mask, p, n_head=n_head, block_b=block_b,
                          single_buffer_weights=single_buffer_weights)

    if n_pad != N:
        x_nld = x_nld[:N]
    return jnp.transpose(x_nld, (1, 0, 2))


# --------------------------------------------------------------------------- #
# Parameters (torch-shaped, pre-transposed) + host-side prep                   #
# --------------------------------------------------------------------------- #

def init_params(key, width, layers):
    """Synthetic f32 weights matching the torch module's shapes (pre-transposed
    to (in, out); biases / LN params stored as (1, dim) rows)."""
    params = []
    std = width ** -0.5
    for _ in range(layers):
        key, k0, k1, k2, k3, k4, k5, k6, k7 = jax.random.split(key, 9)
        params.append(dict(
            ln1_w=jnp.ones((1, width), jnp.float32),
            ln1_b=jnp.zeros((1, width), jnp.float32),
            wqkv_t=(jax.random.normal(k0, (width, 3 * width)) * std).astype(jnp.float32),
            bqkv=(jax.random.normal(k1, (1, 3 * width)) * 0.02).astype(jnp.float32),
            wo_t=(jax.random.normal(k2, (width, width)) * std).astype(jnp.float32),
            bo=(jax.random.normal(k3, (1, width)) * 0.02).astype(jnp.float32),
            ln2_w=jnp.ones((1, width), jnp.float32),
            ln2_b=jnp.zeros((1, width), jnp.float32),
            wfc_t=(jax.random.normal(k4, (width, 4 * width)) * std).astype(jnp.float32),
            bfc=(jax.random.normal(k5, (1, 4 * width)) * 0.02).astype(jnp.float32),
            wproj_t=(jax.random.normal(k6, (4 * width, width)) * std).astype(jnp.float32),
            bproj=(jax.random.normal(k7, (1, width)) * 0.02).astype(jnp.float32),
        ))
    return params


def prepare_kernel_params(p, n_head):
    """Fold 1/sqrt(head_dim) into the Q columns; cast matmul weights to bf16."""
    D = p['wo_t'].shape[0]
    hd = D // n_head
    scale = 1.0 / math.sqrt(hd)
    col_scale = jnp.concatenate([jnp.full((D,), scale, jnp.float32),
                                 jnp.ones((2 * D,), jnp.float32)])[None, :]
    return dict(
        ln1_w=p['ln1_w'], ln1_b=p['ln1_b'],
        wqkv_t=(p['wqkv_t'] * col_scale).astype(jnp.bfloat16),
        bqkv=p['bqkv'] * col_scale,
        wo_t=p['wo_t'].astype(jnp.bfloat16), bo=p['bo'],
        ln2_w=p['ln2_w'], ln2_b=p['ln2_b'],
        wfc_t=p['wfc_t'].astype(jnp.bfloat16), bfc=p['bfc'],
        wproj_t=p['wproj_t'].astype(jnp.bfloat16), bproj=p['bproj'],
    )


# --------------------------------------------------------------------------- #
# Pure-JAX f32 reference (mirrors the PyTorch module)                          #
# --------------------------------------------------------------------------- #

def reference_forward(x, params, *, n_head, attn_mask=None):
    L, N, D = x.shape
    H = n_head
    hd = D // H
    scale = 1.0 / math.sqrt(hd)
    mask = (jnp.zeros((L, L), jnp.float32) if attn_mask is None
            else attn_mask.astype(jnp.float32))

    def ln(v, w, b):
        mu = v.mean(-1, keepdims=True)
        var = ((v - mu) ** 2).mean(-1, keepdims=True)
        return (v - mu) * jax.lax.rsqrt(var + 1e-5) * w + b

    y = x.astype(jnp.float32)
    for p in params:
        h = ln(y, p['ln1_w'], p['ln1_b'])
        qkv = h @ p['wqkv_t'] + p['bqkv']                      # (L, N, 3D)
        q, k, v = jnp.split(qkv, 3, axis=-1)
        q = q.reshape(L, N, H, hd).transpose(1, 2, 0, 3) * scale
        k = k.reshape(L, N, H, hd).transpose(1, 2, 0, 3)
        v = v.reshape(L, N, H, hd).transpose(1, 2, 0, 3)
        s = jnp.einsum('nhqd,nhkd->nhqk', q, k) + mask
        a = jax.nn.softmax(s, axis=-1)
        o = jnp.einsum('nhqk,nhkd->nhqd', a, v)
        o = o.transpose(2, 0, 1, 3).reshape(L, N, D)
        y = y + o @ p['wo_t'] + p['bo']
        h2 = ln(y, p['ln2_w'], p['ln2_b'])
        f = h2 @ p['wfc_t'] + p['bfc']
        f = f * jax.nn.sigmoid(1.702 * f)
        y = y + f @ p['wproj_t'] + p['bproj']
    return y


# --------------------------------------------------------------------------- #
# Demo                                                                         #
# --------------------------------------------------------------------------- #

if __name__ == "__main__":
    # seq=8, batch=7 (exercises padding + block_b>1), width=32, heads=4, layers=2
    L, N, D, H, LAYERS = 8, 7, 32, 4, 2
    key = jax.random.PRNGKey(0)
    kx, kp = jax.random.split(key)
    x = jax.random.normal(kx, (L, N, D), dtype=jnp.float32)

    params_f32 = init_params(kp, D, LAYERS)                      # torch-like f32
    kparams = [prepare_kernel_params(p, H) for p in params_f32]  # bf16 + folded scale

    def run(single_buffer, attn_mask=None):
        fwd = jax.jit(functools.partial(transformer_forward, n_head=H,
                                        attn_mask=attn_mask,
                                        single_buffer_weights=single_buffer))
        return jax.block_until_ready(fwd(x, kparams))

    try:
        single_buffer = True
        out = run(single_buffer)        # preferred: single-buffered weight blocks
    except Exception:
        single_buffer = False
        out = run(single_buffer)        # fallback if pl.Buffered(1) is rejected
    assert out.shape == (L, N, D) and out.dtype == jnp.float32

    # no-mask path (vision tower) vs. f32 reference (loose tol: bf16 matmuls)
    ref = reference_forward(x, params_f32, n_head=H)
    err = float(jnp.max(jnp.abs(out - ref)))
    assert err < 0.2, f"kernel deviates from f32 reference (no mask): {err}"

    # causal-mask path (text tower)
    causal = jnp.triu(jnp.full((L, L), -jnp.inf, dtype=jnp.float32), k=1)
    out_m = run(single_buffer, attn_mask=causal)
    ref_m = reference_forward(x, params_f32, n_head=H, attn_mask=causal)
    err_m = float(jnp.max(jnp.abs(out_m - ref_m)))
    assert err_m < 0.2, f"kernel deviates from f32 reference (causal mask): {err_m}"

    print("KERNEL_OK")
</pallas_src>

<mosaic_0001>
module attributes {stable_mosaic.version = 11 : i64} {
  func.func @_resblock_kernel(%arg0: i32, %arg1: memref<2x8x32xf32, #tpu.memory_space<vmem>>, %arg2: memref<1x32xf32, #tpu.memory_space<vmem>>, %arg3: memref<1x32xf32, #tpu.memory_space<vmem>>, %arg4: memref<32x96xbf16, #tpu.memory_space<vmem>>, %arg5: memref<1x96xf32, #tpu.memory_space<vmem>>, %arg6: memref<32x32xbf16, #tpu.memory_space<vmem>>, %arg7: memref<1x32xf32, #tpu.memory_space<vmem>>, %arg8: memref<1x32xf32, #tpu.memory_space<vmem>>, %arg9: memref<1x32xf32, #tpu.memory_space<vmem>>, %arg10: memref<32x128xbf16, #tpu.memory_space<vmem>>, %arg11: memref<1x128xf32, #tpu.memory_space<vmem>>, %arg12: memref<128x32xbf16, #tpu.memory_space<vmem>>, %arg13: memref<1x32xf32, #tpu.memory_space<vmem>>, %arg14: memref<2x8x32xf32, #tpu.memory_space<vmem>>) attributes {dimension_semantics = [#tpu.dimension_semantics<parallel>], iteration_bounds = array<i64: 4>, scalar_prefetch = 0 : i64, scratch_operands = 0 : i64, tpu.core_type = #tpu.core_type<tc>, window_params = [{transform_indices = @transform_0, window_bounds = array<i64: 2, 8, 32>}, {pipeline_mode = #tpu.pipeline_mode<synchronous>, transform_indices = @transform_1, window_bounds = array<i64: 1, 32>}, {pipeline_mode = #tpu.pipeline_mode<synchronous>, transform_indices = @transform_2, window_bounds = array<i64: 1, 32>}, {pipeline_mode = #tpu.pipeline_mode<synchronous>, transform_indices = @transform_3, window_bounds = array<i64: 32, 96>}, {pipeline_mode = #tpu.pipeline_mode<synchronous>, transform_indices = @transform_4, window_bounds = array<i64: 1, 96>}, {pipeline_mode = #tpu.pipeline_mode<synchronous>, transform_indices = @transform_5, window_bounds = array<i64: 32, 32>}, {pipeline_mode = #tpu.pipeline_mode<synchronous>, transform_indices = @transform_6, window_bounds = array<i64: 1, 32>}, {pipeline_mode = #tpu.pipeline_mode<synchronous>, transform_indices = @transform_7, window_bounds = array<i64: 1, 32>}, {pipeline_mode = #tpu.pipeline_mode<synchronous>, transform_indices = @transform_8, window_bounds = array<i64: 1, 32>}, {pipeline_mode = #tpu.pipeline_mode<synchronous>, transform_indices = @transform_9, window_bounds = array<i64: 32, 128>}, {pipeline_mode = #tpu.pipeline_mode<synchronous>, transform_indices = @transform_10, window_bounds = array<i64: 1, 128>}, {pipeline_mode = #tpu.pipeline_mode<synchronous>, transform_indices = @transform_11, window_bounds = array<i64: 128, 32>}, {pipeline_mode = #tpu.pipeline_mode<synchronous>, transform_indices = @transform_12, window_bounds = array<i64: 1, 32>}, {transform_indices = @transform_13, window_bounds = array<i64: 2, 8, 32>}]} {
    %c0 = arith.constant 0 : index
    %c0_0 = arith.constant 0 : index
    %c0_1 = arith.constant 0 : index
    %0 = vector.load %arg1[%c0, %c0_0, %c0_1] : memref<2x8x32xf32, #tpu.memory_space<vmem>>, vector<2x8x32xf32>
    %1 = vector.shape_cast %0 : vector<2x8x32xf32> to vector<16x32xf32>
    %c0_2 = arith.constant 0 : index
    %c0_3 = arith.constant 0 : index
    %2 = vector.load %arg2[%c0_2, %c0_3] : memref<1x32xf32, #tpu.memory_space<vmem>>, vector<1x32xf32>
    %c0_4 = arith.constant 0 : index
    %c0_5 = arith.constant 0 : index
    %3 = vector.load %arg3[%c0_4, %c0_5] : memref<1x32xf32, #tpu.memory_space<vmem>>, vector<1x32xf32>
    %cst = arith.constant dense<0.000000e+00> : vector<16xf32>
    %4 = vector.multi_reduction <add>, %1, %cst [1] : vector<16x32xf32> to vector<16xf32>
    %5 = vector.shape_cast %4 : vector<16xf32> to vector<16x1xf32>
    %cst_6 = arith.constant 3.200000e+01 : f32
    %6 = vector.broadcast %cst_6 : f32 to vector<16x1xf32>
    %7 = arith.divf %5, %6 : vector<16x1xf32>
    %8 = vector.broadcast %7 : vector<16x1xf32> to vector<16x32xf32>
    %9 = arith.subf %1, %8 : vector<16x32xf32>
    %10 = arith.mulf %9, %9 : vector<16x32xf32>
    %cst_7 = arith.constant dense<0.000000e+00> : vector<16xf32>
    %11 = vector.multi_reduction <add>, %10, %cst_7 [1] : vector<16x32xf32> to vector<16xf32>
    %12 = vector.shape_cast %11 : vector<16xf32> to vector<16x1xf32>
    %cst_8 = arith.constant 3.200000e+01 : f32
    %13 = vector.broadcast %cst_8 : f32 to vector<16x1xf32>
    %14 = arith.divf %12, %13 : vector<16x1xf32>
    %15 = vector.broadcast %7 : vector<16x1xf32> to vector<16x32xf32>
    %16 = arith.subf %1, %15 : vector<16x32xf32>
    %cst_9 = arith.constant 9.99999974E-6 : f32
    %17 = vector.broadcast %cst_9 : f32 to vector<16x1xf32>
    %18 = arith.addf %14, %17 : vector<16x1xf32>
    %19 = math.rsqrt %18 : vector<16x1xf32>
    %20 = vector.broadcast %19 : vector<16x1xf32> to vector<16x32xf32>
    %21 = arith.mulf %16, %20 : vector<16x32xf32>
    %22 = vector.broadcast %2 : vector<1x32xf32> to vector<16x32xf32>
    %23 = arith.mulf %21, %22 : vector<16x32xf32>
    %24 = vector.broadcast %3 : vector<1x32xf32> to vector<16x32xf32>
    %25 = arith.addf %23, %24 : vector<16x32xf32>
    %26 = arith.truncf %25 : vector<16x32xf32> to vector<16x32xbf16>
    %c0_10 = arith.constant 0 : index
    %c0_11 = arith.constant 0 : index
    %27 = vector.load %arg4[%c0_10, %c0_11] : memref<32x96xbf16, #tpu.memory_space<vmem>>, vector<32x96xbf16>
    %cst_12 = arith.constant dense<0.000000e+00> : vector<16x96xf32>
    %28 = tpu.matmul %26, %27, %cst_12 {dimension_numbers = #tpu.dot_dimension_numbers<[1], [0], [0], [1], [0, 0, 1, 1], [], []>} : vector<16x32xbf16>, vector<32x96xbf16>, vector<16x96xf32> -> vector<16x96xf32>
    %c0_13 = arith.constant 0 : index
    %c0_14 = arith.constant 0 : index
    %29 = vector.load %arg5[%c0_13, %c0_14] : memref<1x96xf32, #tpu.memory_space<vmem>>, vector<1x96xf32>
    %30 = vector.broadcast %29 : vector<1x96xf32> to vector<16x96xf32>
    %31 = arith.addf %28, %30 : vector<16x96xf32>
    %32 = arith.truncf %31 : vector<16x96xf32> to vector<16x96xbf16>
    %33 = vector.extract_strided_slice %32 {offsets = [0, 0], sizes = [16, 32], strides = [1, 1]} : vector<16x96xbf16> to vector<16x32xbf16>
    %34 = vector.shape_cast %33 : vector<16x32xbf16> to vector<2x8x4x8xbf16>
    %35 = tpu.transpose %34, [0, 2, 1, 3] : vector<2x8x4x8xbf16> -> vector<2x4x8x8xbf16>
    %36 = vector.shape_cast %35 : vector<2x4x8x8xbf16> to vector<8x8x8xbf16>
    %37 = vector.extract_strided_slice %32 {offsets = [0, 32], sizes = [16, 32], strides = [1, 1]} : vector<16x96xbf16> to vector<16x32xbf16>
    %38 = vector.shape_cast %37 : vector<16x32xbf16> to vector<2x8x4x8xbf16>
    %39 = tpu.transpose %38, [0, 2, 1, 3] : vector<2x8x4x8xbf16> -> vector<2x4x8x8xbf16>
    %40 = vector.shape_cast %39 : vector<2x4x8x8xbf16> to vector<8x8x8xbf16>
    %41 = vector.extract_strided_slice %32 {offsets = [0, 64], sizes = [16, 32], strides = [1, 1]} : vector<16x96xbf16> to vector<16x32xbf16>
    %42 = vector.shape_cast %41 : vector<16x32xbf16> to vector<2x8x4x8xbf16>
    %43 = tpu.transpose %42, [0, 2, 1, 3] : vector<2x8x4x8xbf16> -> vector<2x4x8x8xbf16>
    %44 = vector.shape_cast %43 : vector<2x4x8x8xbf16> to vector<8x8x8xbf16>
    "tpu.trace_start"() <{level = 10 : i32, message = "bqd,bkd->bqk"}> : () -> ()
    %cst_15 = arith.constant dense<0.000000e+00> : vector<8x8x8xf32>
    %45 = tpu.matmul %36, %40, %cst_15 {dimension_numbers = #tpu.dot_dimension_numbers<[2], [2], [1], [1], [0, 0, 0, 1, 1, 1], [0], [0]>} : vector<8x8x8xbf16>, vector<8x8x8xbf16>, vector<8x8x8xf32> -> vector<8x8x8xf32>
    "tpu.trace_stop"() : () -> ()
    %cst_16 = arith.constant dense<0xFF800000> : vector<8x8xf32>
    %46 = vector.multi_reduction <maximumf>, %45, %cst_16 [2] : vector<8x8x8xf32> to vector<8x8xf32>
    %47 = vector.shape_cast %46 : vector<8x8xf32> to vector<8x8x1xf32>
    %48 = vector.broadcast %47 : vector<8x8x1xf32> to vector<8x8x8xf32>
    %49 = arith.subf %45, %48 : vector<8x8x8xf32>
    %50 = math.exp %49 : vector<8x8x8xf32>
    %cst_17 = arith.constant dense<0.000000e+00> : vector<8x8xf32>
    %51 = vector.multi_reduction <add>, %50, %cst_17 [2] : vector<8x8x8xf32> to vector<8x8xf32>
    %52 = vector.shape_cast %51 : vector<8x8xf32> to vector<8x8x1xf32>
    %53 = tpu.reciprocal %52 {approx = true} : vector<8x8x1xf32> -> vector<8x8x1xf32>
    %54 = vector.broadcast %53 : vector<8x8x1xf32> to vector<8x8x8xf32>
    %55 = arith.mulf %50, %54 : vector<8x8x8xf32>
    %56 = arith.truncf %55 : vector<8x8x8xf32> to vector<8x8x8xbf16>
    "tpu.trace_start"() <{level = 10 : i32, message = "bqk,bkd->bqd"}> : () -> ()
    %cst_18 = arith.constant dense<0.000000e+00> : vector<8x8x8xf32>
    %57 = tpu.matmul %56, %44, %cst_18 {dimension_numbers = #tpu.dot_dimension_numbers<[2], [1], [1], [2], [0, 0, 0, 1, 1, 2], [0], [0]>} : vector<8x8x8xbf16>, vector<8x8x8xbf16>, vector<8x8x8xf32> -> vector<8x8x8xf32>
    "tpu.trace_stop"() : () -> ()
    %58 = vector.shape_cast %57 : vector<8x8x8xf32> to vector<2x4x8x8xf32>
    %59 = tpu.transpose %58, [0, 2, 1, 3] : vector<2x4x8x8xf32> -> vector<2x8x4x8xf32>
    %60 = vector.shape_cast %59 : vector<2x8x4x8xf32> to vector<16x32xf32>
    %61 = arith.truncf %60 : vector<16x32xf32> to vector<16x32xbf16>
    %c0_19 = arith.constant 0 : index
    %c0_20 = arith.constant 0 : index
    %62 = vector.load %arg6[%c0_19, %c0_20] : memref<32x32xbf16, #tpu.memory_space<vmem>>, vector<32x32xbf16>
    %cst_21 = arith.constant dense<0.000000e+00> : vector<16x32xf32>
    %63 = tpu.matmul %61, %62, %cst_21 {dimension_numbers = #tpu.dot_dimension_numbers<[1], [0], [0], [1], [0, 0, 1, 1], [], []>} : vector<16x32xbf16>, vector<32x32xbf16>, vector<16x32xf32> -> vector<16x32xf32>
    %c0_22 = arith.constant 0 : index
    %c0_23 = arith.constant 0 : index
    %64 = vector.load %arg7[%c0_22, %c0_23] : memref<1x32xf32, #tpu.memory_space<vmem>>, vector<1x32xf32>
    %65 = vector.broadcast %64 : vector<1x32xf32> to vector<16x32xf32>
    %66 = arith.addf %63, %65 : vector<16x32xf32>
    %67 = arith.addf %1, %66 : vector<16x32xf32>
    %c0_24 = arith.constant 0 : index
    %c0_25 = arith.constant 0 : index
    %68 = vector.load %arg8[%c0_24, %c0_25] : memref<1x32xf32, #tpu.memory_space<vmem>>, vector<1x32xf32>
    %c0_26 = arith.constant 0 : index
    %c0_27 = arith.constant 0 : index
    %69 = vector.load %arg9[%c0_26, %c0_27] : memref<1x32xf32, #tpu.memory_space<vmem>>, vector<1x32xf32>
    %cst_28 = arith.constant dense<0.000000e+00> : vector<16xf32>
    %70 = vector.multi_reduction <add>, %67, %cst_28 [1] : vector<16x32xf32> to vector<16xf32>
    %71 = vector.shape_cast %70 : vector<16xf32> to vector<16x1xf32>
    %cst_29 = arith.constant 3.200000e+01 : f32
    %72 = vector.broadcast %cst_29 : f32 to vector<16x1xf32>
    %73 = arith.divf %71, %72 : vector<16x1xf32>
    %74 = vector.broadcast %73 : vector<16x1xf32> to vector<16x32xf32>
    %75 = arith.subf %67, %74 : vector<16x32xf32>
    %76 = arith.mulf %75, %75 : vector<16x32xf32>
    %cst_30 = arith.constant dense<0.000000e+00> : vector<16xf32>
    %77 = vector.multi_reduction <add>, %76, %cst_30 [1] : vector<16x32xf32> to vector<16xf32>
    %78 = vector.shape_cast %77 : vector<16xf32> to vector<16x1xf32>
    %cst_31 = arith.constant 3.200000e+01 : f32
    %79 = vector.broadcast %cst_31 : f32 to vector<16x1xf32>
    %80 = arith.divf %78, %79 : vector<16x1xf32>
    %81 = vector.broadcast %73 : vector<16x1xf32> to vector<16x32xf32>
    %82 = arith.subf %67, %81 : vector<16x32xf32>
    %cst_32 = arith.constant 9.99999974E-6 : f32
    %83 = vector.broadcast %cst_32 : f32 to vector<16x1xf32>
    %84 = arith.addf %80, %83 : vector<16x1xf32>
    %85 = math.rsqrt %84 : vector<16x1xf32>
    %86 = vector.broadcast %85 : vector<16x1xf32> to vector<16x32xf32>
    %87 = arith.mulf %82, %86 : vector<16x32xf32>
    %88 = vector.broadcast %68 : vector<1x32xf32> to vector<16x32xf32>
    %89 = arith.mulf %87, %88 : vector<16x32xf32>
    %90 = vector.broadcast %69 : vector<1x32xf32> to vector<16x32xf32>
    %91 = arith.addf %89, %90 : vector<16x32xf32>
    %92 = arith.truncf %91 : vector<16x32xf32> to vector<16x32xbf16>
    %c0_33 = arith.constant 0 : index
    %c0_34 = arith.constant 0 : index
    %93 = vector.load %arg10[%c0_33, %c0_34] : memref<32x128xbf16, #tpu.memory_space<vmem>>, vector<32x128xbf16>
    %cst_35 = arith.constant dense<0.000000e+00> : vector<16x128xf32>
    %94 = tpu.matmul %92, %93, %cst_35 {dimension_numbers = #tpu.dot_dimension_numbers<[1], [0], [0], [1], [0, 0, 1, 1], [], []>} : vector<16x32xbf16>, vector<32x128xbf16>, vector<16x128xf32> -> vector<16x128xf32>
    %c0_36 = arith.constant 0 : index
    %c0_37 = arith.constant 0 : index
    %95 = vector.load %arg11[%c0_36, %c0_37] : memref<1x128xf32, #tpu.memory_space<vmem>>, vector<1x128xf32>
    %96 = vector.broadcast %95 : vector<1x128xf32> to vector<16x128xf32>
    %97 = arith.addf %94, %96 : vector<16x128xf32>
    %cst_38 = arith.constant 1.702000e+00 : f32
    %98 = vector.broadcast %cst_38 : f32 to vector<16x128xf32>
    %99 = arith.mulf %98, %97 : vector<16x128xf32>
    %100 = arith.negf %99 : vector<16x128xf32>
    %101 = math.exp %100 : vector<16x128xf32>
    %cst_39 = arith.constant 1.000000e+00 : f32
    %102 = vector.broadcast %cst_39 : f32 to vector<16x128xf32>
    %103 = arith.addf %102, %101 : vector<16x128xf32>
    %104 = arith.divf %102, %103 : vector<16x128xf32>
    %105 = arith.mulf %97, %104 : vector<16x128xf32>
    %106 = arith.truncf %105 : vector<16x128xf32> to vector<16x128xbf16>
    %c0_40 = arith.constant 0 : index
    %c0_41 = arith.constant 0 : index
    %107 = vector.load %arg12[%c0_40, %c0_41] : memref<128x32xbf16, #tpu.memory_space<vmem>>, vector<128x32xbf16>
    %cst_42 = arith.constant dense<0.000000e+00> : vector<16x32xf32>
    %108 = tpu.matmul %106, %107, %cst_42 {dimension_numbers = #tpu.dot_dimension_numbers<[1], [0], [0], [1], [0, 0, 1, 1], [], []>} : vector<16x128xbf16>, vector<128x32xbf16>, vector<16x32xf32> -> vector<16x32xf32>
    %c0_43 = arith.constant 0 : index
    %c0_44 = arith.constant 0 : index
    %109 = vector.load %arg13[%c0_43, %c0_44] : memref<1x32xf32, #tpu.memory_space<vmem>>, vector<1x32xf32>
    %110 = vector.broadcast %109 : vector<1x32xf32> to vector<16x32xf32>
    %111 = arith.addf %108, %110 : vector<16x32xf32>
    %112 = arith.addf %67, %111 : vector<16x32xf32>
    %113 = vector.shape_cast %112 : vector<16x32xf32> to vector<2x8x32xf32>
    %c0_45 = arith.constant 0 : index
    %c0_46 = arith.constant 0 : index
    %c0_47 = arith.constant 0 : index
    %114 = vector.load %arg14[%c0_45, %c0_46, %c0_47] : memref<2x8x32xf32, #tpu.memory_space<vmem>>, vector<2x8x32xf32>
    tpu.vector_store %arg14[%c0_45, %c0_46, %c0_47], %113 {strides = array<i32>} : memref<2x8x32xf32, #tpu.memory_space<vmem>>, vector<2x8x32xf32>,
    return
  }
  func.func @transform_0(%arg0: i32) -> (i32, i32, i32) {
    %c0_i32 = arith.constant 0 : i32
    %c0_i32_0 = arith.constant 0 : i32
    %c0_i32_1 = arith.constant 0 : i32
    return %arg0, %c0_i32, %c0_i32_0 : i32, i32, i32
  }
  func.func @transform_1(%arg0: i32) -> (i32, i32) {
    %c0_i32 = arith.constant 0 : i32
    %c0_i32_0 = arith.constant 0 : i32
    %c0_i32_1 = arith.constant 0 : i32
    return %c0_i32, %c0_i32_0 : i32, i32
  }
  func.func @transform_2(%arg0: i32) -> (i32, i32) {
    %c0_i32 = arith.constant 0 : i32
    %c0_i32_0 = arith.constant 0 : i32
    %c0_i32_1 = arith.constant 0 : i32
    return %c0_i32, %c0_i32_0 : i32, i32
  }
  func.func @transform_3(%arg0: i32) -> (i32, i32) {
    %c0_i32 = arith.constant 0 : i32
    %c0_i32_0 = arith.constant 0 : i32
    %c0_i32_1 = arith.constant 0 : i32
    return %c0_i32, %c0_i32_0 : i32, i32
  }
  func.func @transform_4(%arg0: i32) -> (i32, i32) {
    %c0_i32 = arith.constant 0 : i32
    %c0_i32_0 = arith.constant 0 : i32
    %c0_i32_1 = arith.constant 0 : i32
    return %c0_i32, %c0_i32_0 : i32, i32
  }
  func.func @transform_5(%arg0: i32) -> (i32, i32) {
    %c0_i32 = arith.constant 0 : i32
    %c0_i32_0 = arith.constant 0 : i32
    %c0_i32_1 = arith.constant 0 : i32
    return %c0_i32, %c0_i32_0 : i32, i32
  }
  func.func @transform_6(%arg0: i32) -> (i32, i32) {
    %c0_i32 = arith.constant 0 : i32
    %c0_i32_0 = arith.constant 0 : i32
    %c0_i32_1 = arith.constant 0 : i32
    return %c0_i32, %c0_i32_0 : i32, i32
  }
  func.func @transform_7(%arg0: i32) -> (i32, i32) {
    %c0_i32 = arith.constant 0 : i32
    %c0_i32_0 = arith.constant 0 : i32
    %c0_i32_1 = arith.constant 0 : i32
    return %c0_i32, %c0_i32_0 : i32, i32
  }
  func.func @transform_8(%arg0: i32) -> (i32, i32) {
    %c0_i32 = arith.constant 0 : i32
    %c0_i32_0 = arith.constant 0 : i32
    %c0_i32_1 = arith.constant 0 : i32
    return %c0_i32, %c0_i32_0 : i32, i32
  }
  func.func @transform_9(%arg0: i32) -> (i32, i32) {
    %c0_i32 = arith.constant 0 : i32
    %c0_i32_0 = arith.constant 0 : i32
    %c0_i32_1 = arith.constant 0 : i32
    return %c0_i32, %c0_i32_0 : i32, i32
  }
  func.func @transform_10(%arg0: i32) -> (i32, i32) {
    %c0_i32 = arith.constant 0 : i32
    %c0_i32_0 = arith.constant 0 : i32
    %c0_i32_1 = arith.constant 0 : i32
    return %c0_i32, %c0_i32_0 : i32, i32
  }
  func.func @transform_11(%arg0: i32) -> (i32, i32) {
    %c0_i32 = arith.constant 0 : i32
    %c0_i32_0 = arith.constant 0 : i32
    %c0_i32_1 = arith.constant 0 : i32
    return %c0_i32, %c0_i32_0 : i32, i32
  }
  func.func @transform_12(%arg0: i32) -> (i32, i32) {
    %c0_i32 = arith.constant 0 : i32
    %c0_i32_0 = arith.constant 0 : i32
    %c0_i32_1 = arith.constant 0 : i32
    return %c0_i32, %c0_i32_0 : i32, i32
  }
  func.func @transform_13(%arg0: i32) -> (i32, i32, i32) {
    %c0_i32 = arith.constant 0 : i32
    %c0_i32_0 = arith.constant 0 : i32
    %c0_i32_1 = arith.constant 0 : i32
    return %arg0, %c0_i32, %c0_i32_0 : i32, i32, i32
  }
}

module attributes {stable_mosaic.version = 11 : i64} {
  func.func @_resblock_kernel(%arg0: i32, %arg1: memref<2x8x32xf32, #tpu.memory_space<vmem>>, %arg2: memref<1x32xf32, #tpu.memory_space<vmem>>, %arg3: memref<1x32xf32, #tpu.memory_space<vmem>>, %arg4: memref<32x96xbf16, #tpu.memory_space<vmem>>, %arg5: memref<1x96xf32, #tpu.memory_space<vmem>>, %arg6: memref<32x32xbf16, #tpu.memory_space<vmem>>, %arg7: memref<1x32xf32, #tpu.memory_space<vmem>>, %arg8: memref<1x32xf32, #tpu.memory_space<vmem>>, %arg9: memref<1x32xf32, #tpu.memory_space<vmem>>, %arg10: memref<32x128xbf16, #tpu.memory_space<vmem>>, %arg11: memref<1x128xf32, #tpu.memory_space<vmem>>, %arg12: memref<128x32xbf16, #tpu.memory_space<vmem>>, %arg13: memref<1x32xf32, #tpu.memory_space<vmem>>, %arg14: memref<2x8x32xf32, #tpu.memory_space<vmem>>) attributes {dimension_semantics = [#tpu.dimension_semantics<parallel>], iteration_bounds = array<i64: 4>, scalar_prefetch = 0 : i64, scratch_operands = 0 : i64, tpu.core_type = #tpu.core_type<tc>, window_params = [{transform_indices = @transform_0, window_bounds = array<i64: 2, 8, 32>}, {pipeline_mode = #tpu.pipeline_mode<synchronous>, transform_indices = @transform_1, window_bounds = array<i64: 1, 32>}, {pipeline_mode = #tpu.pipeline_mode<synchronous>, transform_indices = @transform_2, window_bounds = array<i64: 1, 32>}, {pipeline_mode = #tpu.pipeline_mode<synchronous>, transform_indices = @transform_3, window_bounds = array<i64: 32, 96>}, {pipeline_mode = #tpu.pipeline_mode<synchronous>, transform_indices = @transform_4, window_bounds = array<i64: 1, 96>}, {pipeline_mode = #tpu.pipeline_mode<synchronous>, transform_indices = @transform_5, window_bounds = array<i64: 32, 32>}, {pipeline_mode = #tpu.pipeline_mode<synchronous>, transform_indices = @transform_6, window_bounds = array<i64: 1, 32>}, {pipeline_mode = #tpu.pipeline_mode<synchronous>, transform_indices = @transform_7, window_bounds = array<i64: 1, 32>}, {pipeline_mode = #tpu.pipeline_mode<synchronous>, transform_indices = @transform_8, window_bounds = array<i64: 1, 32>}, {pipeline_mode = #tpu.pipeline_mode<synchronous>, transform_indices = @transform_9, window_bounds = array<i64: 32, 128>}, {pipeline_mode = #tpu.pipeline_mode<synchronous>, transform_indices = @transform_10, window_bounds = array<i64: 1, 128>}, {pipeline_mode = #tpu.pipeline_mode<synchronous>, transform_indices = @transform_11, window_bounds = array<i64: 128, 32>}, {pipeline_mode = #tpu.pipeline_mode<synchronous>, transform_indices = @transform_12, window_bounds = array<i64: 1, 32>}, {transform_indices = @transform_13, window_bounds = array<i64: 2, 8, 32>}]} {
    %c0 = arith.constant 0 : index
    %c0_0 = arith.constant 0 : index
    %c0_1 = arith.constant 0 : index
    %0 = vector.load %arg1[%c0, %c0_0, %c0_1] : memref<2x8x32xf32, #tpu.memory_space<vmem>>, vector<2x8x32xf32>
    %1 = vector.shape_cast %0 : vector<2x8x32xf32> to vector<16x32xf32>
    %c0_2 = arith.constant 0 : index
    %c0_3 = arith.constant 0 : index
    %2 = vector.load %arg2[%c0_2, %c0_3] : memref<1x32xf32, #tpu.memory_space<vmem>>, vector<1x32xf32>
    %c0_4 = arith.constant 0 : index
    %c0_5 = arith.constant 0 : index
    %3 = vector.load %arg3[%c0_4, %c0_5] : memref<1x32xf32, #tpu.memory_space<vmem>>, vector<1x32xf32>
    %cst = arith.constant dense<0.000000e+00> : vector<16xf32>
    %4 = vector.multi_reduction <add>, %1, %cst [1] : vector<16x32xf32> to vector<16xf32>
    %5 = vector.shape_cast %4 : vector<16xf32> to vector<16x1xf32>
    %cst_6 = arith.constant 3.200000e+01 : f32
    %6 = vector.broadcast %cst_6 : f32 to vector<16x1xf32>
    %7 = arith.divf %5, %6 : vector<16x1xf32>
    %8 = vector.broadcast %7 : vector<16x1xf32> to vector<16x32xf32>
    %9 = arith.subf %1, %8 : vector<16x32xf32>
    %10 = arith.mulf %9, %9 : vector<16x32xf32>
    %cst_7 = arith.constant dense<0.000000e+00> : vector<16xf32>
    %11 = vector.multi_reduction <add>, %10, %cst_7 [1] : vector<16x32xf32> to vector<16xf32>
    %12 = vector.shape_cast %11 : vector<16xf32> to vector<16x1xf32>
    %cst_8 = arith.constant 3.200000e+01 : f32
    %13 = vector.broadcast %cst_8 : f32 to vector<16x1xf32>
    %14 = arith.divf %12, %13 : vector<16x1xf32>
    %15 = vector.broadcast %7 : vector<16x1xf32> to vector<16x32xf32>
    %16 = arith.subf %1, %15 : vector<16x32xf32>
    %cst_9 = arith.constant 9.99999974E-6 : f32
    %17 = vector.broadcast %cst_9 : f32 to vector<16x1xf32>
    %18 = arith.addf %14, %17 : vector<16x1xf32>
    %19 = math.rsqrt %18 : vector<16x1xf32>
    %20 = vector.broadcast %19 : vector<16x1xf32> to vector<16x32xf32>
    %21 = arith.mulf %16, %20 : vector<16x32xf32>
    %22 = vector.broadcast %2 : vector<1x32xf32> to vector<16x32xf32>
    %23 = arith.mulf %21, %22 : vector<16x32xf32>
    %24 = vector.broadcast %3 : vector<1x32xf32> to vector<16x32xf32>
    %25 = arith.addf %23, %24 : vector<16x32xf32>
    %26 = arith.truncf %25 : vector<16x32xf32> to vector<16x32xbf16>
    %c0_10 = arith.constant 0 : index
    %c0_11 = arith.constant 0 : index
    %27 = vector.load %arg4[%c0_10, %c0_11] : memref<32x96xbf16, #tpu.memory_space<vmem>>, vector<32x96xbf16>
    %cst_12 = arith.constant dense<0.000000e+00> : vector<16x96xf32>
    %28 = tpu.matmul %26, %27, %cst_12 {dimension_numbers = #tpu.dot_dimension_numbers<[1], [0], [0], [1], [0, 0, 1, 1], [], []>} : vector<16x32xbf16>, vector<32x96xbf16>, vector<16x96xf32> -> vector<16x96xf32>
    %c0_13 = arith.constant 0 : index
    %c0_14 = arith.constant 0 : index
    %29 = vector.load %arg5[%c0_13, %c0_14] : memref<1x96xf32, #tpu.memory_space<vmem>>, vector<1x96xf32>
    %30 = vector.broadcast %29 : vector<1x96xf32> to vector<16x96xf32>
    %31 = arith.addf %28, %30 : vector<16x96xf32>
    %32 = arith.truncf %31 : vector<16x96xf32> to vector<16x96xbf16>
    %33 = vector.extract_strided_slice %32 {offsets = [0, 0], sizes = [16, 32], strides = [1, 1]} : vector<16x96xbf16> to vector<16x32xbf16>
    %34 = vector.shape_cast %33 : vector<16x32xbf16> to vector<2x8x4x8xbf16>
    %35 = tpu.transpose %34, [0, 2, 1, 3] : vector<2x8x4x8xbf16> -> vector<2x4x8x8xbf16>
    %36 = vector.shape_cast %35 : vector<2x4x8x8xbf16> to vector<8x8x8xbf16>
    %37 = vector.extract_strided_slice %32 {offsets = [0, 32], sizes = [16, 32], strides = [1, 1]} : vector<16x96xbf16> to vector<16x32xbf16>
    %38 = vector.shape_cast %37 : vector<16x32xbf16> to vector<2x8x4x8xbf16>
    %39 = tpu.transpose %38, [0, 2, 1, 3] : vector<2x8x4x8xbf16> -> vector<2x4x8x8xbf16>
    %40 = vector.shape_cast %39 : vector<2x4x8x8xbf16> to vector<8x8x8xbf16>
    %41 = vector.extract_strided_slice %32 {offsets = [0, 64], sizes = [16, 32], strides = [1, 1]} : vector<16x96xbf16> to vector<16x32xbf16>
    %42 = vector.shape_cast %41 : vector<16x32xbf16> to vector<2x8x4x8xbf16>
    %43 = tpu.transpose %42, [0, 2, 1, 3] : vector<2x8x4x8xbf16> -> vector<2x4x8x8xbf16>
    %44 = vector.shape_cast %43 : vector<2x4x8x8xbf16> to vector<8x8x8xbf16>
    "tpu.trace_start"() <{level = 10 : i32, message = "bqd,bkd->bqk"}> : () -> ()
    %cst_15 = arith.constant dense<0.000000e+00> : vector<8x8x8xf32>
    %45 = tpu.matmul %36, %40, %cst_15 {dimension_numbers = #tpu.dot_dimension_numbers<[2], [2], [1], [1], [0, 0, 0, 1, 1, 1], [0], [0]>} : vector<8x8x8xbf16>, vector<8x8x8xbf16>, vector<8x8x8xf32> -> vector<8x8x8xf32>
    "tpu.trace_stop"() : () -> ()
    %cst_16 = arith.constant dense<0xFF800000> : vector<8x8xf32>
    %46 = vector.multi_reduction <maximumf>, %45, %cst_16 [2] : vector<8x8x8xf32> to vector<8x8xf32>
    %47 = vector.shape_cast %46 : vector<8x8xf32> to vector<8x8x1xf32>
    %48 = vector.broadcast %47 : vector<8x8x1xf32> to vector<8x8x8xf32>
    %49 = arith.subf %45, %48 : vector<8x8x8xf32>
    %50 = math.exp %49 : vector<8x8x8xf32>
    %cst_17 = arith.constant dense<0.000000e+00> : vector<8x8xf32>
    %51 = vector.multi_reduction <add>, %50, %cst_17 [2] : vector<8x8x8xf32> to vector<8x8xf32>
    %52 = vector.shape_cast %51 : vector<8x8xf32> to vector<8x8x1xf32>
    %53 = tpu.reciprocal %52 {approx = true} : vector<8x8x1xf32> -> vector<8x8x1xf32>
    %54 = vector.broadcast %53 : vector<8x8x1xf32> to vector<8x8x8xf32>
    %55 = arith.mulf %50, %54 : vector<8x8x8xf32>
    %56 = arith.truncf %55 : vector<8x8x8xf32> to vector<8x8x8xbf16>
    "tpu.trace_start"() <{level = 10 : i32, message = "bqk,bkd->bqd"}> : () -> ()
    %cst_18 = arith.constant dense<0.000000e+00> : vector<8x8x8xf32>
    %57 = tpu.matmul %56, %44, %cst_18 {dimension_numbers = #tpu.dot_dimension_numbers<[2], [1], [1], [2], [0, 0, 0, 1, 1, 2], [0], [0]>} : vector<8x8x8xbf16>, vector<8x8x8xbf16>, vector<8x8x8xf32> -> vector<8x8x8xf32>
    "tpu.trace_stop"() : () -> ()
    %58 = vector.shape_cast %57 : vector<8x8x8xf32> to vector<2x4x8x8xf32>
    %59 = tpu.transpose %58, [0, 2, 1, 3] : vector<2x4x8x8xf32> -> vector<2x8x4x8xf32>
    %60 = vector.shape_cast %59 : vector<2x8x4x8xf32> to vector<16x32xf32>
    %61 = arith.truncf %60 : vector<16x32xf32> to vector<16x32xbf16>
    %c0_19 = arith.constant 0 : index
    %c0_20 = arith.constant 0 : index
    %62 = vector.load %arg6[%c0_19, %c0_20] : memref<32x32xbf16, #tpu.memory_space<vmem>>, vector<32x32xbf16>
    %cst_21 = arith.constant dense<0.000000e+00> : vector<16x32xf32>
    %63 = tpu.matmul %61, %62, %cst_21 {dimension_numbers = #tpu.dot_dimension_numbers<[1], [0], [0], [1], [0, 0, 1, 1], [], []>} : vector<16x32xbf16>, vector<32x32xbf16>, vector<16x32xf32> -> vector<16x32xf32>
    %c0_22 = arith.constant 0 : index
    %c0_23 = arith.constant 0 : index
    %64 = vector.load %arg7[%c0_22, %c0_23] : memref<1x32xf32, #tpu.memory_space<vmem>>, vector<1x32xf32>
    %65 = vector.broadcast %64 : vector<1x32xf32> to vector<16x32xf32>
    %66 = arith.addf %63, %65 : vector<16x32xf32>
    %67 = arith.addf %1, %66 : vector<16x32xf32>
    %c0_24 = arith.constant 0 : index
    %c0_25 = arith.constant 0 : index
    %68 = vector.load %arg8[%c0_24, %c0_25] : memref<1x32xf32, #tpu.memory_space<vmem>>, vector<1x32xf32>
    %c0_26 = arith.constant 0 : index
    %c0_27 = arith.constant 0 : index
    %69 = vector.load %arg9[%c0_26, %c0_27] : memref<1x32xf32, #tpu.memory_space<vmem>>, vector<1x32xf32>
    %cst_28 = arith.constant dense<0.000000e+00> : vector<16xf32>
    %70 = vector.multi_reduction <add>, %67, %cst_28 [1] : vector<16x32xf32> to vector<16xf32>
    %71 = vector.shape_cast %70 : vector<16xf32> to vector<16x1xf32>
    %cst_29 = arith.constant 3.200000e+01 : f32
    %72 = vector.broadcast %cst_29 : f32 to vector<16x1xf32>
    %73 = arith.divf %71, %72 : vector<16x1xf32>
    %74 = vector.broadcast %73 : vector<16x1xf32> to vector<16x32xf32>
    %75 = arith.subf %67, %74 : vector<16x32xf32>
    %76 = arith.mulf %75, %75 : vector<16x32xf32>
    %cst_30 = arith.constant dense<0.000000e+00> : vector<16xf32>
    %77 = vector.multi_reduction <add>, %76, %cst_30 [1] : vector<16x32xf32> to vector<16xf32>
    %78 = vector.shape_cast %77 : vector<16xf32> to vector<16x1xf32>
    %cst_31 = arith.constant 3.200000e+01 : f32
    %79 = vector.broadcast %cst_31 : f32 to vector<16x1xf32>
    %80 = arith.divf %78, %79 : vector<16x1xf32>
    %81 = vector.broadcast %73 : vector<16x1xf32> to vector<16x32xf32>
    %82 = arith.subf %67, %81 : vector<16x32xf32>
    %cst_32 = arith.constant 9.99999974E-6 : f32
    %83 = vector.broadcast %cst_32 : f32 to vector<16x1xf32>
    %84 = arith.addf %80, %83 : vector<16x1xf32>
    %85 = math.rsqrt %84 : vector<16x1xf32>
    %86 = vector.broadcast %85 : vector<16x1xf32> to vector<16x32xf32>
    %87 = arith.mulf %82, %86 : vector<16x32xf32>
    %88 = vector.broadcast %68 : vector<1x32xf32> to vector<16x32xf32>
    %89 = arith.mulf %87, %88 : vector<16x32xf32>
    %90 = vector.broadcast %69 : vector<1x32xf32> to vector<16x32xf32>
    %91 = arith.addf %89, %90 : vector<16x32xf32>
    %92 = arith.truncf %91 : vector<16x32xf32> to vector<16x32xbf16>
    %c0_33 = arith.constant 0 : index
    %c0_34 = arith.constant 0 : index
    %93 = vector.load %arg10[%c0_33, %c0_34] : memref<32x128xbf16, #tpu.memory_space<vmem>>, vector<32x128xbf16>
    %cst_35 = arith.constant dense<0.000000e+00> : vector<16x128xf32>
    %94 = tpu.matmul %92, %93, %cst_35 {dimension_numbers = #tpu.dot_dimension_numbers<[1], [0], [0], [1], [0, 0, 1, 1], [], []>} : vector<16x32xbf16>, vector<32x128xbf16>, vector<16x128xf32> -> vector<16x128xf32>
    %c0_36 = arith.constant 0 : index
    %c0_37 = arith.constant 0 : index
    %95 = vector.load %arg11[%c0_36, %c0_37] : memref<1x128xf32, #tpu.memory_space<vmem>>, vector<1x128xf32>
    %96 = vector.broadcast %95 : vector<1x128xf32> to vector<16x128xf32>
    %97 = arith.addf %94, %96 : vector<16x128xf32>
    %cst_38 = arith.constant 1.702000e+00 : f32
    %98 = vector.broadcast %cst_38 : f32 to vector<16x128xf32>
    %99 = arith.mulf %98, %97 : vector<16x128xf32>
    %100 = arith.negf %99 : vector<16x128xf32>
    %101 = math.exp %100 : vector<16x128xf32>
    %cst_39 = arith.constant 1.000000e+00 : f32
    %102 = vector.broadcast %cst_39 : f32 to vector<16x128xf32>
    %103 = arith.addf %102, %101 : vector<16x128xf32>
    %104 = arith.divf %102, %103 : vector<16x128xf32>
    %105 = arith.mulf %97, %104 : vector<16x128xf32>
    %106 = arith.truncf %105 : vector<16x128xf32> to vector<16x128xbf16>
    %c0_40 = arith.constant 0 : index
    %c0_41 = arith.constant 0 : index
    %107 = vector.load %arg12[%c0_40, %c0_41] : memref<128x32xbf16, #tpu.memory_space<vmem>>, vector<128x32xbf16>
    %cst_42 = arith.constant dense<0.000000e+00> : vector<16x32xf32>
    %108 = tpu.matmul %106, %107, %cst_42 {dimension_numbers = #tpu.dot_dimension_numbers<[1], [0], [0], [1], [0, 0, 1, 1], [], []>} : vector<16x128xbf16>, vector<128x32xbf16>, vector<16x32xf32> -> vector<16x32xf32>
    %c0_43 = arith.constant 0 : index
    %c0_44 = arith.constant 0 : index
    %109 = vector.load %arg13[%c0_43, %c0_44] : memref<1x32xf32, #tpu.memory_space<vmem>>, vector<1x32xf32>
    %110 = vector.broadcast %109 : vector<1x32xf32> to vector<16x32xf32>
    %111 = arith.addf %108, %110 : vector<16x32xf32>
    %112 = arith.addf %67, %111 : vector<16x32xf32>
    %113 = vector.shape_cast %112 : vector<16x32xf32> to vector<2x8x32xf32>
    %c0_45 = arith.constant 0 : index
    %c0_46 = arith.constant 0 : index
    %c0_47 = arith.constant 0 : index
    %114 = vector.load %arg14[%c0_45, %c0_46, %c0_47] : memref<2x8x32xf32, #tpu.memory_space<vmem>>, vector<2x8x32xf32>
    tpu.vector_store %arg14[%c0_45, %c0_46, %c0_47], %113 {strides = array<i32>} : memref<2x8x32xf32, #tpu.memory_space<vmem>>, vector<2x8x32xf32>,
    return
  }
  func.func @transform_0(%arg0: i32) -> (i32, i32, i32) {
    %c0_i32 = arith.constant 0 : i32
    %c0_i32_0 = arith.constant 0 : i32
    %c0_i32_1 = arith.constant 0 : i32
    return %arg0, %c0_i32, %c0_i32_0 : i32, i32, i32
  }
  func.func @transform_1(%arg0: i32) -> (i32, i32) {
    %c0_i32 = arith.constant 0 : i32
    %c0_i32_0 = arith.constant 0 : i32
    %c0_i32_1 = arith.constant 0 : i32
    return %c0_i32, %c0_i32_0 : i32, i32
  }
  func.func @transform_2(%arg0: i32) -> (i32, i32) {
    %c0_i32 = arith.constant 0 : i32
    %c0_i32_0 = arith.constant 0 : i32
    %c0_i32_1 = arith.constant 0 : i32
    return %c0_i32, %c0_i32_0 : i32, i32
  }
  func.func @transform_3(%arg0: i32) -> (i32, i32) {
    %c0_i32 = arith.constant 0 : i32
    %c0_i32_0 = arith.constant 0 : i32
    %c0_i32_1 = arith.constant 0 : i32
    return %c0_i32, %c0_i32_0 : i32, i32
  }
  func.func @transform_4(%arg0: i32) -> (i32, i32) {
    %c0_i32 = arith.constant 0 : i32
    %c0_i32_0 = arith.constant 0 : i32
    %c0_i32_1 = arith.constant 0 : i32
    return %c0_i32, %c0_i32_0 : i32, i32
  }
  func.func @transform_5(%arg0: i32) -> (i32, i32) {
    %c0_i32 = arith.constant 0 : i32
    %c0_i32_0 = arith.constant 0 : i32
    %c0_i32_1 = arith.constant 0 : i32
    return %c0_i32, %c0_i32_0 : i32, i32
  }
  func.func @transform_6(%arg0: i32) -> (i32, i32) {
    %c0_i32 = arith.constant 0 : i32
    %c0_i32_0 = arith.constant 0 : i32
    %c0_i32_1 = arith.constant 0 : i32
    return %c0_i32, %c0_i32_0 : i32, i32
  }
  func.func @transform_7(%arg0: i32) -> (i32, i32) {
    %c0_i32 = arith.constant 0 : i32
    %c0_i32_0 = arith.constant 0 : i32
    %c0_i32_1 = arith.constant 0 : i32
    return %c0_i32, %c0_i32_0 : i32, i32
  }
  func.func @transform_8(%arg0: i32) -> (i32, i32) {
    %c0_i32 = arith.constant 0 : i32
    %c0_i32_0 = arith.constant 0 : i32
    %c0_i32_1 = arith.constant 0 : i32
    return %c0_i32, %c0_i32_0 : i32, i32
  }
  func.func @transform_9(%arg0: i32) -> (i32, i32) {
    %c0_i32 = arith.constant 0 : i32
    %c0_i32_0 = arith.constant 0 : i32
    %c0_i32_1 = arith.constant 0 : i32
    return %c0_i32, %c0_i32_0 : i32, i32
  }
  func.func @transform_10(%arg0: i32) -> (i32, i32) {
    %c0_i32 = arith.constant 0 : i32
    %c0_i32_0 = arith.constant 0 : i32
    %c0_i32_1 = arith.constant 0 : i32
    return %c0_i32, %c0_i32_0 : i32, i32
  }
  func.func @transform_11(%arg0: i32) -> (i32, i32) {
    %c0_i32 = arith.constant 0 : i32
    %c0_i32_0 = arith.constant 0 : i32
    %c0_i32_1 = arith.constant 0 : i32
    return %c0_i32, %c0_i32_0 : i32, i32
  }
  func.func @transform_12(%arg0: i32) -> (i32, i32) {
    %c0_i32 = arith.constant 0 : i32
    %c0_i32_0 = arith.constant 0 : i32
    %c0_i32_1 = arith.constant 0 : i32
    return %c0_i32, %c0_i32_0 : i32, i32
  }
  func.func @transform_13(%arg0: i32) -> (i32, i32, i32) {
    %c0_i32 = arith.constant 0 : i32
    %c0_i32_0 = arith.constant 0 : i32
    %c0_i32_1 = arith.constant 0 : i32
    return %arg0, %c0_i32, %c0_i32_0 : i32, i32, i32
  }
}

</mosaic_0001>

<bundles_post_ra>
// kernel: transformer_forward.2
= control target key start
LH: loop header
LB: loop body
LE: loop exit
PB: predicated region body
PF: predicated region fallthrough
CT: control target
= control target key end

     0   :  { %s3367_s25 = smov 0   ;;  %s3868_s0 = inlined_call_operand.vmem [shape: f32[8,8,32], index: 0, kind: input, shape index: {}, may-alias: {0,13}]   ;;  %s3869_s1 = inlined_call_operand.vmem [shape: f32[1,32], index: 1, kind: input, shape index: {}]   ;;  %s3870_s2 = inlined_call_operand.vmem [shape: f32[1,32], index: 2, kind: input, shape index: {}]   ;;  %s3871_s3 = inlined_call_operand.vmem [shape: bf16[32,96], index: 3, kind: input, shape index: {}]   ;;  %s3872_s4 = inlined_call_operand.vmem [shape: f32[1,96], index: 4, kind: input, shape index: {}]   ;;  %s3873_s5 = inlined_call_operand.vmem [shape: bf16[32,32], index: 5, kind: input, shape index: {}]   ;;  %s3874_s6 = inlined_call_operand.vmem [shape: f32[1,32], index: 6, kind: input, shape index: {}]   ;;  %s3875_s7 = inlined_call_operand.vmem [shape: f32[1,32], index: 7, kind: input, shape index: {}]   ;;  %s3876_s8 = inlined_call_operand.vmem [shape: f32[1,32], index: 8, kind: input, shape index: {}]   ;;  %s3877_s9 = inlined_call_operand.vmem [shape: bf16[32,128], index: 9, kind: input, shape index: {}]   ;;  %s3878_s10 = inlined_call_operand.vmem [shape: f32[1,128], index: 10, kind: input, shape index: {}]   ;;  %s3879_s11 = inlined_call_operand.vmem [shape: bf16[128,32], index: 11, kind: input, shape index: {}]   ;;  %s3880_s12 = inlined_call_operand.vmem [shape: f32[1,32], index: 12, kind: input, shape index: {}]   ;;  %s3881_s13 = inlined_call_operand.vmem [shape: f32[8,8,32], index: 13, kind: output, shape index: {}, may-alias: {0,13}]  }
   0x1 LB: > { %s2916_s26 = sadd.s32 4294967295, %s3282_s25   ;;  %p2920_p0 = scmp.ge.s32.totalorder %s3282_s25, 1  ;;  %s3282_s25 = sphi %s3367_s25, %s23_s25  }
   0x2   : > { %p388_p1 = scmp.lt.s32.totalorder %s3282_s25, 5 }
   0x4   : > { %p389_p2 = pnand %p2920_p0, %p388_p1 }
   0x5   : > { %s2921_s27 = sshll.u32 (!%p389_p2), %s2916_s26, 1  ;;  %s3286_s26 = smov (!%p389_p2), 112  }
   0x6   : > { %392 = sbr.rel (%p389_p2) target bundleno = 2664 (0xa68), region = 72  ;;  %p433_p3 = scmp.lt.s32.totalorder (!%p389_p2), %s2921_s27, 7 }
   0x7   : > { %s3287_s29 = smov (!%p389_p2), 120   ;;  %s3288_s30 = smov (!%p389_p2), 104  }
   0x8   : > { %s3289_s15 = smov (!%p389_p2), 96   ;;  %s3293_s16 = smov (!%p389_p2), 64  }
   0x9   : > { %s3294_s21 = smov (!%p389_p2), 16   ;;  %s3295_s22 = smov (!%p389_p2), 8  }
   0xa   : > { %s3296_s23 = smov (!%p389_p2), 24  }
   0xb   : > { %s3883_s27 = smov (!%p433_p3, %s2921_s27), 7  ;;  %vm449_vm0 = vcmask 261120   ;;  %v3212_v14 = vld [vmem:[%s3871_s3 + $0x8] sm:$0xff]   ;;  %v3284_v15 = vmov 0.0   ;;  %vm3285_vm1 = vmmov 0   ;;  %v3213_v16 = vld [vmem:[%s3871_s3] sm:$0xff]   ;;  %v595_v47 = vlaneseq }
   0xc   : > { %s2922_s28 = sshll.u32 %s3883_s27, 3  ;;  %3036 = vmatprep.subr.bf16.mxu0 %v3284_v15  ;;  %3040 = vmatprep.mubr.msk.bf16.mxu0 %vm3285_vm1, %v3284_v15  ;;  %v2925_v25 = vld [vmem:[%s3869_s1] ss:$0 sm:$0xff]  ;;  %v3290_v45 = vmov 1983009808   ;;  %vm1407_vm2 = vcmask 64512  }
   0xd   : > { %s3383_s14 = scalar_lea.vmem %s3868_s0, %s2922_s28  ;;  %3037 = vmatpush3.bf16.msra.mxu0 %v3212_v14  ;;  %3056 = vmatprep.subr.bf16.mxu1 %v3284_v15  ;;  %v2926_v29 = vld [vmem:[%s3870_s2] ss:$0 sm:$0xff]  ;;  %v593_v46 = vunpack.c.l.s4 %v3290_v45  ;;  %v596_v49 = vshrl.u32 %v595_v47, 7  ;;  %v3291_v53 = vmov 1934713408   ;;  %vm1875_vm3 = vcmask 1043456  }
   0xe   : > { %v445_v0 = vld [vmem:[%s3383_s14] sm:$0xff]  ;;  %v446_v1 = vld [vmem:[%s3383_s14 + $0x8] sm:$0xff]  ;;  %3038 = vmatprep.subr.bf16.mxu0 %v3284_v15  ;;  %3058 = vmatprep.mubr.msk.bf16.mxu1 %vm3285_vm1, %v3284_v15  ;;  %v624_v54 = vunpack.c.l.s4 %v3291_v53  ;;  %vm2539_vm4 = vcmask 130048   ;;  %vm2542_vm5 = vcmask 195584  }
   0xf   : > { %v450_v2 = vsel %vm449_vm0, %v445_v0, 0.0  ;;  %v453_v3 = vsel %vm449_vm0, %v446_v1, 0.0  ;;  %v2927_v35 = vld [vmem:[%s3872_s4] ss:$0 sm:$0xff]  ;;  %v594_v48 = vunpack.c.0.s8 %v593_v46 }
  0x10   : > { %451 = vadd.xlane.f32.xlu0 %v450_v2  ;;  %v625_v61 = vunpack.c.0.s8 %v624_v54 }
  0x11   : > { %3039 = vmatpush3.bf16.msra.mxu0 %v3213_v16  ;;  %v3437_v56 = vsub.s32 %v594_v48, %v596_v49 }
  0x12   : > { %3044 = vmatprep.subr.bf16.mxu0 %v3284_v15 }
  0x14   : > { %454 = vadd.xlane.f32.xlu0 %v453_v3 }
  0x99   : > { %v452_v4 = vpop.xlane.xlu0 %451 }
  0x9a   : > { %v457_v5 = vmul.f32 0.03125, %v452_v4  ;;  %v3450_v4 = vsub.s32 %v625_v61, %v596_v49 }
  0x9c   : > { %v459_v6 = vsub.f32 %v445_v0, %v457_v5 }
  0x9d   : > { %v455_v7 = vpop.xlane.xlu0 %454 }
  0x9e   : > { %v458_v8 = vmul.f32 0.03125, %v455_v7  ;;  %v461_v9 = vmul.f32 %v459_v6, %v459_v6 }
  0xa0   : > { %v460_v10 = vsub.f32 %v446_v1, %v458_v8  ;;  %v463_v11 = vsel %vm449_vm0, %v461_v9, 0.0  ;;  %v3292_v1 = vmov 0  }
  0xa1   : > { %464 = vadd.xlane.f32.xlu1 %v463_v11  ;;  %v3447_v2 = vpack.i.b16 %v3292_v1, %v3292_v1 }
  0xa2   : > { %v462_v12 = vmul.f32 %v460_v10, %v460_v10 }
  0xa4   : > { %v466_v13 = vsel %vm449_vm0, %v462_v12, 0.0 }
  0xa5   : > { %467 = vadd.xlane.f32.xlu1 %v466_v13 }
 0x12a   : > { %v465_v17 = vpop.xlane.xlu1 %464 }
 0x12b   : > { %v469_v18 = vmul.f32 0.03125, %v465_v17 }
 0x12d   : > { %v471_v19 = vadd.f32 1e-05, %v469_v18 }
 0x12e   : > { %v468_v20 = vpop.xlane.xlu1 %467 }
 0x12f   : > { %3226 = vrsqrt.f32 %v471_v19  ;;  %v470_v21 = vmul.f32 0.03125, %v468_v20 }
 0x131   : > { %v472_v22 = vadd.f32 1e-05, %v470_v21 }
 0x133   : > { %3228 = vrsqrt.f32 %v472_v22 }
 0x13c   : > { %v3227_v23 = vpop.eup %3226 }
 0x13d   : > { %v475_v24 = vmul.f32 %v3227_v23, %v459_v6 }
 0x13f   : > { %v483_v28 = vmul.f32 %v2925_v25, %v475_v24 }
 0x140   : > { %v3229_v26 = vpop.eup %3228 }
 0x141   : > { %v476_v27 = vmul.f32 %v3229_v26, %v460_v10  ;;  %v491_v31 = vadd.f32 %v2926_v29, %v483_v28 }
 0x143   : > { %v484_v30 = vmul.f32 %v2925_v25, %v476_v27 }
 0x145   : > { %v492_v32 = vadd.f32 %v2926_v29, %v484_v30 }
 0x147   : > { %v493_v33 = vpack.c.bf16 %v492_v32, %v491_v31 }
 0x149   : > { %3041 = vmatmul.mubr.msk.bf16.vlgmr.msra.gmra.mxu0 %vm449_vm0, %v493_v33 }
 0x14a   : > { %3046 = vmatprep.mubr.msk.bf16.mxu0 %vm3285_vm1, %v3284_v15 }
 0x209   : > { %v554_v34 = vpop.f32.mrf.mxu0 }
 0x20a   : > { %v555_v38 = vadd.f32 %v2927_v35, %v554_v34 }
 0x20b   : > { %v3042_v36 = vpop.f32.mrf.mxu0 }
 0x20d   : > { %v557_v37 = vpop.f32.mrf.mxu0 }
 0x20e   : > { %v558_v39 = vadd.f32 %v2927_v35, %v557_v37 }
 0x20f   : > { %v3043_v40 = vpop.f32.mrf.mxu0 }
 0x210   : > { %v3417_v41 = vpack.c.bf16 %v558_v39, %v555_v38 }
 0x212   : > { %565 = vrot.lane.b32.xlu1 %v3417_v41, %s3286_s26  ;;  %563 = vrot.lane.b32.xlu0 %v3417_v41, %s3287_s29  ;;  %v573_v58 = vshrl.u32 %v3417_v41, 16 }
 0x216   : > { %567 = vrot.lane.b32.xlu1 %v3417_v41, %s3288_s30  ;;  %s442_s30 = scalar_lea.vmem %s3881_s13, %s2922_s28 }
 0x21a   : > { %847 = vrot.lane.b32.xlu1 %v3417_v41, %s3289_s15 }
 0x284   : > { %v3423_v42 = vpop.permute.xlu1 %565  ;;  %v3425_v43 = vpop.permute.xlu0 %563 }
 0x285   : > { %851 = vrot.lane.b32.xlu1 %v3423_v42, %s3289_s15  ;;  %849 = vrot.lane.b32.xlu0 %v3425_v43, %s3289_s15  ;;  %v581_v51 = vshrl.u32 %v3423_v42, 16  ;;  %v574_v52 = vshrl.u32 %v3425_v43, 16  ;;  %v571_v57 = vpack.i.b16 %v3425_v43, %v3417_v41 }
 0x287   : > { %v575_v60 = vpack.i.b16 %v574_v52, %v573_v58  ;;  %v598_v63 = vrot.slane %v571_v57, %v3437_v56  ;;  %v591_v12 = vcombine.high %v571_v57, %v3447_v2 }
 0x288   : > { %v3429_v44 = vpop.permute.xlu1 %567 }
 0x289   : > { %853 = vrot.lane.b32.xlu0 %v3429_v44, %s3289_s15  ;;  %v582_v50 = vshrl.u32 %v3429_v44, 16  ;;  %v579_v55 = vpack.i.b16 %v3429_v44, %v3423_v42  ;;  %v664_v3 = vrot.slane %v575_v60, %v3437_v56  ;;  %v657_v13 = vcombine.high %v575_v60, %v3447_v2 }
 0x28a   : > { %v3468_v27 = vrot.slane %v591_v12, %v3437_v56 }
 0x28b   : > { %v583_v59 = vpack.i.b16 %v582_v50, %v581_v51  ;;  %v613_v62 = vrot.slane %v579_v55, %v3437_v56  ;;  %v606_v17 = vcombine.high %v579_v55, %v3447_v2  ;;  %v3471_v28 = vrot.slane %v657_v13, %v3437_v56 }
 0x28c   : > { %v848_v7 = vpop.permute.xlu1 %847 }
 0x28d   : > { %v679_v0 = vrot.slane %v583_v59, %v3437_v56  ;;  %v621_v5 = vcombine.low %v598_v63, %v613_v62  ;;  %v622_v6 = vcombine.high %v598_v63, %v613_v62  ;;  %v672_v8 = vcombine.high %v583_v59, %v3447_v2 }
 0x28e   : > { %v859_v20 = vshrl.u32 %v848_v7, 16  ;;  %v3475_v31 = vrot.slane %v606_v17, %v3437_v56 }
 0x28f   : > { %v687_v9 = vcombine.low %v664_v3, %v679_v0  ;;  %v688_v10 = vcombine.high %v664_v3, %v679_v0  ;;  %v3457_v18 = vrot.slane %v621_v5, %v3450_v4  ;;  %v3460_v19 = vrot.slane %v622_v6, %v3450_v4 }
 0x290   : > { %v3463_v22 = vrot.slane %v672_v8, %v3437_v56 }
 0x291   : > { %v695_v23 = vrot.slane %v687_v9, %v3450_v4  ;;  %v702_v24 = vrot.slane %v688_v10, %v3450_v4  ;;  %v723_v32 = vcombine.low %v3457_v18, %v3460_v19  ;;  %v2931_v35 = vcombine.high %v3457_v18, %v3460_v19 }
 0x292   : > { %v703_v39 = vcombine.low %v3471_v28, %v3463_v22 }
 0x293   : > { %v748_v40 = vcombine.low %v695_v23, %v702_v24  ;;  %v2932_v51 = vcombine.high %v695_v23, %v702_v24 }
 0x295   : > { %v755_v12 = vrot.slane %v748_v40, %v3437_v56 }
 0x2f7   : > { %v850_v11 = vpop.permute.xlu0 %849  ;;  %v852_v21 = vpop.permute.xlu1 %851 }
 0x2f8   : > { %v857_v14 = vpack.i.b16 %v850_v11, %v848_v7  ;;  %v860_v16 = vshrl.u32 %v850_v11, 16  ;;  %v867_v33 = vshrl.u32 %v852_v21, 16  ;;  %v704_v11 = vcombine.high %v3471_v28, %v3463_v22 }
 0x2fa   : > { %v861_v25 = vpack.i.b16 %v860_v16, %v859_v20  ;;  %v871_v29 = vcombine.high %v857_v14, %v3447_v2  ;;  %v878_v36 = vrot.slane %v857_v14, %v3437_v56  ;;  %v763_v20 = vrot.slane %v2932_v51, %v3437_v56 }
 0x2fb   : > { %v854_v26 = vpop.permute.xlu0 %853 }
 0x2fc   : > { %v865_v30 = vpack.i.b16 %v854_v26, %v852_v21  ;;  %v868_v34 = vshrl.u32 %v854_v26, 16  ;;  %v937_v45 = vcombine.high %v861_v25, %v3447_v2  ;;  %v885_v47 = vrot.slane %v871_v29, %v3437_v56 }
 0x2fd   : > { %v944_v52 = vrot.slane %v861_v25, %v3437_v56  ;;  %v637_v29 = vcombine.low %v3468_v27, %v3475_v31 }
 0x2fe   : > { %v886_v37 = vcombine.high %v865_v30, %v3447_v2  ;;  %v893_v38 = vrot.slane %v865_v30, %v3437_v56  ;;  %v869_v46 = vpack.i.b16 %v868_v34, %v867_v33  ;;  %v951_v60 = vrot.slane %v937_v45, %v3437_v56 }
 0x2ff   : > { %v638_v30 = vcombine.high %v3468_v27, %v3475_v31  ;;  %v730_v33 = vrot.slane %v723_v32, %v3437_v56  ;;  %v738_v34 = vrot.slane %v2931_v35, %v3437_v56  ;;  %v711_v45 = vrot.slane %v703_v39, %v3450_v4 }
 0x300   : > { %v900_v48 = vrot.slane %v886_v37, %v3437_v56  ;;  %v901_v49 = vcombine.low %v878_v36, %v893_v38  ;;  %v902_v50 = vcombine.high %v878_v36, %v893_v38  ;;  %v952_v53 = vcombine.high %v869_v46, %v3447_v2 }
 0x301   : > { %v959_v54 = vrot.slane %v869_v46, %v3437_v56  ;;  %v718_v46 = vrot.slane %v704_v11, %v3450_v4  ;;  %v645_v32 = vrot.slane %v637_v29, %v3450_v4  ;;  %v652_v35 = vrot.slane %v638_v30, %v3450_v4 }
 0x302   : > { %v909_v55 = vrot.slane %v901_v49, %v3450_v4  ;;  %v916_v57 = vrot.slane %v902_v50, %v3450_v4  ;;  %v917_v58 = vcombine.low %v885_v47, %v900_v48  ;;  %v918_v59 = vcombine.high %v885_v47, %v900_v48 }
 0x303   : > { %v966_v61 = vrot.slane %v952_v53, %v3437_v56  ;;  %v967_v62 = vcombine.low %v944_v52, %v959_v54  ;;  %v968_v63 = vcombine.high %v944_v52, %v959_v54  ;;  %v764_v47 = vcombine.low %v755_v12, %v763_v20 }
 0x304   : > { %v925_v0 = vrot.slane %v917_v58, %v3450_v4  ;;  %v932_v3 = vrot.slane %v918_v59, %v3450_v4  ;;  %v1003_v5 = vcombine.low %v909_v55, %v916_v57  ;;  %v2935_v6 = vcombine.high %v909_v55, %v916_v57 }
 0x305   : > { %v975_v7 = vrot.slane %v967_v62, %v3450_v4  ;;  %v982_v8 = vrot.slane %v968_v63, %v3450_v4  ;;  %v983_v9 = vcombine.low %v951_v60, %v966_v61  ;;  %v984_v10 = vcombine.high %v951_v60, %v966_v61 }
 0x306   : > { %v1010_v13 = vrot.slane %v1003_v5, %v3437_v56  ;;  %v1018_v14 = vrot.slane %v2935_v6, %v3437_v56  ;;  %v1053_v21 = vcombine.low %v925_v0, %v932_v3  ;;  %v2937_v23 = vcombine.high %v925_v0, %v932_v3 }
 0x307   : > { %v991_v16 = vrot.slane %v983_v9, %v3450_v4  ;;  %v998_v17 = vrot.slane %v984_v10, %v3450_v4  ;;  %v1028_v18 = vcombine.low %v975_v7, %v982_v8  ;;  %v2936_v19 = vcombine.high %v975_v7, %v982_v8 }
 0x308   : > { %v1019_v24 = vcombine.low %v1010_v13, %v1018_v14  ;;  %v1060_v48 = vrot.slane %v1053_v21, %v3437_v56  ;;  %v1068_v27 = vrot.slane %v2937_v23, %v3437_v56  ;;  %v739_v49 = vcombine.low %v730_v33, %v738_v34 }
 0x309   : > { %v1035_v25 = vrot.slane %v1028_v18, %v3437_v56  ;;  %v1043_v22 = vrot.slane %v2936_v19, %v3437_v56  ;;  %v1078_v26 = vcombine.low %v991_v16, %v998_v17  ;;  %v2938_v28 = vcombine.high %v991_v16, %v998_v17 }
 0x30a   : > { %v1026_v36 = vrot.slane %v1019_v24, %v3450_v4  ;;  %v798_v53 = vcombine.low %v711_v45, %v718_v46  ;;  %v2934_v54 = vcombine.high %v711_v45, %v718_v46  ;;  %v771_v55 = vrot.slane %v764_v47, %v3450_v4 }
 0x30b   : > { %v1044_v37 = vcombine.low %v1035_v25, %v1043_v22  ;;  %v1085_v38 = vrot.slane %v1078_v26, %v3437_v56  ;;  %v1093_v40 = vrot.slane %v2938_v28, %v3437_v56  ;;  %v1069_v60 = vcombine.low %v1060_v48, %v1068_v27 }
 0x30c   : > { %v1027_v51 = vcombine.high %v1026_v36, %v3292_v1  ;;  %v773_v61 = vcombine.low %v645_v32, %v652_v35  ;;  %v2933_v62 = vcombine.high %v645_v32, %v652_v35  ;;  %v746_v0 = vrot.slane %v739_v49, %v3450_v4 }
 0x30d   : > { %v1051_v31 = vrot.slane %v1044_v37, %v3450_v4  ;;  %v1094_v52 = vcombine.low %v1085_v38, %v1093_v40  ;;  %v1106_v3 = vshrl.u32 %v1026_v36, 16  ;;  %v805_v6 = vrot.slane %v798_v53, %v3437_v56 }
 0x30e   : > { %v813_v7 = vrot.slane %v2934_v54, %v3437_v56  ;;  %v772_v9 = vcombine.high %v771_v55, %v3292_v1  ;;  %v1076_v10 = vrot.slane %v1069_v60, %v3450_v4  ;;  %v780_v11 = vrot.slane %v773_v61, %v3437_v56 }
 0x30f   : > { %v1105_v50 = vpack.i.b16 %v1051_v31, %v1026_v36  ;;  %v1052_v39 = vcombine.high %v1051_v31, %v3292_v1  ;;  %v1107_v59 = vshrl.u32 %v1051_v31, 16  ;;  %v1101_v5 = vrot.slane %v1094_v52, %v3450_v4 }
 0x310   : > { %v788_v12 = vrot.slane %v2933_v62, %v3437_v56  ;;  %v825_v13 = vpack.i.b16 %v771_v55, %v746_v0  ;;  %v747_v14 = vcombine.high %v746_v0, %v3292_v1  ;;  %v814_v20 = vcombine.low %v805_v6, %v813_v7 }
 0x311   : > { %v1412_v57 = vsel %vm1407_vm2, %v1105_v50, 0  ;;  %v1111_v58 = vpack.i.b16 %v1052_v39, %v1027_v51  ;;  %v1108_v8 = vpack.i.b16 %v1107_v59, %v1106_v3  ;;  %v1117_v16 = vpack.i.b16 %v1101_v5, %v1076_v10 }
 0x312   : > { %3045 = vmatpush3.bf16.xpose.msra.mxu0 %v1412_v57  ;;  %v1113_v17 = vshrl.u32 %v1052_v39, 16  ;;  %v831_v19 = vpack.i.b16 %v772_v9, %v747_v14  ;;  %v789_v21 = vcombine.low %v780_v11, %v788_v12  ;;  %v1112_v23 = vshrl.u32 %v1027_v51, 16 }
 0x313   : > { %v1504_v63 = vsel %vm1407_vm2, %v1111_v58, 0  ;;  %3050 = vmatprep.subr.bf16.mxu0 %v3284_v15  ;;  %v1458_v18 = vsel %vm1407_vm2, %v1108_v8, 0  ;;  %v1596_v24 = vsel %vm1407_vm2, %v1117_v16, 0  ;;  %v827_v25 = vshrl.u32 %v771_v55, 16 }
 0x314   : > { %3057 = vmatpush3.bf16.xpose.msra.mxu1 %v1504_v63  ;;  %v1102_v22 = vcombine.high %v1101_v5, %v3292_v1  ;;  %v826_v26 = vshrl.u32 %v746_v0, 16  ;;  %v1114_v28 = vpack.i.b16 %v1113_v17, %v1112_v23  ;;  %v821_v29 = vrot.slane %v814_v20, %v3450_v4 }
 0x315   : > { %3068 = vmatprep.subr.bf16.mxu1 %v3284_v15  ;;  %v1077_v30 = vcombine.high %v1076_v10, %v3292_v1  ;;  %v796_v34 = vrot.slane %v789_v21, %v3450_v4  ;;  %v1119_v40 = vshrl.u32 %v1101_v5, 16  ;;  %v833_v45 = vshrl.u32 %v772_v9, 16 }
 0x316   : > { %v828_v33 = vpack.i.b16 %v827_v25, %v826_v26  ;;  %v1550_v37 = vsel %vm1407_vm2, %v1114_v28, 0  ;;  %v1118_v47 = vshrl.u32 %v1076_v10, 16  ;;  %v832_v48 = vshrl.u32 %v747_v14, 16 }
 0x317   : > { %v1123_v36 = vpack.i.b16 %v1102_v22, %v1077_v30  ;;  %v837_v38 = vpack.i.b16 %v821_v29, %v796_v34  ;;  %v822_v31 = vcombine.high %v821_v29, %v3292_v1  ;;  %v797_v35 = vcombine.high %v796_v34, %v3292_v1 }
 0x318   : > { %v1120_v27 = vpack.i.b16 %v1119_v40, %v1118_v47  ;;  %v834_v32 = vpack.i.b16 %v833_v45, %v832_v48  ;;  %v1125_v51 = vshrl.u32 %v1102_v22, 16  ;;  %v839_v39 = vshrl.u32 %v821_v29, 16 }
 0x319   : > { %3047 = vmatmul.mubr.msk.bf16.vlgmr.msra.gmra.mxu0 %vm1407_vm2, %v825_v13  ;;  %v1688_v46 = vsel %vm1407_vm2, %v1123_v36, 0  ;;  %v843_v50 = vpack.i.b16 %v822_v31, %v797_v35  ;;  %v1124_v52 = vshrl.u32 %v1077_v30, 16  ;;  %v838_v53 = vshrl.u32 %v796_v34, 16 }
 0x31a   : > { %3051 = vmatpush3.bf16.xpose.msra.mxu0 %v1458_v18  ;;  %3052 = vmatprep.mubr.msk.bf16.mxu0 %vm3285_vm1, %v3284_v15  ;;  %v1642_v49 = vsel %vm1407_vm2, %v1120_v27, 0  ;;  %v845_v58 = vshrl.u32 %v822_v31, 16  ;;  %v844_v59 = vshrl.u32 %v797_v35, 16 }
 0x31b   : > { %3059 = vmatmul.mubr.msk.bf16.vlgmr.msra.gmra.mxu1 %vm1407_vm2, %v831_v19  ;;  %3062 = vmatprep.subr.bf16.mxu0 %v3284_v15  ;;  %v1126_v54 = vpack.i.b16 %v1125_v51, %v1124_v52  ;;  %v840_v55 = vpack.i.b16 %v839_v39, %v838_v53 }
 0x31c   : > { %3069 = vmatpush3.bf16.xpose.msra.mxu1 %v1596_v24  ;;  %3070 = vmatprep.mubr.msk.bf16.mxu1 %vm3285_vm1, %v3284_v15  ;;  %v846_v60 = vpack.i.b16 %v845_v58, %v844_v59 }
 0x31d   : > { %3080 = vmatprep.subr.bf16.mxu1 %v3284_v15  ;;  %v1734_v57 = vsel %vm1407_vm2, %v1126_v54, 0 }
 0x321   : > { %3053 = vmatmul.mubr.msk.bf16.vlgmr.msra.gmra.mxu0 %vm1407_vm2, %v828_v33 }
 0x322   : > { %3063 = vmatpush3.bf16.xpose.msra.mxu0 %v1550_v37  ;;  %3064 = vmatprep.mubr.msk.bf16.mxu0 %vm3285_vm1, %v3284_v15 }
 0x323   : > { %3071 = vmatmul.mubr.msk.bf16.vlgmr.msra.gmra.mxu1 %vm1407_vm2, %v837_v38  ;;  %3074 = vmatprep.subr.bf16.mxu0 %v3284_v15 }
 0x324   : > { %3081 = vmatpush3.bf16.xpose.msra.mxu1 %v1688_v46  ;;  %3082 = vmatprep.mubr.msk.bf16.mxu1 %vm3285_vm1, %v3284_v15 }
 0x325   : > { %3092 = vmatprep.subr.bf16.mxu1 %v3284_v15 }
 0x329   : > { %3065 = vmatmul.mubr.msk.bf16.vlgmr.msra.gmra.mxu0 %vm1407_vm2, %v834_v32 }
 0x32a   : > { %3075 = vmatpush3.bf16.xpose.msra.mxu0 %v1642_v49  ;;  %3076 = vmatprep.mubr.msk.bf16.mxu0 %vm3285_vm1, %v3284_v15 }
 0x32b   : > { %3083 = vmatmul.mubr.msk.bf16.vlgmr.msra.gmra.mxu1 %vm1407_vm2, %v843_v50  ;;  %3086 = vmatprep.subr.bf16.mxu0 %v3284_v15 }
 0x32c   : > { %3094 = vmatprep.mubr.msk.bf16.mxu1 %vm3285_vm1, %v3284_v15 }
 0x331   : > { %3077 = vmatmul.mubr.msk.bf16.vlgmr.msra.gmra.mxu0 %vm1407_vm2, %v840_v55 }
 0x332   : > { %3087 = vmatpush3.bf16.xpose.msra.mxu0 %v1734_v57  ;;  %3088 = vmatprep.mubr.msk.bf16.mxu0 %vm3285_vm1, %v3284_v15 }
 0x333   : > { %3098 = vmatprep.subr.bf16.mxu0 %v3284_v15 }
 0x339   : > { %3089 = vmatmul.mubr.msk.bf16.vlgmr.msra.gmra.mxu0 %vm1407_vm2, %v846_v60 }
 0x33a   : > { %3100 = vmatprep.mubr.msk.bf16.mxu0 %vm3285_vm1, %v3284_v15 }
 0x3d9   : > { %v1448_v61 = vpop.f32.mrf.mxu0 }
 0x3da   : > { %v1776_v62 = vsel %vm1407_vm2, %v1448_v61, -inf }
 0x3db   : > { %v3585_v63 = vpop.f32.mrf.mxu1  ;;  %1777 = vmax.xlane.f32.xlu1 %v1776_v62  ;;  %v3048_v0 = vpop.f32.mrf.mxu0 }
 0x3dc   : > { %v1782_v17 = vsel %vm1407_vm2, %v3585_v63, -inf }
 0x3dd   : > { %v1451_v3 = vpop.f32.mrf.mxu0  ;;  %v3060_v5 = vpop.f32.mrf.mxu1 }
 0x3df   : > { %v3049_v6 = vpop.f32.mrf.mxu0  ;;  %v1543_v7 = vpop.f32.mrf.mxu1 }
 0x3e1   : > { %v1494_v8 = vpop.f32.mrf.mxu0  ;;  %v3061_v9 = vpop.f32.mrf.mxu1 }
 0x3e2   : > { %v1779_v10 = vsel %vm1407_vm2, %v1494_v8, -inf }
 0x3e3   : > { %v3588_v11 = vpop.f32.mrf.mxu1  ;;  %1780 = vmax.xlane.f32.xlu0 %v1779_v10  ;;  %v3054_v12 = vpop.f32.mrf.mxu0 }
 0x3e4   : > { %v1788_v13 = vsel %vm1407_vm2, %v3588_v11, -inf }
 0x3e5   : > { %v3072_v14 = vpop.f32.mrf.mxu1  ;;  %1789 = vmax.xlane.f32.xlu1 %v1788_v13  ;;  %v1497_v16 = vpop.f32.mrf.mxu0 }
 0x3e7   : > { %v1635_v18 = vpop.f32.mrf.mxu1  ;;  %1783 = vmax.xlane.f32.xlu0 %v1782_v17  ;;  %v3055_v19 = vpop.f32.mrf.mxu0 }
 0x3e9   : > { %v1586_v20 = vpop.f32.mrf.mxu0  ;;  %v3073_v21 = vpop.f32.mrf.mxu1 }
 0x3ea   : > { %v1785_v23 = vsel %vm1407_vm2, %v1586_v20, -inf }
 0x3eb   : > { %v1724_v24 = vpop.f32.mrf.mxu1  ;;  %1786 = vmax.xlane.f32.xlu0 %v1785_v23  ;;  %v3066_v25 = vpop.f32.mrf.mxu0 }
 0x3ec   : > { %v1794_v22 = vsel %vm1407_vm2, %v1724_v24, -inf }
 0x3ed   : > { %v3084_v26 = vpop.f32.mrf.mxu1  ;;  %1795 = vmax.xlane.f32.xlu1 %v1794_v22  ;;  %v1589_v28 = vpop.f32.mrf.mxu0 }
 0x3ef   : > { %v3067_v29 = vpop.f32.mrf.mxu0  ;;  %v1727_v30 = vpop.f32.mrf.mxu1 }
 0x3f1   : > { %v1678_v33 = vpop.f32.mrf.mxu0  ;;  %v3085_v34 = vpop.f32.mrf.mxu1 }
 0x3f2   : > { %v1791_v36 = vsel %vm1407_vm2, %v1678_v33, -inf }
 0x3f3   : > { %1792 = vmax.xlane.f32.xlu0 %v1791_v36  ;;  %v3078_v37 = vpop.f32.mrf.mxu0 }
 0x3f5   : > { %v1681_v38 = vpop.f32.mrf.mxu0 }
 0x3f7   : > { %v3079_v40 = vpop.f32.mrf.mxu0 }
 0x3f9   : > { %v1770_v45 = vpop.f32.mrf.mxu0 }
 0x3fa   : > { %v1797_v46 = vsel %vm1407_vm2, %v1770_v45, -inf }
 0x3fb   : > { %1798 = vmax.xlane.f32.xlu0 %v1797_v46  ;;  %v3090_v47 = vpop.f32.mrf.mxu0 }
 0x3fd   : > { %v1773_v48 = vpop.f32.mrf.mxu0 }
 0x3fe   : > { %1127 = vrot.lane.b32.xlu1 %v3417_v41, %s3293_s16 }
 0x3ff   : > { %v3091_v27 = vpop.f32.mrf.mxu0 }
 0x464   : > { %v1778_v31 = vpop.xlane.xlu1 %1777 }
 0x465   : > { %v1800_v32 = vsub.f32 %v1448_v61, %v1778_v31 }
 0x467   : > { %v1808_v35 = vmul.f32 1.442695, %v1800_v32 }
 0x469   : > { %3230 = vpow2.f32 %v1808_v35 }
 0x46c   : > { %v1781_v49 = vpop.xlane.xlu0 %1780 }
 0x46d   : > { %v1801_v50 = vsub.f32 %v1494_v8, %v1781_v49 }
 0x46e   : > { %v1790_v55 = vpop.xlane.xlu1 %1789 }
 0x46f   : > { %v1810_v51 = vmul.f32 1.442695, %v1801_v50  ;;  %v1804_v3 = vsub.f32 %v3588_v11, %v1790_v55 }
 0x470   : > { %v1784_v54 = vpop.xlane.xlu0 %1783 }
 0x471   : > { %3232 = vpow2.f32 %v1810_v51  ;;  %v1802_v57 = vsub.f32 %v3585_v63, %v1784_v54 }
 0x473   : > { %v1812_v61 = vmul.f32 1.442695, %v1802_v57 }
 0x474   : > { %v1787_v58 = vpop.xlane.xlu0 %1786 }
 0x475   : > { %v1803_v60 = vsub.f32 %v1586_v20, %v1787_v58  ;;  %3234 = vpow2.f32 %v1812_v61 }
 0x476   : > { %v3599_v39 = vpop.eup %3230  ;;  %v1796_v59 = vpop.xlane.xlu1 %1795 }
 0x477   : > { %v1824_v52 = vsel %vm1407_vm2, %v3599_v39, 0.0  ;;  %v1806_v62 = vsub.f32 %v1724_v24, %v1796_v59  ;;  %v1814_v0 = vmul.f32 1.442695, %v1803_v60 }
 0x478   : > { %1825 = vadd.xlane.f32.xlu1 %v1824_v52 }
 0x479   : > { %v1820_v5 = vmul.f32 1.442695, %v1806_v62  ;;  %3236 = vpow2.f32 %v1814_v0 }
 0x47a   : > { %v1128_v23 = vpop.permute.xlu1 %1127 }
 0x47b   : > { %3238 = vpow2.f32 %v1820_v5  ;;  %v1139_v36 = vshrl.u32 %v1128_v23, 16 }
 0x47c   : > { %v1793_v6 = vpop.xlane.xlu0 %1792 }
 0x47e   : > { %v3603_v53 = vpop.eup %3232 }
 0x47f   : > { %v1827_v41 = vsel %vm1407_vm2, %v3603_v53, 0.0 }
 0x480   : > { %1828 = vadd.xlane.f32.xlu0 %v1827_v41 }
 0x482   : > { %v3612_v9 = vpop.eup %3234 }
 0x483   : > { %v1830_v11 = vsel %vm1407_vm2, %v3612_v9, 0.0 }
 0x484   : > { %v1799_v7 = vpop.xlane.xlu0 %1798 }
 0x485   : > { %v1807_v8 = vsub.f32 %v1770_v45, %v1799_v7 }
 0x486   : > { %v3614_v10 = vpop.eup %3236 }
 0x487   : > { %v1822_v63 = vmul.f32 1.442695, %v1807_v8  ;;  %v1833_v14 = vsel %vm1407_vm2, %v3614_v10, 0.0 }
 0x488   : > { %v3618_v12 = vpop.eup %3238 }
 0x489   : > { %1131 = vrot.lane.b32.xlu1 %v3423_v42, %s3293_s16  ;;  %v1816_v42 = vmul.f32 1.442695, %v1804_v3  ;;  %v1842_v13 = vsel %vm1407_vm2, %v3618_v12, 0.0 }
 0x48b   : > { %3240 = vpow2.f32 %v1816_v42 }
 0x48d   : > { %1133 = vrot.lane.b32.xlu1 %v3429_v44, %s3293_s16  ;;  %v1805_v44 = vsub.f32 %v1678_v33, %v1793_v6 }
 0x496   : > { %1129 = vrot.lane.b32.xlu0 %v3425_v43, %s3293_s16  ;;  %v1818_v43 = vmul.f32 1.442695, %v1805_v44 }
 0x498   : > { %3242 = vpow2.f32 %v1818_v43  ;;  %v3624_v16 = vpop.eup %3240 }
 0x499   : > { %3244 = vpow2.f32 %v1822_v63  ;;  %v1836_v17 = vsel %vm1407_vm2, %v3624_v16, 0.0 }
 0x4a5   : > { %v3628_v18 = vpop.eup %3242 }
 0x4a6   : > { %v1839_v19 = vsel %vm1407_vm2, %v3628_v18, 0.0  ;;  %v3632_v20 = vpop.eup %3244 }
 0x4a7   : > { %v1845_v21 = vsel %vm1407_vm2, %v3632_v20, 0.0 }
 0x4b1   : > { %1831 = vadd.xlane.f32.xlu1 %v1830_v11 }
 0x4b5   : > { %1843 = vadd.xlane.f32.xlu1 %v1842_v13  ;;  %1834 = vadd.xlane.f32.xlu0 %v1833_v14 }
 0x4b9   : > { %1837 = vadd.xlane.f32.xlu0 %v1836_v17 }
 0x4bd   : > { %1840 = vadd.xlane.f32.xlu0 %v1839_v19 }
 0x4c1   : > { %1846 = vadd.xlane.f32.xlu0 %v1845_v21 }
 0x501   : > { %v1826_v24 = vpop.xlane.xlu1 %1825 }
 0x502   : > { %3246 = vrcp.f32 %v1826_v24 }
 0x505   : > { %v1132_v25 = vpop.permute.xlu1 %1131 }
 0x506   : > { %v1147_v30 = vshrl.u32 %v1132_v25, 16 }
 0x509   : > { %v1134_v22 = vpop.permute.xlu1 %1133  ;;  %v1829_v26 = vpop.xlane.xlu0 %1828 }
 0x50a   : > { %v1148_v28 = vshrl.u32 %v1134_v22, 16  ;;  %v3636_v29 = vpack.i.b16 %v1134_v22, %v1132_v25  ;;  %3248 = vrcp.f32 %v1829_v26 }
 0x50c   : > { %v3640_v37 = vpack.i.b16 %v1148_v28, %v1147_v30  ;;  %v1173_v40 = vrot.slane %v3636_v29, %v3437_v56 }
 0x50d   : > { %v1130_v33 = vpop.permute.xlu0 %1129 }
 0x50e   : > { %v3638_v34 = vpack.i.b16 %v1130_v33, %v1128_v23  ;;  %v1140_v38 = vshrl.u32 %v1130_v33, 16  ;;  %v1239_v27 = vrot.slane %v3640_v37, %v3437_v56  ;;  %v1232_v30 = vcombine.high %v3640_v37, %v3447_v2 }
 0x50f   : > { %v3247_v3 = vpop.eup %3246 }
 0x510   : > { %v1158_v45 = vrot.slane %v3638_v34, %v3437_v56  ;;  %v1141_v46 = vpack.i.b16 %v1140_v38, %v1139_v36  ;;  %v1856_v7 = vmul.f32 %v3247_v3, %v3599_v39  ;;  %v1151_v33 = vcombine.high %v3638_v34, %v3447_v2 }
 0x511   : > { %v1166_v36 = vcombine.high %v3636_v29, %v3447_v2 }
 0x512   : > { %v1181_v47 = vcombine.low %v1158_v45, %v1173_v40  ;;  %v1182_v48 = vcombine.high %v1158_v45, %v1173_v40  ;;  %v1224_v31 = vrot.slane %v1141_v46, %v3437_v56  ;;  %v1864_v25 = vpack.c.bf16 %v1856_v7, %v1856_v7 }
 0x513   : > { %v1246_v40 = vrot.slane %v1232_v30, %v3437_v56  ;;  %v1165_v45 = vrot.slane %v1151_v33, %v3437_v56 }
 0x514   : > { %v1189_v32 = vrot.slane %v1181_v47, %v3450_v4  ;;  %v1196_v35 = vrot.slane %v1182_v48, %v3450_v4  ;;  %v1247_v49 = vcombine.low %v1224_v31, %v1239_v27  ;;  %v1248_v50 = vcombine.high %v1224_v31, %v1239_v27 }
 0x516   : > { %v1283_v51 = vcombine.low %v1189_v32, %v1196_v35  ;;  %v2939_v52 = vcombine.high %v1189_v32, %v1196_v35  ;;  %v1255_v41 = vrot.slane %v1247_v49, %v3450_v4  ;;  %v1262_v54 = vrot.slane %v1248_v50, %v3450_v4 }
 0x517   : > { %v3249_v42 = vpop.eup %3248 }
 0x518   : > { %v1290_v55 = vrot.slane %v1283_v51, %v3437_v56  ;;  %v1298_v57 = vrot.slane %v2939_v52, %v3437_v56  ;;  %v1308_v58 = vcombine.low %v1255_v41, %v1262_v54  ;;  %v2940_v59 = vcombine.high %v1255_v41, %v1262_v54 }
 0x519   : > { %v1857_v13 = vmul.f32 %v3249_v42, %v3603_v53  ;;  %v1217_v53 = vcombine.high %v1141_v46, %v3447_v2  ;;  %v1180_v46 = vrot.slane %v1166_v36, %v3437_v56 }
 0x51a   : > { %v1299_v60 = vcombine.low %v1290_v55, %v1298_v57  ;;  %v1315_v61 = vrot.slane %v1308_v58, %v3437_v56  ;;  %v1323_v62 = vrot.slane %v2940_v59, %v3437_v56 }
 0x51b   : > { %v1865_v26 = vpack.c.bf16 %v1857_v13, %v1857_v13  ;;  %v1231_v38 = vrot.slane %v1217_v53, %v3437_v56  ;;  %v1197_v27 = vcombine.low %v1165_v45, %v1180_v46  ;;  %v1198_v37 = vcombine.high %v1165_v45, %v1180_v46 }
 0x51c   : > { %v1306_v0 = vrot.slane %v1299_v60, %v3450_v4  ;;  %v1324_v5 = vcombine.low %v1315_v61, %v1323_v62 }
 0x51d   : > { %v1263_v47 = vcombine.low %v1231_v38, %v1246_v40  ;;  %v1264_v48 = vcombine.high %v1231_v38, %v1246_v40  ;;  %v1205_v32 = vrot.slane %v1197_v27, %v3450_v4  ;;  %v1212_v2 = vrot.slane %v1198_v37, %v3450_v4 }
 0x51e   : > { %v1307_v6 = vcombine.high %v1306_v0, %v3292_v1  ;;  %v1331_v44 = vrot.slane %v1324_v5, %v3450_v4  ;;  %v1386_v8 = vshrl.u32 %v1306_v0, 16 }
 0x51f   : > { %v1271_v31 = vrot.slane %v1263_v47, %v3450_v4  ;;  %v1278_v34 = vrot.slane %v1264_v48, %v3450_v4  ;;  %v1333_v50 = vcombine.low %v1205_v32, %v1212_v2  ;;  %v2941_v51 = vcombine.high %v1205_v32, %v1212_v2 }
 0x520   : > { %v1385_v43 = vpack.i.b16 %v1331_v44, %v1306_v0  ;;  %v1387_v63 = vshrl.u32 %v1331_v44, 16  ;;  %v1332_v11 = vcombine.high %v1331_v44, %v3292_v1  ;;  %v1392_v14 = vshrl.u32 %v1307_v6, 16 }
 0x521   : > { %v1358_v29 = vcombine.low %v1271_v31, %v1278_v34  ;;  %v2942_v35 = vcombine.high %v1271_v31, %v1278_v34  ;;  %v1340_v55 = vrot.slane %v1333_v50, %v3437_v56  ;;  %v1348_v57 = vrot.slane %v2941_v51, %v3437_v56 }
 0x522   : > { %v1877_v17 = vsel %vm1875_vm3, %v1385_v43, 0  ;;  %v1388_v19 = vpack.i.b16 %v1387_v63, %v1386_v8  ;;  %v1391_v21 = vpack.i.b16 %v1332_v11, %v1307_v6  ;;  %v1393_v23 = vshrl.u32 %v1332_v11, 16 }
 0x523   : > { %3093 = vmatpush3.bf16.msra.mxu1 %v1877_v17  ;;  %v1365_v52 = vrot.slane %v1358_v29, %v3437_v56  ;;  %v1373_v41 = vrot.slane %v2942_v35, %v3437_v56  ;;  %v1349_v61 = vcombine.low %v1340_v55, %v1348_v57 }
 0x524   : > { %v1923_v24 = vsel %vm1875_vm3, %v1388_v19, 0  ;;  %3104 = vmatprep.subr.bf16.mxu1 %v3284_v15  ;;  %v1394_v39 = vpack.i.b16 %v1393_v23, %v1392_v14  ;;  %v1969_v22 = vsel %vm1875_vm3, %v1391_v21, 0 }
 0x525   : > { %3099 = vmatpush3.bf16.msra.mxu0 %v1923_v24  ;;  %v1374_v58 = vcombine.low %v1365_v52, %v1373_v41  ;;  %v1356_v3 = vrot.slane %v1349_v61, %v3450_v4 }
 0x526   : > { %3095 = vmatmul.mubr.msk.bf16.vlgmr.msra.gmra.mxu1 %vm1407_vm2, %v1864_v25  ;;  %3110 = vmatprep.subr.bf16.mxu0 %v3284_v15  ;;  %v2015_v28 = vsel %vm1875_vm3, %v1394_v39, 0 }
 0x527   : > { %3105 = vmatpush3.bf16.msra.mxu1 %v1969_v22  ;;  %3106 = vmatprep.mubr.msk.bf16.mxu1 %vm3285_vm1, %v3284_v15  ;;  %v1381_v62 = vrot.slane %v1374_v58, %v3450_v4  ;;  %v1398_v8 = vshrl.u32 %v1356_v3, 16 }
 0x528   : > { %3101 = vmatmul.mubr.msk.bf16.vlgmr.msra.gmra.mxu0 %vm1407_vm2, %v1865_v26  ;;  %3116 = vmatprep.subr.bf16.mxu1 %v3284_v15 }
 0x529   : > { %3111 = vmatpush3.bf16.msra.mxu0 %v2015_v28  ;;  %3112 = vmatprep.mubr.msk.bf16.mxu0 %vm3285_vm1, %v3284_v15  ;;  %v1397_v42 = vpack.i.b16 %v1381_v62, %v1356_v3  ;;  %v1399_v7 = vshrl.u32 %v1381_v62, 16  ;;  %v1382_v13 = vcombine.high %v1381_v62, %v3292_v1 }
 0x52a   : > { %3122 = vmatprep.subr.bf16.mxu0 %v3284_v15 }
 0x52b   : > { %v2061_v11 = vsel %vm1875_vm3, %v1397_v42, 0  ;;  %v1400_v17 = vpack.i.b16 %v1399_v7, %v1398_v8  ;;  %v1405_v39 = vshrl.u32 %v1382_v13, 16 }
 0x52d   : > { %v2107_v25 = vsel %vm1875_vm3, %v1400_v17, 0 }
 0x53a   : > { %v1832_v49 = vpop.xlane.xlu1 %1831 }
 0x53b   : > { %3250 = vrcp.f32 %v1832_v49 }
 0x53e   : > { %v1835_v54 = vpop.xlane.xlu0 %1834  ;;  %v1844_v60 = vpop.xlane.xlu1 %1843 }
 0x53f   : > { %3252 = vrcp.f32 %v1835_v54 }
 0x542   : > { %v1838_v59 = vpop.xlane.xlu0 %1837 }
 0x543   : > { %3254 = vrcp.f32 %v1838_v59 }
 0x544   : > { %3256 = vrcp.f32 %v1844_v60 }
 0x546   : > { %v1841_v0 = vpop.xlane.xlu0 %1840 }
 0x547   : > { %3258 = vrcp.f32 %v1841_v0 }
 0x548   : > { %v3251_v5 = vpop.eup %3250 }
 0x549   : > { %v1858_v6 = vmul.f32 %v3251_v5, %v3612_v9  ;;  %v1357_v9 = vcombine.high %v1356_v3, %v3292_v1 }
 0x54a   : > { %v1847_v44 = vpop.xlane.xlu0 %1846 }
 0x54b   : > { %v1866_v43 = vpack.c.bf16 %v1858_v6, %v1858_v6  ;;  %3260 = vrcp.f32 %v1847_v44  ;;  %v1403_v24 = vpack.i.b16 %v1382_v13, %v1357_v9  ;;  %v1404_v1 = vshrl.u32 %v1357_v9, 16 }
 0x54c   : > { %v3253_v63 = vpop.eup %3252 }
 0x54d   : > { %3107 = vmatmul.mubr.msk.bf16.vlgmr.msra.gmra.mxu1 %vm1407_vm2, %v1866_v43  ;;  %v1859_v14 = vmul.f32 %v3253_v63, %v3614_v10  ;;  %v1406_v28 = vpack.i.b16 %v1405_v39, %v1404_v1 }
 0x54e   : > { %3117 = vmatpush3.bf16.msra.mxu1 %v2061_v11  ;;  %3118 = vmatprep.mubr.msk.bf16.mxu1 %vm3285_vm1, %v3284_v15 }
 0x54f   : > { %3128 = vmatprep.subr.bf16.mxu1 %v3284_v15  ;;  %v1867_v21 = vpack.c.bf16 %v1859_v14, %v1859_v14  ;;  %v2199_v38 = vsel %vm1875_vm3, %v1406_v28, 0 }
 0x550   : > { %v3255_v19 = vpop.eup %3254 }
 0x551   : > { %v1860_v23 = vmul.f32 %v3255_v19, %v3624_v16  ;;  %3113 = vmatmul.mubr.msk.bf16.vlgmr.msra.gmra.mxu0 %vm1407_vm2, %v1867_v21  ;;  %v3257_v22 = vpop.eup %3256  ;;  %v2153_v16 = vsel %vm1875_vm3, %v1403_v24, 0 }
 0x552   : > { %3123 = vmatpush3.bf16.msra.mxu0 %v2107_v25  ;;  %3124 = vmatprep.mubr.msk.bf16.mxu0 %vm3285_vm1, %v3284_v15  ;;  %v1862_v33 = vmul.f32 %v3257_v22, %v3618_v12 }
 0x553   : > { %v1868_v10 = vpack.c.bf16 %v1860_v23, %v1860_v23  ;;  %3134 = vmatprep.subr.bf16.mxu0 %v3284_v15 }
 0x554   : > { %v3259_v26 = vpop.eup %3258  ;;  %v1870_v40 = vpack.c.bf16 %v1862_v33, %v1862_v33 }
 0x555   : > { %3119 = vmatmul.mubr.msk.bf16.vlgmr.msra.gmra.mxu1 %vm1407_vm2, %v1868_v10  ;;  %v1861_v53 = vmul.f32 %v3259_v26, %v3628_v18 }
 0x556   : > { %3129 = vmatpush3.bf16.msra.mxu1 %v2153_v16  ;;  %3130 = vmatprep.mubr.msk.bf16.mxu1 %vm3285_vm1, %v3284_v15 }
 0x557   : > { %v1869_v30 = vpack.c.bf16 %v1861_v53, %v1861_v53  ;;  %3140 = vmatprep.subr.bf16.mxu1 %v3284_v15 }
 0x558   : > { %v3261_v36 = vpop.eup %3260 }
 0x559   : > { %3125 = vmatmul.mubr.msk.bf16.vlgmr.msra.gmra.mxu0 %vm1407_vm2, %v1869_v30  ;;  %v1863_v18 = vmul.f32 %v3261_v36, %v3632_v20 }
 0x55a   : > { %3135 = vmatpush3.bf16.msra.mxu0 %v2199_v38  ;;  %3136 = vmatprep.mubr.msk.bf16.mxu0 %vm3285_vm1, %v3284_v15 }
 0x55b   : > { %3148 = vmatprep.subr.bf16.mxu0 %v3284_v15  ;;  %v1871_v12 = vpack.c.bf16 %v1863_v18, %v1863_v18 }
 0x55d   : > { %3131 = vmatmul.mubr.msk.bf16.vlgmr.msra.gmra.mxu1 %vm1407_vm2, %v1870_v40 }
 0x55e   : > { %3144 = vmatprep.mubr.msk.bf16.mxu1 %vm3285_vm1, %v3284_v15 }
 0x561   : > { %3137 = vmatmul.mubr.msk.bf16.vlgmr.msra.gmra.mxu0 %vm1407_vm2, %v1871_v12 }
 0x562   : > { %3152 = vmatprep.mubr.msk.bf16.mxu0 %vm3285_vm1, %v3284_v15 }
 0x5e6   : > { %v1913_v45 = vpop.f32.mrf.mxu1 }
 0x5e8   : > { %v3096_v46 = vpop.f32.mrf.mxu1  ;;  %v1959_v47 = vpop.f32.mrf.mxu0 }
 0x5ea   : > { %v1916_v48 = vpop.f32.mrf.mxu1  ;;  %v3102_v27 = vpop.f32.mrf.mxu0 }
 0x5ec   : > { %v3097_v37 = vpop.f32.mrf.mxu1  ;;  %v1962_v20 = vpop.f32.mrf.mxu0 }
 0x5ee   : > { %v3103_v31 = vpop.f32.mrf.mxu0 }
 0x60d   : > { %v2005_v34 = vpop.f32.mrf.mxu1 }
 0x60e   : > { %v2241_v2 = vcombine.low %v1913_v45, %v2005_v34  ;;  %v2242_v29 = vcombine.high %v1913_v45, %v2005_v34 }
 0x60f   : > { %v3108_v32 = vpop.f32.mrf.mxu1 }
 0x610   : > { %v2249_v54 = vrot.slane %v2241_v2, %v3437_v56  ;;  %v2256_v55 = vrot.slane %v2242_v29, %v3437_v56 }
 0x611   : > { %v2008_v35 = vpop.f32.mrf.mxu1  ;;  %v2051_v49 = vpop.f32.mrf.mxu0 }
 0x612   : > { %v2257_v50 = vcombine.low %v1959_v47, %v2051_v49  ;;  %v2258_v51 = vcombine.high %v1959_v47, %v2051_v49 }
 0x613   : > { %v3109_v52 = vpop.f32.mrf.mxu1  ;;  %v3114_v41 = vpop.f32.mrf.mxu0 }
 0x614   : > { %v2265_v57 = vrot.slane %v2257_v50, %v3437_v56  ;;  %v2272_v58 = vrot.slane %v2258_v51, %v3437_v56 }
 0x615   : > { %v2097_v59 = vpop.f32.mrf.mxu1  ;;  %v2054_v60 = vpop.f32.mrf.mxu0 }
 0x616   : > { %v2273_v61 = vcombine.low %v2249_v54, %v2265_v57  ;;  %v2274_v62 = vcombine.high %v2249_v54, %v2265_v57  ;;  %v2289_v0 = vcombine.low %v2256_v55, %v2272_v58  ;;  %v2290_v3 = vcombine.high %v2256_v55, %v2272_v58 }
 0x617   : > { %v3120_v5 = vpop.f32.mrf.mxu1  ;;  %v3115_v6 = vpop.f32.mrf.mxu0 }
 0x618   : > { %v2281_v42 = vrot.slane %v2273_v61, %v3450_v4  ;;  %v2288_v44 = vrot.slane %v2274_v62, %v3450_v4  ;;  %v2297_v7 = vrot.slane %v2289_v0, %v3450_v4  ;;  %v2304_v43 = vrot.slane %v2290_v3, %v3450_v4 }
 0x619   : > { %v2100_v8 = vpop.f32.mrf.mxu1  ;;  %v2143_v63 = vpop.f32.mrf.mxu0 }
 0x61a   : > { %v2377_v11 = vcombine.low %v2281_v42, %v2288_v44  ;;  %v2959_v13 = vcombine.high %v2281_v42, %v2288_v44  ;;  %v2393_v14 = vcombine.low %v2297_v7, %v2304_v43  ;;  %v2960_v17 = vcombine.high %v2297_v7, %v2304_v43  ;;  %v3215_v43 = vld [vmem:[%s3873_s5] sm:$0xff]  }
 0x61b   : > { %v3121_v9 = vpop.f32.mrf.mxu1  ;;  %v3126_v19 = vpop.f32.mrf.mxu0 }
 0x61c   : > { %v2384_v21 = vrot.slane %v2377_v11, %v3437_v56  ;;  %v2392_v23 = vrot.slane %v2959_v13, %v3437_v56  ;;  %v2400_v24 = vrot.slane %v2393_v14, %v3437_v56  ;;  %v2408_v25 = vrot.slane %v2960_v17, %v3437_v56 }
 0x61d   : > { %v2189_v39 = vpop.f32.mrf.mxu1  ;;  %v2146_v22 = vpop.f32.mrf.mxu0 }
 0x61e   : > { %v2409_v26 = vcombine.low %v2384_v21, %v2392_v23  ;;  %v2425_v1 = vcombine.low %v2400_v24, %v2408_v25  ;;  %v2309_v53 = vcombine.low %v2097_v59, %v2189_v39  ;;  %v2310_v28 = vcombine.high %v2097_v59, %v2189_v39  ;;  %v3214_v59 = vld [vmem:[%s3873_s5 + $0x8] sm:$0xff]  }
 0x61f   : > { %v3132_v10 = vpop.f32.mrf.mxu1  ;;  %v3127_v16 = vpop.f32.mrf.mxu0  ;;  %v2410_v52 = vcombine.high %v2384_v21, %v2392_v23  ;;  %v2426_v41 = vcombine.high %v2400_v24, %v2408_v25  ;;  %3141 = vmatpush3.bf16.msra.mxu1 %v3214_v59 }
 0x620   : > { %v3745_v33 = vrot.slane %v2409_v26, %v3450_v4  ;;  %v3748_v36 = vrot.slane %v2425_v1, %v3450_v4  ;;  %v2317_v47 = vrot.slane %v2309_v53, %v3437_v56  ;;  %v2324_v48 = vrot.slane %v2310_v28, %v3437_v56  ;;  %3142 = vmatprep.subr.bf16.mxu1 %v3284_v15 }
 0x621   : > { %v2192_v30 = vpop.f32.mrf.mxu1  ;;  %v2235_v38 = vpop.f32.mrf.mxu0  ;;  %v2424_v3 = vrot.slane %v2410_v52, %v3450_v4  ;;  %v2440_v5 = vrot.slane %v2426_v41, %v3450_v4 }
 0x622   : > { %v2325_v40 = vcombine.low %v2143_v63, %v2235_v38  ;;  %v2326_v18 = vcombine.high %v2143_v63, %v2235_v38  ;;  %v2441_v45 = vcombine.low %v3745_v33, %v3748_v36  ;;  %v2442_v17 = vcombine.high %v3745_v33, %v3748_v36  ;;  %v2963_v33 = vld [vmem:[%s3874_s6] ss:$0 sm:$0xff] }
 0x623   : > { %v3133_v12 = vpop.f32.mrf.mxu1  ;;  %v3138_v46 = vpop.f32.mrf.mxu0  ;;  %3143 = vmatpush3.bf16.msra.mxu1 %v3215_v43  ;;  %v2443_v13 = vcombine.low %v2424_v3, %v2440_v5  ;;  %v2444_v25 = vcombine.high %v2424_v3, %v2440_v5 }
 0x624   : > { %v2333_v27 = vrot.slane %v2325_v40, %v3437_v56  ;;  %v2340_v37 = vrot.slane %v2326_v18, %v3437_v56  ;;  %3156 = vmatprep.subr.bf16.mxu1 %v3284_v15 }
 0x625   : > { %v2238_v20 = vpop.f32.mrf.mxu0 }
 0x626   : > { %v2341_v31 = vcombine.low %v2317_v47, %v2333_v27  ;;  %v2342_v34 = vcombine.high %v2317_v47, %v2333_v27  ;;  %v2357_v32 = vcombine.low %v2324_v48, %v2340_v37  ;;  %v2358_v2 = vcombine.high %v2324_v48, %v2340_v37  ;;  %v3274_v37 = vld [vmem:[%s3383_s14] sm:$0xff] }
 0x627   : > { %v3139_v29 = vpop.f32.mrf.mxu0 }
 0x628   : > { %v2349_v35 = vrot.slane %v2341_v31, %v3450_v4  ;;  %v2356_v49 = vrot.slane %v2342_v34, %v3450_v4  ;;  %v2365_v50 = vrot.slane %v2357_v32, %v3450_v4  ;;  %v2372_v51 = vrot.slane %v2358_v2, %v3450_v4  ;;  %v3275_v29 = vld [vmem:[%s3383_s14 + $0x8] sm:$0xff] }
 0x62a   : > { %v2445_v54 = vcombine.low %v2349_v35, %v2356_v49  ;;  %v2961_v55 = vcombine.high %v2349_v35, %v2356_v49  ;;  %v2461_v57 = vcombine.low %v2365_v50, %v2372_v51  ;;  %v2962_v58 = vcombine.high %v2365_v50, %v2372_v51 }
 0x62c   : > { %v2452_v60 = vrot.slane %v2445_v54, %v3437_v56  ;;  %v2460_v61 = vrot.slane %v2961_v55, %v3437_v56  ;;  %v2468_v62 = vrot.slane %v2461_v57, %v3437_v56  ;;  %v2476_v0 = vrot.slane %v2962_v58, %v3437_v56 }
 0x62e   : > { %v2478_v6 = vcombine.high %v2452_v60, %v2460_v61  ;;  %v2494_v42 = vcombine.high %v2468_v62, %v2476_v0  ;;  %v2477_v44 = vcombine.low %v2452_v60, %v2460_v61  ;;  %v2493_v7 = vcombine.low %v2468_v62, %v2476_v0  ;;  %v3216_v61 = vld [vmem:[%s3877_s9 + $0x8] sm:$0xff]   ;;  %v3217_v62 = vld [vmem:[%s3877_s9] sm:$0xff]  }
 0x62f   : > { %3149 = vmatpush3.bf16.msra.mxu0 %v3216_v61 }
 0x630   : > { %v2492_v8 = vrot.slane %v2478_v6, %v3450_v4  ;;  %v2508_v63 = vrot.slane %v2494_v42, %v3450_v4  ;;  %v2485_v56 = vrot.slane %v2477_v44, %v3450_v4  ;;  %v2501_v11 = vrot.slane %v2493_v7, %v3450_v4  ;;  %3150 = vmatprep.subr.bf16.mxu0 %v3284_v15 }
 0x632   : > { %v2511_v14 = vcombine.low %v2492_v8, %v2508_v63  ;;  %v2510_v9 = vcombine.high %v2485_v56, %v2501_v11  ;;  %v2509_v19 = vcombine.low %v2485_v56, %v2501_v11  ;;  %v2512_v24 = vcombine.high %v2492_v8, %v2508_v63  ;;  %v2967_v8 = vld [vmem:[%s3875_s7] ss:$0 sm:$0xff] }
 0x633   : > { %3151 = vmatpush3.bf16.msra.mxu0 %v3217_v62 }
 0x634   : > { %v3202_v21 = vpack.i.bf16 %v2511_v14, %v2443_v13  ;;  %v3197_v23 = vpack.i.bf16 %v2510_v9, %v2442_v17  ;;  %v3207_v39 = vpack.i.bf16 %v2512_v24, %v2444_v25  ;;  %v2968_v13 = vld [vmem:[%s3876_s8] ss:$0 sm:$0xff]  ;;  %v3220_v24 = vld [vmem:[%s3879_s11 + $0x28] sm:$0xff]  }
 0x635   : > { %v3221_v25 = vld [vmem:[%s3879_s11 + $0x20] sm:$0xff]  }
 0x636   : > { %3203 = vrot.lane.b32.xlu0 %v3202_v21, %s3294_s21  ;;  %3198 = vrot.lane.b32.xlu1 %v3197_v23, %s3295_s22  ;;  %v3218_v21 = vld [vmem:[%s3879_s11 + $0x38] sm:$0xff]   ;;  %v3219_v23 = vld [vmem:[%s3879_s11 + $0x30] sm:$0xff]  }
 0x63a   : > { %3208 = vrot.lane.b32.xlu1 %v3207_v39, %s3296_s23  ;;  %v3222_v39 = vld [vmem:[%s3879_s11 + $0x18] sm:$0xff]  }
 0x6a8   : > { %v3204_v4 = vpop.permute.xlu0 %3203  ;;  %v3199_v22 = vpop.permute.xlu1 %3198 }
 0x6a9   : > { %v3201_v10 = vunpack.i.h.bf16 %v3199_v22  ;;  %v3200_v26 = vunpack.i.l.bf16 %v3199_v22  ;;  %v3206_v1 = vunpack.i.h.bf16 %v3204_v4  ;;  %v3205_v16 = vunpack.i.l.bf16 %v3204_v4  ;;  %v3223_v4 = vld [vmem:[%s3879_s11 + $0x10] sm:$0xff]   ;;  %v3224_v22 = vld [vmem:[%s3879_s11 + $0x8] sm:$0xff]  }
 0x6ab   : > { %v2537_v53 = vsel %vm1407_vm2, %v2441_v45, %v3200_v26  ;;  %v2538_v28 = vsel %vm1407_vm2, %v2509_v19, %v3201_v10  ;;  %v3225_v10 = vld [vmem:[%s3879_s11] sm:$0xff]  }
 0x6ac   : > { %v3209_v30 = vpop.permute.xlu1 %3208  ;;  %v2540_v18 = vsel %vm2539_vm4, %v2537_v53, %v3205_v16  ;;  %v2541_v12 = vsel %vm2539_vm4, %v2538_v28, %v3206_v1  ;;  %v2969_v26 = vld [vmem:[%s3878_s10] ss:$0 sm:$0xff] }
 0x6ad   : > { %v3211_v38 = vunpack.i.h.bf16 %v3209_v30  ;;  %v3210_v40 = vunpack.i.l.bf16 %v3209_v30 }
 0x6af   : > { %v2543_v46 = vsel %vm2542_vm5, %v2540_v18, %v3210_v40  ;;  %v2544_v47 = vsel %vm2542_vm5, %v2541_v12, %v3211_v38 }
 0x6b0   : > { %v2545_v48 = vpack.c.bf16 %v2544_v47, %v2543_v46 }
 0x6b2   : > { %3145 = vmatmul.mubr.msk.bf16.vlgmr.msra.gmra.mxu1 %vm449_vm0, %v2545_v48 }
 0x6b3   : > { %3172 = vmatprep.mubr.msk.bf16.mxu1 %vm3285_vm1, %v3284_v15  ;;  %3157 = vmatpush3.bf16.msra.mxu1 %v3218_v21 }
 0x6b4   : > { %3158 = vmatprep.subr.bf16.mxu1 %v3284_v15 }
 0x6b7   : > { %3159 = vmatpush3.bf16.msra.mxu1 %v3219_v23 }
 0x6b8   : > { %3160 = vmatprep.subr.bf16.mxu1 %v3284_v15 }
 0x6bb   : > { %3161 = vmatpush3.bf16.msra.mxu1 %v3220_v24 }
 0x6bc   : > { %3162 = vmatprep.subr.bf16.mxu1 %v3284_v15 }
 0x6bf   : > { %3163 = vmatpush3.bf16.msra.mxu1 %v3221_v25 }
 0x6c0   : > { %3164 = vmatprep.subr.bf16.mxu1 %v3284_v15 }
 0x6c3   : > { %3165 = vmatpush3.bf16.msra.mxu1 %v3222_v39 }
 0x6c4   : > { %3166 = vmatprep.subr.bf16.mxu1 %v3284_v15 }
 0x6c7   : > { %3167 = vmatpush3.bf16.msra.mxu1 %v3223_v4 }
 0x6c8   : > { %3168 = vmatprep.subr.bf16.mxu1 %v3284_v15 }
 0x6cb   : > { %3169 = vmatpush3.bf16.msra.mxu1 %v3224_v22 }
 0x6cc   : > { %3170 = vmatprep.subr.bf16.mxu1 %v3284_v15 }
 0x6cf   : > { %3171 = vmatpush3.bf16.msra.mxu1 %v3225_v10 }
 0x772   : > { %v2606_v36 = vpop.f32.mrf.mxu1 }
 0x773   : > { %v2607_v45 = vadd.f32 %v2963_v33, %v2606_v36 }
 0x774   : > { %v3146_v27 = vpop.f32.mrf.mxu1 }
 0x775   : > { %v3792_v20 = vadd.f32 %v3274_v37, %v2607_v45 }
 0x776   : > { %v2609_v31 = vpop.f32.mrf.mxu1 }
 0x777   : > { %v2610_v34 = vadd.f32 %v2963_v33, %v2609_v31  ;;  %v2617_v32 = vsel %vm449_vm0, %v3792_v20, 0.0 }
 0x778   : > { %2618 = vadd.xlane.f32.xlu1 %v2617_v32  ;;  %v3147_v2 = vpop.f32.mrf.mxu1 }
 0x779   : > { %v3797_v35 = vadd.f32 %v3275_v29, %v2610_v34  ;;  %v2975_v34 = vld [vmem:[%s3880_s12] ss:$0 sm:$0xff] }
 0x77b   : > { %v2620_v49 = vsel %vm449_vm0, %v3797_v35, 0.0 }
 0x77c   : > { %2621 = vadd.xlane.f32.xlu0 %v2620_v49 }
 0x801   : > { %v2619_v50 = vpop.xlane.xlu1 %2618 }
 0x802   : > { %v2623_v51 = vmul.f32 0.03125, %v2619_v50 }
 0x804   : > { %v2625_v52 = vsub.f32 %v3792_v20, %v2623_v51 }
 0x805   : > { %v2622_v41 = vpop.xlane.xlu0 %2621 }
 0x806   : > { %v2624_v54 = vmul.f32 0.03125, %v2622_v41  ;;  %v2627_v55 = vmul.f32 %v2625_v52, %v2625_v52 }
 0x808   : > { %v2626_v57 = vsub.f32 %v3797_v35, %v2624_v54  ;;  %v2629_v58 = vsel %vm449_vm0, %v2627_v55, 0.0 }
 0x809   : > { %2630 = vadd.xlane.f32.xlu0 %v2629_v58 }
 0x80a   : > { %v2628_v59 = vmul.f32 %v2626_v57, %v2626_v57 }
 0x80c   : > { %v2632_v60 = vsel %vm449_vm0, %v2628_v59, 0.0 }
 0x80d   : > { %2633 = vadd.xlane.f32.xlu1 %v2632_v60 }
 0x892   : > { %v2631_v0 = vpop.xlane.xlu0 %2630 }
 0x893   : > { %v2635_v3 = vmul.f32 0.03125, %v2631_v0 }
 0x895   : > { %v2637_v5 = vadd.f32 1e-05, %v2635_v3 }
 0x896   : > { %v2634_v6 = vpop.xlane.xlu1 %2633 }
 0x897   : > { %3262 = vrsqrt.f32 %v2637_v5  ;;  %v2636_v42 = vmul.f32 0.03125, %v2634_v6 }
 0x899   : > { %v2638_v44 = vadd.f32 1e-05, %v2636_v42 }
 0x89b   : > { %3264 = vrsqrt.f32 %v2638_v44 }
 0x8a4   : > { %v3263_v7 = vpop.eup %3262 }
 0x8a5   : > { %v2641_v43 = vmul.f32 %v3263_v7, %v2625_v52 }
 0x8a7   : > { %v2649_v11 = vmul.f32 %v2967_v8, %v2641_v43 }
 0x8a8   : > { %v3265_v63 = vpop.eup %3264 }
 0x8a9   : > { %v2642_v56 = vmul.f32 %v3265_v63, %v2626_v57  ;;  %v2657_v17 = vadd.f32 %v2968_v13, %v2649_v11 }
 0x8ab   : > { %v2650_v14 = vmul.f32 %v2967_v8, %v2642_v56 }
 0x8ad   : > { %v2658_v9 = vadd.f32 %v2968_v13, %v2650_v14 }
 0x8af   : > { %v2659_v19 = vpack.c.bf16 %v2658_v9, %v2657_v17 }
 0x8b1   : > { %3153 = vmatmul.mubr.msk.bf16.vlgmr.msra.gmra.mxu0 %vm449_vm0, %v2659_v19 }
 0x971   : > { %v2720_v1 = vpop.f32.mrf.mxu0 }
 0x972   : > { %v2721_v16 = vadd.f32 %v2969_v26, %v2720_v1 }
 0x973   : > { %v3154_v53 = vpop.f32.mrf.mxu0 }
 0x974   : > { %v2973_v28 = vmul.f32 -1.702, %v2721_v16 }
 0x975   : > { %v2723_v30 = vpop.f32.mrf.mxu0 }
 0x976   : > { %v2731_v38 = vmul.f32 1.442695, %v2973_v28  ;;  %v2724_v40 = vadd.f32 %v2969_v26, %v2723_v30 }
 0x977   : > { %v3155_v18 = vpop.f32.mrf.mxu0 }
 0x978   : > { %3266 = vpow2.f32 %v2731_v38  ;;  %v2974_v12 = vmul.f32 -1.702, %v2724_v40 }
 0x97a   : > { %v2733_v15 = vmul.f32 1.442695, %v2974_v12 }
 0x97c   : > { %3268 = vpow2.f32 %v2733_v15 }
 0x985   : > { %v3267_v46 = vpop.eup %3266 }
 0x986   : > { %v2735_v47 = vadd.f32 1.0, %v3267_v46 }
 0x988   : > { %3270 = vrcp.f32 %v2735_v47 }
 0x989   : > { %v3269_v48 = vpop.eup %3268 }
 0x98a   : > { %v2736_v33 = vadd.f32 1.0, %v3269_v48 }
 0x98c   : > { %3272 = vrcp.f32 %v2736_v33 }
 0x995   : > { %v3271_v36 = vpop.eup %3270 }
 0x996   : > { %v2741_v27 = vmul.f32 %v3271_v36, %v2721_v16 }
 0x999   : > { %v3273_v45 = vpop.eup %3272 }
 0x99a   : > { %v2742_v37 = vmul.f32 %v3273_v45, %v2724_v40 }
 0x99c   : > { %v2743_v31 = vpack.c.bf16 %v2742_v37, %v2741_v27 }
 0x99e   : > { %3173 = vmatmul.mubr.bf16.vlgmr.msra.gmra.mxu1 %v2743_v31 }
 0xa5e   : > { %v2849_v32 = vpop.f32.mrf.mxu1 }
 0xa5f   : > { %v2850_v2 = vadd.f32 %v2975_v34, %v2849_v32 }
 0xa60   : > { %v3174_v29 = vpop.f32.mrf.mxu1 }
 0xa61   : > { %v2856_v49 = vadd.f32 %v2850_v2, %v3792_v20 }
 0xa62   : > { %v2852_v50 = vpop.f32.mrf.mxu1 }
 0xa63   : > { %2858 = vst.msk [vmem:[%s442_s30] sm:$0xff] %vm449_vm0, %v2856_v49  ;;  %v2853_v51 = vadd.f32 %v2975_v34, %v2852_v50 }
 0xa64   : > { %v3175_v52 = vpop.f32.mrf.mxu1 }
 0xa65   : > { %v2857_v41 = vadd.f32 %v2853_v51, %v3797_v35 }
 0xa67   : > { %2859 = vst.msk [vmem:[%s442_s30 + $0x8] sm:$0xff] %vm449_vm0, %v2857_v41 }
 0xa68 PF: > { %s23_s25 = sadd.s32 1, %s3282_s25  }
 0xa69   : > { %p20_p4 = scmp.ge.s32.totalorder %s23_s25, 6  }
 0xa6b   :  { %22 = sbr.rel (!%p20_p4) target bundleno = 1 (0x1), region = 102 }

// kernel: transformer_forward.2
= control target key start
LH: loop header
LB: loop body
LE: loop exit
PB: predicated region body
PF: predicated region fallthrough
CT: control target
= control target key end

     0   :  { %s3367_s25 = smov 0   ;;  %s3868_s0 = inlined_call_operand.vmem [shape: f32[8,8,32], index: 0, kind: input, shape index: {}, may-alias: {0,13}]   ;;  %s3869_s1 = inlined_call_operand.vmem [shape: f32[1,32], index: 1, kind: input, shape index: {}]   ;;  %s3870_s2 = inlined_call_operand.vmem [shape: f32[1,32], index: 2, kind: input, shape index: {}]   ;;  %s3871_s3 = inlined_call_operand.vmem [shape: bf16[32,96], index: 3, kind: input, shape index: {}]   ;;  %s3872_s4 = inlined_call_operand.vmem [shape: f32[1,96], index: 4, kind: input, shape index: {}]   ;;  %s3873_s5 = inlined_call_operand.vmem [shape: bf16[32,32], index: 5, kind: input, shape index: {}]   ;;  %s3874_s6 = inlined_call_operand.vmem [shape: f32[1,32], index: 6, kind: input, shape index: {}]   ;;  %s3875_s7 = inlined_call_operand.vmem [shape: f32[1,32], index: 7, kind: input, shape index: {}]   ;;  %s3876_s8 = inlined_call_operand.vmem [shape: f32[1,32], index: 8, kind: input, shape index: {}]   ;;  %s3877_s9 = inlined_call_operand.vmem [shape: bf16[32,128], index: 9, kind: input, shape index: {}]   ;;  %s3878_s10 = inlined_call_operand.vmem [shape: f32[1,128], index: 10, kind: input, shape index: {}]   ;;  %s3879_s11 = inlined_call_operand.vmem [shape: bf16[128,32], index: 11, kind: input, shape index: {}]   ;;  %s3880_s12 = inlined_call_operand.vmem [shape: f32[1,32], index: 12, kind: input, shape index: {}]   ;;  %s3881_s13 = inlined_call_operand.vmem [shape: f32[8,8,32], index: 13, kind: output, shape index: {}, may-alias: {0,13}]  }
   0x1 LB: > { %s2916_s26 = sadd.s32 4294967295, %s3282_s25   ;;  %p2920_p0 = scmp.ge.s32.totalorder %s3282_s25, 1  ;;  %s3282_s25 = sphi %s3367_s25, %s23_s25  }
   0x2   : > { %p388_p1 = scmp.lt.s32.totalorder %s3282_s25, 5 }
   0x4   : > { %p389_p2 = pnand %p2920_p0, %p388_p1 }
   0x5   : > { %s2921_s27 = sshll.u32 (!%p389_p2), %s2916_s26, 1  ;;  %s3286_s26 = smov (!%p389_p2), 112  }
   0x6   : > { %392 = sbr.rel (%p389_p2) target bundleno = 2664 (0xa68), region = 72  ;;  %p433_p3 = scmp.lt.s32.totalorder (!%p389_p2), %s2921_s27, 7 }
   0x7   : > { %s3287_s29 = smov (!%p389_p2), 120   ;;  %s3288_s30 = smov (!%p389_p2), 104  }
   0x8   : > { %s3289_s15 = smov (!%p389_p2), 96   ;;  %s3293_s16 = smov (!%p389_p2), 64  }
   0x9   : > { %s3294_s21 = smov (!%p389_p2), 16   ;;  %s3295_s22 = smov (!%p389_p2), 8  }
   0xa   : > { %s3296_s23 = smov (!%p389_p2), 24  }
   0xb   : > { %s3883_s27 = smov (!%p433_p3, %s2921_s27), 7  ;;  %vm449_vm0 = vcmask 261120   ;;  %v3212_v14 = vld [vmem:[%s3871_s3 + $0x8] sm:$0xff]   ;;  %v3284_v15 = vmov 0.0   ;;  %vm3285_vm1 = vmmov 0   ;;  %v3213_v16 = vld [vmem:[%s3871_s3] sm:$0xff]   ;;  %v595_v47 = vlaneseq }
   0xc   : > { %s2922_s28 = sshll.u32 %s3883_s27, 3  ;;  %3036 = vmatprep.subr.bf16.mxu0 %v3284_v15  ;;  %3040 = vmatprep.mubr.msk.bf16.mxu0 %vm3285_vm1, %v3284_v15  ;;  %v2925_v25 = vld [vmem:[%s3869_s1] ss:$0 sm:$0xff]  ;;  %v3290_v45 = vmov 1983009808   ;;  %vm1407_vm2 = vcmask 64512  }
   0xd   : > { %s3383_s14 = scalar_lea.vmem %s3868_s0, %s2922_s28  ;;  %3037 = vmatpush3.bf16.msra.mxu0 %v3212_v14  ;;  %3056 = vmatprep.subr.bf16.mxu1 %v3284_v15  ;;  %v2926_v29 = vld [vmem:[%s3870_s2] ss:$0 sm:$0xff]  ;;  %v593_v46 = vunpack.c.l.s4 %v3290_v45  ;;  %v596_v49 = vshrl.u32 %v595_v47, 7  ;;  %v3291_v53 = vmov 1934713408   ;;  %vm1875_vm3 = vcmask 1043456  }
   0xe   : > { %v445_v0 = vld [vmem:[%s3383_s14] sm:$0xff]  ;;  %v446_v1 = vld [vmem:[%s3383_s14 + $0x8] sm:$0xff]  ;;  %3038 = vmatprep.subr.bf16.mxu0 %v3284_v15  ;;  %3058 = vmatprep.mubr.msk.bf16.mxu1 %vm3285_vm1, %v3284_v15  ;;  %v624_v54 = vunpack.c.l.s4 %v3291_v53  ;;  %vm2539_vm4 = vcmask 130048   ;;  %vm2542_vm5 = vcmask 195584  }
   0xf   : > { %v450_v2 = vsel %vm449_vm0, %v445_v0, 0.0  ;;  %v453_v3 = vsel %vm449_vm0, %v446_v1, 0.0  ;;  %v2927_v35 = vld [vmem:[%s3872_s4] ss:$0 sm:$0xff]  ;;  %v594_v48 = vunpack.c.0.s8 %v593_v46 }
  0x10   : > { %451 = vadd.xlane.f32.xlu0 %v450_v2  ;;  %v625_v61 = vunpack.c.0.s8 %v624_v54 }
  0x11   : > { %3039 = vmatpush3.bf16.msra.mxu0 %v3213_v16  ;;  %v3437_v56 = vsub.s32 %v594_v48, %v596_v49 }
  0x12   : > { %3044 = vmatprep.subr.bf16.mxu0 %v3284_v15 }
  0x14   : > { %454 = vadd.xlane.f32.xlu0 %v453_v3 }
  0x99   : > { %v452_v4 = vpop.xlane.xlu0 %451 }
  0x9a   : > { %v457_v5 = vmul.f32 0.03125, %v452_v4  ;;  %v3450_v4 = vsub.s32 %v625_v61, %v596_v49 }
  0x9c   : > { %v459_v6 = vsub.f32 %v445_v0, %v457_v5 }
  0x9d   : > { %v455_v7 = vpop.xlane.xlu0 %454 }
  0x9e   : > { %v458_v8 = vmul.f32 0.03125, %v455_v7  ;;  %v461_v9 = vmul.f32 %v459_v6, %v459_v6 }
  0xa0   : > { %v460_v10 = vsub.f32 %v446_v1, %v458_v8  ;;  %v463_v11 = vsel %vm449_vm0, %v461_v9, 0.0  ;;  %v3292_v1 = vmov 0  }
  0xa1   : > { %464 = vadd.xlane.f32.xlu1 %v463_v11  ;;  %v3447_v2 = vpack.i.b16 %v3292_v1, %v3292_v1 }
  0xa2   : > { %v462_v12 = vmul.f32 %v460_v10, %v460_v10 }
  0xa4   : > { %v466_v13 = vsel %vm449_vm0, %v462_v12, 0.0 }
  0xa5   : > { %467 = vadd.xlane.f32.xlu1 %v466_v13 }
 0x12a   : > { %v465_v17 = vpop.xlane.xlu1 %464 }
 0x12b   : > { %v469_v18 = vmul.f32 0.03125, %v465_v17 }
 0x12d   : > { %v471_v19 = vadd.f32 1e-05, %v469_v18 }
 0x12e   : > { %v468_v20 = vpop.xlane.xlu1 %467 }
 0x12f   : > { %3226 = vrsqrt.f32 %v471_v19  ;;  %v470_v21 = vmul.f32 0.03125, %v468_v20 }
 0x131   : > { %v472_v22 = vadd.f32 1e-05, %v470_v21 }
 0x133   : > { %3228 = vrsqrt.f32 %v472_v22 }
 0x13c   : > { %v3227_v23 = vpop.eup %3226 }
 0x13d   : > { %v475_v24 = vmul.f32 %v3227_v23, %v459_v6 }
 0x13f   : > { %v483_v28 = vmul.f32 %v2925_v25, %v475_v24 }
 0x140   : > { %v3229_v26 = vpop.eup %3228 }
 0x141   : > { %v476_v27 = vmul.f32 %v3229_v26, %v460_v10  ;;  %v491_v31 = vadd.f32 %v2926_v29, %v483_v28 }
 0x143   : > { %v484_v30 = vmul.f32 %v2925_v25, %v476_v27 }
 0x145   : > { %v492_v32 = vadd.f32 %v2926_v29, %v484_v30 }
 0x147   : > { %v493_v33 = vpack.c.bf16 %v492_v32, %v491_v31 }
 0x149   : > { %3041 = vmatmul.mubr.msk.bf16.vlgmr.msra.gmra.mxu0 %vm449_vm0, %v493_v33 }
 0x14a   : > { %3046 = vmatprep.mubr.msk.bf16.mxu0 %vm3285_vm1, %v3284_v15 }
 0x209   : > { %v554_v34 = vpop.f32.mrf.mxu0 }
 0x20a   : > { %v555_v38 = vadd.f32 %v2927_v35, %v554_v34 }
 0x20b   : > { %v3042_v36 = vpop.f32.mrf.mxu0 }
 0x20d   : > { %v557_v37 = vpop.f32.mrf.mxu0 }
 0x20e   : > { %v558_v39 = vadd.f32 %v2927_v35, %v557_v37 }
 0x20f   : > { %v3043_v40 = vpop.f32.mrf.mxu0 }
 0x210   : > { %v3417_v41 = vpack.c.bf16 %v558_v39, %v555_v38 }
 0x212   : > { %565 = vrot.lane.b32.xlu1 %v3417_v41, %s3286_s26  ;;  %563 = vrot.lane.b32.xlu0 %v3417_v41, %s3287_s29  ;;  %v573_v58 = vshrl.u32 %v3417_v41, 16 }
 0x216   : > { %567 = vrot.lane.b32.xlu1 %v3417_v41, %s3288_s30  ;;  %s442_s30 = scalar_lea.vmem %s3881_s13, %s2922_s28 }
 0x21a   : > { %847 = vrot.lane.b32.xlu1 %v3417_v41, %s3289_s15 }
 0x284   : > { %v3423_v42 = vpop.permute.xlu1 %565  ;;  %v3425_v43 = vpop.permute.xlu0 %563 }
 0x285   : > { %851 = vrot.lane.b32.xlu1 %v3423_v42, %s3289_s15  ;;  %849 = vrot.lane.b32.xlu0 %v3425_v43, %s3289_s15  ;;  %v581_v51 = vshrl.u32 %v3423_v42, 16  ;;  %v574_v52 = vshrl.u32 %v3425_v43, 16  ;;  %v571_v57 = vpack.i.b16 %v3425_v43, %v3417_v41 }
 0x287   : > { %v575_v60 = vpack.i.b16 %v574_v52, %v573_v58  ;;  %v598_v63 = vrot.slane %v571_v57, %v3437_v56  ;;  %v591_v12 = vcombine.high %v571_v57, %v3447_v2 }
 0x288   : > { %v3429_v44 = vpop.permute.xlu1 %567 }
 0x289   : > { %853 = vrot.lane.b32.xlu0 %v3429_v44, %s3289_s15  ;;  %v582_v50 = vshrl.u32 %v3429_v44, 16  ;;  %v579_v55 = vpack.i.b16 %v3429_v44, %v3423_v42  ;;  %v664_v3 = vrot.slane %v575_v60, %v3437_v56  ;;  %v657_v13 = vcombine.high %v575_v60, %v3447_v2 }
 0x28a   : > { %v3468_v27 = vrot.slane %v591_v12, %v3437_v56 }
 0x28b   : > { %v583_v59 = vpack.i.b16 %v582_v50, %v581_v51  ;;  %v613_v62 = vrot.slane %v579_v55, %v3437_v56  ;;  %v606_v17 = vcombine.high %v579_v55, %v3447_v2  ;;  %v3471_v28 = vrot.slane %v657_v13, %v3437_v56 }
 0x28c   : > { %v848_v7 = vpop.permute.xlu1 %847 }
 0x28d   : > { %v679_v0 = vrot.slane %v583_v59, %v3437_v56  ;;  %v621_v5 = vcombine.low %v598_v63, %v613_v62  ;;  %v622_v6 = vcombine.high %v598_v63, %v613_v62  ;;  %v672_v8 = vcombine.high %v583_v59, %v3447_v2 }
 0x28e   : > { %v859_v20 = vshrl.u32 %v848_v7, 16  ;;  %v3475_v31 = vrot.slane %v606_v17, %v3437_v56 }
 0x28f   : > { %v687_v9 = vcombine.low %v664_v3, %v679_v0  ;;  %v688_v10 = vcombine.high %v664_v3, %v679_v0  ;;  %v3457_v18 = vrot.slane %v621_v5, %v3450_v4  ;;  %v3460_v19 = vrot.slane %v622_v6, %v3450_v4 }
 0x290   : > { %v3463_v22 = vrot.slane %v672_v8, %v3437_v56 }
 0x291   : > { %v695_v23 = vrot.slane %v687_v9, %v3450_v4  ;;  %v702_v24 = vrot.slane %v688_v10, %v3450_v4  ;;  %v723_v32 = vcombine.low %v3457_v18, %v3460_v19  ;;  %v2931_v35 = vcombine.high %v3457_v18, %v3460_v19 }
 0x292   : > { %v703_v39 = vcombine.low %v3471_v28, %v3463_v22 }
 0x293   : > { %v748_v40 = vcombine.low %v695_v23, %v702_v24  ;;  %v2932_v51 = vcombine.high %v695_v23, %v702_v24 }
 0x295   : > { %v755_v12 = vrot.slane %v748_v40, %v3437_v56 }
 0x2f7   : > { %v850_v11 = vpop.permute.xlu0 %849  ;;  %v852_v21 = vpop.permute.xlu1 %851 }
 0x2f8   : > { %v857_v14 = vpack.i.b16 %v850_v11, %v848_v7  ;;  %v860_v16 = vshrl.u32 %v850_v11, 16  ;;  %v867_v33 = vshrl.u32 %v852_v21, 16  ;;  %v704_v11 = vcombine.high %v3471_v28, %v3463_v22 }
 0x2fa   : > { %v861_v25 = vpack.i.b16 %v860_v16, %v859_v20  ;;  %v871_v29 = vcombine.high %v857_v14, %v3447_v2  ;;  %v878_v36 = vrot.slane %v857_v14, %v3437_v56  ;;  %v763_v20 = vrot.slane %v2932_v51, %v3437_v56 }
 0x2fb   : > { %v854_v26 = vpop.permute.xlu0 %853 }
 0x2fc   : > { %v865_v30 = vpack.i.b16 %v854_v26, %v852_v21  ;;  %v868_v34 = vshrl.u32 %v854_v26, 16  ;;  %v937_v45 = vcombine.high %v861_v25, %v3447_v2  ;;  %v885_v47 = vrot.slane %v871_v29, %v3437_v56 }
 0x2fd   : > { %v944_v52 = vrot.slane %v861_v25, %v3437_v56  ;;  %v637_v29 = vcombine.low %v3468_v27, %v3475_v31 }
 0x2fe   : > { %v886_v37 = vcombine.high %v865_v30, %v3447_v2  ;;  %v893_v38 = vrot.slane %v865_v30, %v3437_v56  ;;  %v869_v46 = vpack.i.b16 %v868_v34, %v867_v33  ;;  %v951_v60 = vrot.slane %v937_v45, %v3437_v56 }
 0x2ff   : > { %v638_v30 = vcombine.high %v3468_v27, %v3475_v31  ;;  %v730_v33 = vrot.slane %v723_v32, %v3437_v56  ;;  %v738_v34 = vrot.slane %v2931_v35, %v3437_v56  ;;  %v711_v45 = vrot.slane %v703_v39, %v3450_v4 }
 0x300   : > { %v900_v48 = vrot.slane %v886_v37, %v3437_v56  ;;  %v901_v49 = vcombine.low %v878_v36, %v893_v38  ;;  %v902_v50 = vcombine.high %v878_v36, %v893_v38  ;;  %v952_v53 = vcombine.high %v869_v46, %v3447_v2 }
 0x301   : > { %v959_v54 = vrot.slane %v869_v46, %v3437_v56  ;;  %v718_v46 = vrot.slane %v704_v11, %v3450_v4  ;;  %v645_v32 = vrot.slane %v637_v29, %v3450_v4  ;;  %v652_v35 = vrot.slane %v638_v30, %v3450_v4 }
 0x302   : > { %v909_v55 = vrot.slane %v901_v49, %v3450_v4  ;;  %v916_v57 = vrot.slane %v902_v50, %v3450_v4  ;;  %v917_v58 = vcombine.low %v885_v47, %v900_v48  ;;  %v918_v59 = vcombine.high %v885_v47, %v900_v48 }
 0x303   : > { %v966_v61 = vrot.slane %v952_v53, %v3437_v56  ;;  %v967_v62 = vcombine.low %v944_v52, %v959_v54  ;;  %v968_v63 = vcombine.high %v944_v52, %v959_v54  ;;  %v764_v47 = vcombine.low %v755_v12, %v763_v20 }
 0x304   : > { %v925_v0 = vrot.slane %v917_v58, %v3450_v4  ;;  %v932_v3 = vrot.slane %v918_v59, %v3450_v4  ;;  %v1003_v5 = vcombine.low %v909_v55, %v916_v57  ;;  %v2935_v6 = vcombine.high %v909_v55, %v916_v57 }
 0x305   : > { %v975_v7 = vrot.slane %v967_v62, %v3450_v4  ;;  %v982_v8 = vrot.slane %v968_v63, %v3450_v4  ;;  %v983_v9 = vcombine.low %v951_v60, %v966_v61  ;;  %v984_v10 = vcombine.high %v951_v60, %v966_v61 }
 0x306   : > { %v1010_v13 = vrot.slane %v1003_v5, %v3437_v56  ;;  %v1018_v14 = vrot.slane %v2935_v6, %v3437_v56  ;;  %v1053_v21 = vcombine.low %v925_v0, %v932_v3  ;;  %v2937_v23 = vcombine.high %v925_v0, %v932_v3 }
 0x307   : > { %v991_v16 = vrot.slane %v983_v9, %v3450_v4  ;;  %v998_v17 = vrot.slane %v984_v10, %v3450_v4  ;;  %v1028_v18 = vcombine.low %v975_v7, %v982_v8  ;;  %v2936_v19 = vcombine.high %v975_v7, %v982_v8 }
 0x308   : > { %v1019_v24 = vcombine.low %v1010_v13, %v1018_v14  ;;  %v1060_v48 = vrot.slane %v1053_v21, %v3437_v56  ;;  %v1068_v27 = vrot.slane %v2937_v23, %v3437_v56  ;;  %v739_v49 = vcombine.low %v730_v33, %v738_v34 }
 0x309   : > { %v1035_v25 = vrot.slane %v1028_v18, %v3437_v56  ;;  %v1043_v22 = vrot.slane %v2936_v19, %v3437_v56  ;;  %v1078_v26 = vcombine.low %v991_v16, %v998_v17  ;;  %v2938_v28 = vcombine.high %v991_v16, %v998_v17 }
 0x30a   : > { %v1026_v36 = vrot.slane %v1019_v24, %v3450_v4  ;;  %v798_v53 = vcombine.low %v711_v45, %v718_v46  ;;  %v2934_v54 = vcombine.high %v711_v45, %v718_v46  ;;  %v771_v55 = vrot.slane %v764_v47, %v3450_v4 }
 0x30b   : > { %v1044_v37 = vcombine.low %v1035_v25, %v1043_v22  ;;  %v1085_v38 = vrot.slane %v1078_v26, %v3437_v56  ;;  %v1093_v40 = vrot.slane %v2938_v28, %v3437_v56  ;;  %v1069_v60 = vcombine.low %v1060_v48, %v1068_v27 }
 0x30c   : > { %v1027_v51 = vcombine.high %v1026_v36, %v3292_v1  ;;  %v773_v61 = vcombine.low %v645_v32, %v652_v35  ;;  %v2933_v62 = vcombine.high %v645_v32, %v652_v35  ;;  %v746_v0 = vrot.slane %v739_v49, %v3450_v4 }
 0x30d   : > { %v1051_v31 = vrot.slane %v1044_v37, %v3450_v4  ;;  %v1094_v52 = vcombine.low %v1085_v38, %v1093_v40  ;;  %v1106_v3 = vshrl.u32 %v1026_v36, 16  ;;  %v805_v6 = vrot.slane %v798_v53, %v3437_v56 }
 0x30e   : > { %v813_v7 = vrot.slane %v2934_v54, %v3437_v56  ;;  %v772_v9 = vcombine.high %v771_v55, %v3292_v1  ;;  %v1076_v10 = vrot.slane %v1069_v60, %v3450_v4  ;;  %v780_v11 = vrot.slane %v773_v61, %v3437_v56 }
 0x30f   : > { %v1105_v50 = vpack.i.b16 %v1051_v31, %v1026_v36  ;;  %v1052_v39 = vcombine.high %v1051_v31, %v3292_v1  ;;  %v1107_v59 = vshrl.u32 %v1051_v31, 16  ;;  %v1101_v5 = vrot.slane %v1094_v52, %v3450_v4 }
 0x310   : > { %v788_v12 = vrot.slane %v2933_v62, %v3437_v56  ;;  %v825_v13 = vpack.i.b16 %v771_v55, %v746_v0  ;;  %v747_v14 = vcombine.high %v746_v0, %v3292_v1  ;;  %v814_v20 = vcombine.low %v805_v6, %v813_v7 }
 0x311   : > { %v1412_v57 = vsel %vm1407_vm2, %v1105_v50, 0  ;;  %v1111_v58 = vpack.i.b16 %v1052_v39, %v1027_v51  ;;  %v1108_v8 = vpack.i.b16 %v1107_v59, %v1106_v3  ;;  %v1117_v16 = vpack.i.b16 %v1101_v5, %v1076_v10 }
 0x312   : > { %3045 = vmatpush3.bf16.xpose.msra.mxu0 %v1412_v57  ;;  %v1113_v17 = vshrl.u32 %v1052_v39, 16  ;;  %v831_v19 = vpack.i.b16 %v772_v9, %v747_v14  ;;  %v789_v21 = vcombine.low %v780_v11, %v788_v12  ;;  %v1112_v23 = vshrl.u32 %v1027_v51, 16 }
 0x313   : > { %v1504_v63 = vsel %vm1407_vm2, %v1111_v58, 0  ;;  %3050 = vmatprep.subr.bf16.mxu0 %v3284_v15  ;;  %v1458_v18 = vsel %vm1407_vm2, %v1108_v8, 0  ;;  %v1596_v24 = vsel %vm1407_vm2, %v1117_v16, 0  ;;  %v827_v25 = vshrl.u32 %v771_v55, 16 }
 0x314   : > { %3057 = vmatpush3.bf16.xpose.msra.mxu1 %v1504_v63  ;;  %v1102_v22 = vcombine.high %v1101_v5, %v3292_v1  ;;  %v826_v26 = vshrl.u32 %v746_v0, 16  ;;  %v1114_v28 = vpack.i.b16 %v1113_v17, %v1112_v23  ;;  %v821_v29 = vrot.slane %v814_v20, %v3450_v4 }
 0x315   : > { %3068 = vmatprep.subr.bf16.mxu1 %v3284_v15  ;;  %v1077_v30 = vcombine.high %v1076_v10, %v3292_v1  ;;  %v796_v34 = vrot.slane %v789_v21, %v3450_v4  ;;  %v1119_v40 = vshrl.u32 %v1101_v5, 16  ;;  %v833_v45 = vshrl.u32 %v772_v9, 16 }
 0x316   : > { %v828_v33 = vpack.i.b16 %v827_v25, %v826_v26  ;;  %v1550_v37 = vsel %vm1407_vm2, %v1114_v28, 0  ;;  %v1118_v47 = vshrl.u32 %v1076_v10, 16  ;;  %v832_v48 = vshrl.u32 %v747_v14, 16 }
 0x317   : > { %v1123_v36 = vpack.i.b16 %v1102_v22, %v1077_v30  ;;  %v837_v38 = vpack.i.b16 %v821_v29, %v796_v34  ;;  %v822_v31 = vcombine.high %v821_v29, %v3292_v1  ;;  %v797_v35 = vcombine.high %v796_v34, %v3292_v1 }
 0x318   : > { %v1120_v27 = vpack.i.b16 %v1119_v40, %v1118_v47  ;;  %v834_v32 = vpack.i.b16 %v833_v45, %v832_v48  ;;  %v1125_v51 = vshrl.u32 %v1102_v22, 16  ;;  %v839_v39 = vshrl.u32 %v821_v29, 16 }
 0x319   : > { %3047 = vmatmul.mubr.msk.bf16.vlgmr.msra.gmra.mxu0 %vm1407_vm2, %v825_v13  ;;  %v1688_v46 = vsel %vm1407_vm2, %v1123_v36, 0  ;;  %v843_v50 = vpack.i.b16 %v822_v31, %v797_v35  ;;  %v1124_v52 = vshrl.u32 %v1077_v30, 16  ;;  %v838_v53 = vshrl.u32 %v796_v34, 16 }
 0x31a   : > { %3051 = vmatpush3.bf16.xpose.msra.mxu0 %v1458_v18  ;;  %3052 = vmatprep.mubr.msk.bf16.mxu0 %vm3285_vm1, %v3284_v15  ;;  %v1642_v49 = vsel %vm1407_vm2, %v1120_v27, 0  ;;  %v845_v58 = vshrl.u32 %v822_v31, 16  ;;  %v844_v59 = vshrl.u32 %v797_v35, 16 }
 0x31b   : > { %3059 = vmatmul.mubr.msk.bf16.vlgmr.msra.gmra.mxu1 %vm1407_vm2, %v831_v19  ;;  %3062 = vmatprep.subr.bf16.mxu0 %v3284_v15  ;;  %v1126_v54 = vpack.i.b16 %v1125_v51, %v1124_v52  ;;  %v840_v55 = vpack.i.b16 %v839_v39, %v838_v53 }
 0x31c   : > { %3069 = vmatpush3.bf16.xpose.msra.mxu1 %v1596_v24  ;;  %3070 = vmatprep.mubr.msk.bf16.mxu1 %vm3285_vm1, %v3284_v15  ;;  %v846_v60 = vpack.i.b16 %v845_v58, %v844_v59 }
 0x31d   : > { %3080 = vmatprep.subr.bf16.mxu1 %v3284_v15  ;;  %v1734_v57 = vsel %vm1407_vm2, %v1126_v54, 0 }
 0x321   : > { %3053 = vmatmul.mubr.msk.bf16.vlgmr.msra.gmra.mxu0 %vm1407_vm2, %v828_v33 }
 0x322   : > { %3063 = vmatpush3.bf16.xpose.msra.mxu0 %v1550_v37  ;;  %3064 = vmatprep.mubr.msk.bf16.mxu0 %vm3285_vm1, %v3284_v15 }
 0x323   : > { %3071 = vmatmul.mubr.msk.bf16.vlgmr.msra.gmra.mxu1 %vm1407_vm2, %v837_v38  ;;  %3074 = vmatprep.subr.bf16.mxu0 %v3284_v15 }
 0x324   : > { %3081 = vmatpush3.bf16.xpose.msra.mxu1 %v1688_v46  ;;  %3082 = vmatprep.mubr.msk.bf16.mxu1 %vm3285_vm1, %v3284_v15 }
 0x325   : > { %3092 = vmatprep.subr.bf16.mxu1 %v3284_v15 }
 0x329   : > { %3065 = vmatmul.mubr.msk.bf16.vlgmr.msra.gmra.mxu0 %vm1407_vm2, %v834_v32 }
 0x32a   : > { %3075 = vmatpush3.bf16.xpose.msra.mxu0 %v1642_v49  ;;  %3076 = vmatprep.mubr.msk.bf16.mxu0 %vm3285_vm1, %v3284_v15 }
 0x32b   : > { %3083 = vmatmul.mubr.msk.bf16.vlgmr.msra.gmra.mxu1 %vm1407_vm2, %v843_v50  ;;  %3086 = vmatprep.subr.bf16.mxu0 %v3284_v15 }
 0x32c   : > { %3094 = vmatprep.mubr.msk.bf16.mxu1 %vm3285_vm1, %v3284_v15 }
 0x331   : > { %3077 = vmatmul.mubr.msk.bf16.vlgmr.msra.gmra.mxu0 %vm1407_vm2, %v840_v55 }
 0x332   : > { %3087 = vmatpush3.bf16.xpose.msra.mxu0 %v1734_v57  ;;  %3088 = vmatprep.mubr.msk.bf16.mxu0 %vm3285_vm1, %v3284_v15 }
 0x333   : > { %3098 = vmatprep.subr.bf16.mxu0 %v3284_v15 }
 0x339   : > { %3089 = vmatmul.mubr.msk.bf16.vlgmr.msra.gmra.mxu0 %vm1407_vm2, %v846_v60 }
 0x33a   : > { %3100 = vmatprep.mubr.msk.bf16.mxu0 %vm3285_vm1, %v3284_v15 }
 0x3d9   : > { %v1448_v61 = vpop.f32.mrf.mxu0 }
 0x3da   : > { %v1776_v62 = vsel %vm1407_vm2, %v1448_v61, -inf }
 0x3db   : > { %v3585_v63 = vpop.f32.mrf.mxu1  ;;  %1777 = vmax.xlane.f32.xlu1 %v1776_v62  ;;  %v3048_v0 = vpop.f32.mrf.mxu0 }
 0x3dc   : > { %v1782_v17 = vsel %vm1407_vm2, %v3585_v63, -inf }
 0x3dd   : > { %v1451_v3 = vpop.f32.mrf.mxu0  ;;  %v3060_v5 = vpop.f32.mrf.mxu1 }
 0x3df   : > { %v3049_v6 = vpop.f32.mrf.mxu0  ;;  %v1543_v7 = vpop.f32.mrf.mxu1 }
 0x3e1   : > { %v1494_v8 = vpop.f32.mrf.mxu0  ;;  %v3061_v9 = vpop.f32.mrf.mxu1 }
 0x3e2   : > { %v1779_v10 = vsel %vm1407_vm2, %v1494_v8, -inf }
 0x3e3   : > { %v3588_v11 = vpop.f32.mrf.mxu1  ;;  %1780 = vmax.xlane.f32.xlu0 %v1779_v10  ;;  %v3054_v12 = vpop.f32.mrf.mxu0 }
 0x3e4   : > { %v1788_v13 = vsel %vm1407_vm2, %v3588_v11, -inf }
 0x3e5   : > { %v3072_v14 = vpop.f32.mrf.mxu1  ;;  %1789 = vmax.xlane.f32.xlu1 %v1788_v13  ;;  %v1497_v16 = vpop.f32.mrf.mxu0 }
 0x3e7   : > { %v1635_v18 = vpop.f32.mrf.mxu1  ;;  %1783 = vmax.xlane.f32.xlu0 %v1782_v17  ;;  %v3055_v19 = vpop.f32.mrf.mxu0 }
 0x3e9   : > { %v1586_v20 = vpop.f32.mrf.mxu0  ;;  %v3073_v21 = vpop.f32.mrf.mxu1 }
 0x3ea   : > { %v1785_v23 = vsel %vm1407_vm2, %v1586_v20, -inf }
 0x3eb   : > { %v1724_v24 = vpop.f32.mrf.mxu1  ;;  %1786 = vmax.xlane.f32.xlu0 %v1785_v23  ;;  %v3066_v25 = vpop.f32.mrf.mxu0 }
 0x3ec   : > { %v1794_v22 = vsel %vm1407_vm2, %v1724_v24, -inf }
 0x3ed   : > { %v3084_v26 = vpop.f32.mrf.mxu1  ;;  %1795 = vmax.xlane.f32.xlu1 %v1794_v22  ;;  %v1589_v28 = vpop.f32.mrf.mxu0 }
 0x3ef   : > { %v3067_v29 = vpop.f32.mrf.mxu0  ;;  %v1727_v30 = vpop.f32.mrf.mxu1 }
 0x3f1   : > { %v1678_v33 = vpop.f32.mrf.mxu0  ;;  %v3085_v34 = vpop.f32.mrf.mxu1 }
 0x3f2   : > { %v1791_v36 = vsel %vm1407_vm2, %v1678_v33, -inf }
 0x3f3   : > { %1792 = vmax.xlane.f32.xlu0 %v1791_v36  ;;  %v3078_v37 = vpop.f32.mrf.mxu0 }
 0x3f5   : > { %v1681_v38 = vpop.f32.mrf.mxu0 }
 0x3f7   : > { %v3079_v40 = vpop.f32.mrf.mxu0 }
 0x3f9   : > { %v1770_v45 = vpop.f32.mrf.mxu0 }
 0x3fa   : > { %v1797_v46 = vsel %vm1407_vm2, %v1770_v45, -inf }
 0x3fb   : > { %1798 = vmax.xlane.f32.xlu0 %v1797_v46  ;;  %v3090_v47 = vpop.f32.mrf.mxu0 }
 0x3fd   : > { %v1773_v48 = vpop.f32.mrf.mxu0 }
 0x3fe   : > { %1127 = vrot.lane.b32.xlu1 %v3417_v41, %s3293_s16 }
 0x3ff   : > { %v3091_v27 = vpop.f32.mrf.mxu0 }
 0x464   : > { %v1778_v31 = vpop.xlane.xlu1 %1777 }
 0x465   : > { %v1800_v32 = vsub.f32 %v1448_v61, %v1778_v31 }
 0x467   : > { %v1808_v35 = vmul.f32 1.442695, %v1800_v32 }
 0x469   : > { %3230 = vpow2.f32 %v1808_v35 }
 0x46c   : > { %v1781_v49 = vpop.xlane.xlu0 %1780 }
 0x46d   : > { %v1801_v50 = vsub.f32 %v1494_v8, %v1781_v49 }
 0x46e   : > { %v1790_v55 = vpop.xlane.xlu1 %1789 }
 0x46f   : > { %v1810_v51 = vmul.f32 1.442695, %v1801_v50  ;;  %v1804_v3 = vsub.f32 %v3588_v11, %v1790_v55 }
 0x470   : > { %v1784_v54 = vpop.xlane.xlu0 %1783 }
 0x471   : > { %3232 = vpow2.f32 %v1810_v51  ;;  %v1802_v57 = vsub.f32 %v3585_v63, %v1784_v54 }
 0x473   : > { %v1812_v61 = vmul.f32 1.442695, %v1802_v57 }
 0x474   : > { %v1787_v58 = vpop.xlane.xlu0 %1786 }
 0x475   : > { %v1803_v60 = vsub.f32 %v1586_v20, %v1787_v58  ;;  %3234 = vpow2.f32 %v1812_v61 }
 0x476   : > { %v3599_v39 = vpop.eup %3230  ;;  %v1796_v59 = vpop.xlane.xlu1 %1795 }
 0x477   : > { %v1824_v52 = vsel %vm1407_vm2, %v3599_v39, 0.0  ;;  %v1806_v62 = vsub.f32 %v1724_v24, %v1796_v59  ;;  %v1814_v0 = vmul.f32 1.442695, %v1803_v60 }
 0x478   : > { %1825 = vadd.xlane.f32.xlu1 %v1824_v52 }
 0x479   : > { %v1820_v5 = vmul.f32 1.442695, %v1806_v62  ;;  %3236 = vpow2.f32 %v1814_v0 }
 0x47a   : > { %v1128_v23 = vpop.permute.xlu1 %1127 }
 0x47b   : > { %3238 = vpow2.f32 %v1820_v5  ;;  %v1139_v36 = vshrl.u32 %v1128_v23, 16 }
 0x47c   : > { %v1793_v6 = vpop.xlane.xlu0 %1792 }
 0x47e   : > { %v3603_v53 = vpop.eup %3232 }
 0x47f   : > { %v1827_v41 = vsel %vm1407_vm2, %v3603_v53, 0.0 }
 0x480   : > { %1828 = vadd.xlane.f32.xlu0 %v1827_v41 }
 0x482   : > { %v3612_v9 = vpop.eup %3234 }
 0x483   : > { %v1830_v11 = vsel %vm1407_vm2, %v3612_v9, 0.0 }
 0x484   : > { %v1799_v7 = vpop.xlane.xlu0 %1798 }
 0x485   : > { %v1807_v8 = vsub.f32 %v1770_v45, %v1799_v7 }
 0x486   : > { %v3614_v10 = vpop.eup %3236 }
 0x487   : > { %v1822_v63 = vmul.f32 1.442695, %v1807_v8  ;;  %v1833_v14 = vsel %vm1407_vm2, %v3614_v10, 0.0 }
 0x488   : > { %v3618_v12 = vpop.eup %3238 }
 0x489   : > { %1131 = vrot.lane.b32.xlu1 %v3423_v42, %s3293_s16  ;;  %v1816_v42 = vmul.f32 1.442695, %v1804_v3  ;;  %v1842_v13 = vsel %vm1407_vm2, %v3618_v12, 0.0 }
 0x48b   : > { %3240 = vpow2.f32 %v1816_v42 }
 0x48d   : > { %1133 = vrot.lane.b32.xlu1 %v3429_v44, %s3293_s16  ;;  %v1805_v44 = vsub.f32 %v1678_v33, %v1793_v6 }
 0x496   : > { %1129 = vrot.lane.b32.xlu0 %v3425_v43, %s3293_s16  ;;  %v1818_v43 = vmul.f32 1.442695, %v1805_v44 }
 0x498   : > { %3242 = vpow2.f32 %v1818_v43  ;;  %v3624_v16 = vpop.eup %3240 }
 0x499   : > { %3244 = vpow2.f32 %v1822_v63  ;;  %v1836_v17 = vsel %vm1407_vm2, %v3624_v16, 0.0 }
 0x4a5   : > { %v3628_v18 = vpop.eup %3242 }
 0x4a6   : > { %v1839_v19 = vsel %vm1407_vm2, %v3628_v18, 0.0  ;;  %v3632_v20 = vpop.eup %3244 }
 0x4a7   : > { %v1845_v21 = vsel %vm1407_vm2, %v3632_v20, 0.0 }
 0x4b1   : > { %1831 = vadd.xlane.f32.xlu1 %v1830_v11 }
 0x4b5   : > { %1843 = vadd.xlane.f32.xlu1 %v1842_v13  ;;  %1834 = vadd.xlane.f32.xlu0 %v1833_v14 }
 0x4b9   : > { %1837 = vadd.xlane.f32.xlu0 %v1836_v17 }
 0x4bd   : > { %1840 = vadd.xlane.f32.xlu0 %v1839_v19 }
 0x4c1   : > { %1846 = vadd.xlane.f32.xlu0 %v1845_v21 }
 0x501   : > { %v1826_v24 = vpop.xlane.xlu1 %1825 }
 0x502   : > { %3246 = vrcp.f32 %v1826_v24 }
 0x505   : > { %v1132_v25 = vpop.permute.xlu1 %1131 }
 0x506   : > { %v1147_v30 = vshrl.u32 %v1132_v25, 16 }
 0x509   : > { %v1134_v22 = vpop.permute.xlu1 %1133  ;;  %v1829_v26 = vpop.xlane.xlu0 %1828 }
 0x50a   : > { %v1148_v28 = vshrl.u32 %v1134_v22, 16  ;;  %v3636_v29 = vpack.i.b16 %v1134_v22, %v1132_v25  ;;  %3248 = vrcp.f32 %v1829_v26 }
 0x50c   : > { %v3640_v37 = vpack.i.b16 %v1148_v28, %v1147_v30  ;;  %v1173_v40 = vrot.slane %v3636_v29, %v3437_v56 }
 0x50d   : > { %v1130_v33 = vpop.permute.xlu0 %1129 }
 0x50e   : > { %v3638_v34 = vpack.i.b16 %v1130_v33, %v1128_v23  ;;  %v1140_v38 = vshrl.u32 %v1130_v33, 16  ;;  %v1239_v27 = vrot.slane %v3640_v37, %v3437_v56  ;;  %v1232_v30 = vcombine.high %v3640_v37, %v3447_v2 }
 0x50f   : > { %v3247_v3 = vpop.eup %3246 }
 0x510   : > { %v1158_v45 = vrot.slane %v3638_v34, %v3437_v56  ;;  %v1141_v46 = vpack.i.b16 %v1140_v38, %v1139_v36  ;;  %v1856_v7 = vmul.f32 %v3247_v3, %v3599_v39  ;;  %v1151_v33 = vcombine.high %v3638_v34, %v3447_v2 }
 0x511   : > { %v1166_v36 = vcombine.high %v3636_v29, %v3447_v2 }
 0x512   : > { %v1181_v47 = vcombine.low %v1158_v45, %v1173_v40  ;;  %v1182_v48 = vcombine.high %v1158_v45, %v1173_v40  ;;  %v1224_v31 = vrot.slane %v1141_v46, %v3437_v56  ;;  %v1864_v25 = vpack.c.bf16 %v1856_v7, %v1856_v7 }
 0x513   : > { %v1246_v40 = vrot.slane %v1232_v30, %v3437_v56  ;;  %v1165_v45 = vrot.slane %v1151_v33, %v3437_v56 }
 0x514   : > { %v1189_v32 = vrot.slane %v1181_v47, %v3450_v4  ;;  %v1196_v35 = vrot.slane %v1182_v48, %v3450_v4  ;;  %v1247_v49 = vcombine.low %v1224_v31, %v1239_v27  ;;  %v1248_v50 = vcombine.high %v1224_v31, %v1239_v27 }
 0x516   : > { %v1283_v51 = vcombine.low %v1189_v32, %v1196_v35  ;;  %v2939_v52 = vcombine.high %v1189_v32, %v1196_v35  ;;  %v1255_v41 = vrot.slane %v1247_v49, %v3450_v4  ;;  %v1262_v54 = vrot.slane %v1248_v50, %v3450_v4 }
 0x517   : > { %v3249_v42 = vpop.eup %3248 }
 0x518   : > { %v1290_v55 = vrot.slane %v1283_v51, %v3437_v56  ;;  %v1298_v57 = vrot.slane %v2939_v52, %v3437_v56  ;;  %v1308_v58 = vcombine.low %v1255_v41, %v1262_v54  ;;  %v2940_v59 = vcombine.high %v1255_v41, %v1262_v54 }
 0x519   : > { %v1857_v13 = vmul.f32 %v3249_v42, %v3603_v53  ;;  %v1217_v53 = vcombine.high %v1141_v46, %v3447_v2  ;;  %v1180_v46 = vrot.slane %v1166_v36, %v3437_v56 }
 0x51a   : > { %v1299_v60 = vcombine.low %v1290_v55, %v1298_v57  ;;  %v1315_v61 = vrot.slane %v1308_v58, %v3437_v56  ;;  %v1323_v62 = vrot.slane %v2940_v59, %v3437_v56 }
 0x51b   : > { %v1865_v26 = vpack.c.bf16 %v1857_v13, %v1857_v13  ;;  %v1231_v38 = vrot.slane %v1217_v53, %v3437_v56  ;;  %v1197_v27 = vcombine.low %v1165_v45, %v1180_v46  ;;  %v1198_v37 = vcombine.high %v1165_v45, %v1180_v46 }
 0x51c   : > { %v1306_v0 = vrot.slane %v1299_v60, %v3450_v4  ;;  %v1324_v5 = vcombine.low %v1315_v61, %v1323_v62 }
 0x51d   : > { %v1263_v47 = vcombine.low %v1231_v38, %v1246_v40  ;;  %v1264_v48 = vcombine.high %v1231_v38, %v1246_v40  ;;  %v1205_v32 = vrot.slane %v1197_v27, %v3450_v4  ;;  %v1212_v2 = vrot.slane %v1198_v37, %v3450_v4 }
 0x51e   : > { %v1307_v6 = vcombine.high %v1306_v0, %v3292_v1  ;;  %v1331_v44 = vrot.slane %v1324_v5, %v3450_v4  ;;  %v1386_v8 = vshrl.u32 %v1306_v0, 16 }
 0x51f   : > { %v1271_v31 = vrot.slane %v1263_v47, %v3450_v4  ;;  %v1278_v34 = vrot.slane %v1264_v48, %v3450_v4  ;;  %v1333_v50 = vcombine.low %v1205_v32, %v1212_v2  ;;  %v2941_v51 = vcombine.high %v1205_v32, %v1212_v2 }
 0x520   : > { %v1385_v43 = vpack.i.b16 %v1331_v44, %v1306_v0  ;;  %v1387_v63 = vshrl.u32 %v1331_v44, 16  ;;  %v1332_v11 = vcombine.high %v1331_v44, %v3292_v1  ;;  %v1392_v14 = vshrl.u32 %v1307_v6, 16 }
 0x521   : > { %v1358_v29 = vcombine.low %v1271_v31, %v1278_v34  ;;  %v2942_v35 = vcombine.high %v1271_v31, %v1278_v34  ;;  %v1340_v55 = vrot.slane %v1333_v50, %v3437_v56  ;;  %v1348_v57 = vrot.slane %v2941_v51, %v3437_v56 }
 0x522   : > { %v1877_v17 = vsel %vm1875_vm3, %v1385_v43, 0  ;;  %v1388_v19 = vpack.i.b16 %v1387_v63, %v1386_v8  ;;  %v1391_v21 = vpack.i.b16 %v1332_v11, %v1307_v6  ;;  %v1393_v23 = vshrl.u32 %v1332_v11, 16 }
 0x523   : > { %3093 = vmatpush3.bf16.msra.mxu1 %v1877_v17  ;;  %v1365_v52 = vrot.slane %v1358_v29, %v3437_v56  ;;  %v1373_v41 = vrot.slane %v2942_v35, %v3437_v56  ;;  %v1349_v61 = vcombine.low %v1340_v55, %v1348_v57 }
 0x524   : > { %v1923_v24 = vsel %vm1875_vm3, %v1388_v19, 0  ;;  %3104 = vmatprep.subr.bf16.mxu1 %v3284_v15  ;;  %v1394_v39 = vpack.i.b16 %v1393_v23, %v1392_v14  ;;  %v1969_v22 = vsel %vm1875_vm3, %v1391_v21, 0 }
 0x525   : > { %3099 = vmatpush3.bf16.msra.mxu0 %v1923_v24  ;;  %v1374_v58 = vcombine.low %v1365_v52, %v1373_v41  ;;  %v1356_v3 = vrot.slane %v1349_v61, %v3450_v4 }
 0x526   : > { %3095 = vmatmul.mubr.msk.bf16.vlgmr.msra.gmra.mxu1 %vm1407_vm2, %v1864_v25  ;;  %3110 = vmatprep.subr.bf16.mxu0 %v3284_v15  ;;  %v2015_v28 = vsel %vm1875_vm3, %v1394_v39, 0 }
 0x527   : > { %3105 = vmatpush3.bf16.msra.mxu1 %v1969_v22  ;;  %3106 = vmatprep.mubr.msk.bf16.mxu1 %vm3285_vm1, %v3284_v15  ;;  %v1381_v62 = vrot.slane %v1374_v58, %v3450_v4  ;;  %v1398_v8 = vshrl.u32 %v1356_v3, 16 }
 0x528   : > { %3101 = vmatmul.mubr.msk.bf16.vlgmr.msra.gmra.mxu0 %vm1407_vm2, %v1865_v26  ;;  %3116 = vmatprep.subr.bf16.mxu1 %v3284_v15 }
 0x529   : > { %3111 = vmatpush3.bf16.msra.mxu0 %v2015_v28  ;;  %3112 = vmatprep.mubr.msk.bf16.mxu0 %vm3285_vm1, %v3284_v15  ;;  %v1397_v42 = vpack.i.b16 %v1381_v62, %v1356_v3  ;;  %v1399_v7 = vshrl.u32 %v1381_v62, 16  ;;  %v1382_v13 = vcombine.high %v1381_v62, %v3292_v1 }
 0x52a   : > { %3122 = vmatprep.subr.bf16.mxu0 %v3284_v15 }
 0x52b   : > { %v2061_v11 = vsel %vm1875_vm3, %v1397_v42, 0  ;;  %v1400_v17 = vpack.i.b16 %v1399_v7, %v1398_v8  ;;  %v1405_v39 = vshrl.u32 %v1382_v13, 16 }
 0x52d   : > { %v2107_v25 = vsel %vm1875_vm3, %v1400_v17, 0 }
 0x53a   : > { %v1832_v49 = vpop.xlane.xlu1 %1831 }
 0x53b   : > { %3250 = vrcp.f32 %v1832_v49 }
 0x53e   : > { %v1835_v54 = vpop.xlane.xlu0 %1834  ;;  %v1844_v60 = vpop.xlane.xlu1 %1843 }
 0x53f   : > { %3252 = vrcp.f32 %v1835_v54 }
 0x542   : > { %v1838_v59 = vpop.xlane.xlu0 %1837 }
 0x543   : > { %3254 = vrcp.f32 %v1838_v59 }
 0x544   : > { %3256 = vrcp.f32 %v1844_v60 }
 0x546   : > { %v1841_v0 = vpop.xlane.xlu0 %1840 }
 0x547   : > { %3258 = vrcp.f32 %v1841_v0 }
 0x548   : > { %v3251_v5 = vpop.eup %3250 }
 0x549   : > { %v1858_v6 = vmul.f32 %v3251_v5, %v3612_v9  ;;  %v1357_v9 = vcombine.high %v1356_v3, %v3292_v1 }
 0x54a   : > { %v1847_v44 = vpop.xlane.xlu0 %1846 }
 0x54b   : > { %v1866_v43 = vpack.c.bf16 %v1858_v6, %v1858_v6  ;;  %3260 = vrcp.f32 %v1847_v44  ;;  %v1403_v24 = vpack.i.b16 %v1382_v13, %v1357_v9  ;;  %v1404_v1 = vshrl.u32 %v1357_v9, 16 }
 0x54c   : > { %v3253_v63 = vpop.eup %3252 }
 0x54d   : > { %3107 = vmatmul.mubr.msk.bf16.vlgmr.msra.gmra.mxu1 %vm1407_vm2, %v1866_v43  ;;  %v1859_v14 = vmul.f32 %v3253_v63, %v3614_v10  ;;  %v1406_v28 = vpack.i.b16 %v1405_v39, %v1404_v1 }
 0x54e   : > { %3117 = vmatpush3.bf16.msra.mxu1 %v2061_v11  ;;  %3118 = vmatprep.mubr.msk.bf16.mxu1 %vm3285_vm1, %v3284_v15 }
 0x54f   : > { %3128 = vmatprep.subr.bf16.mxu1 %v3284_v15  ;;  %v1867_v21 = vpack.c.bf16 %v1859_v14, %v1859_v14  ;;  %v2199_v38 = vsel %vm1875_vm3, %v1406_v28, 0 }
 0x550   : > { %v3255_v19 = vpop.eup %3254 }
 0x551   : > { %v1860_v23 = vmul.f32 %v3255_v19, %v3624_v16  ;;  %3113 = vmatmul.mubr.msk.bf16.vlgmr.msra.gmra.mxu0 %vm1407_vm2, %v1867_v21  ;;  %v3257_v22 = vpop.eup %3256  ;;  %v2153_v16 = vsel %vm1875_vm3, %v1403_v24, 0 }
 0x552   : > { %3123 = vmatpush3.bf16.msra.mxu0 %v2107_v25  ;;  %3124 = vmatprep.mubr.msk.bf16.mxu0 %vm3285_vm1, %v3284_v15  ;;  %v1862_v33 = vmul.f32 %v3257_v22, %v3618_v12 }
 0x553   : > { %v1868_v10 = vpack.c.bf16 %v1860_v23, %v1860_v23  ;;  %3134 = vmatprep.subr.bf16.mxu0 %v3284_v15 }
 0x554   : > { %v3259_v26 = vpop.eup %3258  ;;  %v1870_v40 = vpack.c.bf16 %v1862_v33, %v1862_v33 }
 0x555   : > { %3119 = vmatmul.mubr.msk.bf16.vlgmr.msra.gmra.mxu1 %vm1407_vm2, %v1868_v10  ;;  %v1861_v53 = vmul.f32 %v3259_v26, %v3628_v18 }
 0x556   : > { %3129 = vmatpush3.bf16.msra.mxu1 %v2153_v16  ;;  %3130 = vmatprep.mubr.msk.bf16.mxu1 %vm3285_vm1, %v3284_v15 }
 0x557   : > { %v1869_v30 = vpack.c.bf16 %v1861_v53, %v1861_v53  ;;  %3140 = vmatprep.subr.bf16.mxu1 %v3284_v15 }
 0x558   : > { %v3261_v36 = vpop.eup %3260 }
 0x559   : > { %3125 = vmatmul.mubr.msk.bf16.vlgmr.msra.gmra.mxu0 %vm1407_vm2, %v1869_v30  ;;  %v1863_v18 = vmul.f32 %v3261_v36, %v3632_v20 }
 0x55a   : > { %3135 = vmatpush3.bf16.msra.mxu0 %v2199_v38  ;;  %3136 = vmatprep.mubr.msk.bf16.mxu0 %vm3285_vm1, %v3284_v15 }
 0x55b   : > { %3148 = vmatprep.subr.bf16.mxu0 %v3284_v15  ;;  %v1871_v12 = vpack.c.bf16 %v1863_v18, %v1863_v18 }
 0x55d   : > { %3131 = vmatmul.mubr.msk.bf16.vlgmr.msra.gmra.mxu1 %vm1407_vm2, %v1870_v40 }
 0x55e   : > { %3144 = vmatprep.mubr.msk.bf16.mxu1 %vm3285_vm1, %v3284_v15 }
 0x561   : > { %3137 = vmatmul.mubr.msk.bf16.vlgmr.msra.gmra.mxu0 %vm1407_vm2, %v1871_v12 }
 0x562   : > { %3152 = vmatprep.mubr.msk.bf16.mxu0 %vm3285_vm1, %v3284_v15 }
 0x5e6   : > { %v1913_v45 = vpop.f32.mrf.mxu1 }
 0x5e8   : > { %v3096_v46 = vpop.f32.mrf.mxu1  ;;  %v1959_v47 = vpop.f32.mrf.mxu0 }
 0x5ea   : > { %v1916_v48 = vpop.f32.mrf.mxu1  ;;  %v3102_v27 = vpop.f32.mrf.mxu0 }
 0x5ec   : > { %v3097_v37 = vpop.f32.mrf.mxu1  ;;  %v1962_v20 = vpop.f32.mrf.mxu0 }
 0x5ee   : > { %v3103_v31 = vpop.f32.mrf.mxu0 }
 0x60d   : > { %v2005_v34 = vpop.f32.mrf.mxu1 }
 0x60e   : > { %v2241_v2 = vcombine.low %v1913_v45, %v2005_v34  ;;  %v2242_v29 = vcombine.high %v1913_v45, %v2005_v34 }
 0x60f   : > { %v3108_v32 = vpop.f32.mrf.mxu1 }
 0x610   : > { %v2249_v54 = vrot.slane %v2241_v2, %v3437_v56  ;;  %v2256_v55 = vrot.slane %v2242_v29, %v3437_v56 }
 0x611   : > { %v2008_v35 = vpop.f32.mrf.mxu1  ;;  %v2051_v49 = vpop.f32.mrf.mxu0 }
 0x612   : > { %v2257_v50 = vcombine.low %v1959_v47, %v2051_v49  ;;  %v2258_v51 = vcombine.high %v1959_v47, %v2051_v49 }
 0x613   : > { %v3109_v52 = vpop.f32.mrf.mxu1  ;;  %v3114_v41 = vpop.f32.mrf.mxu0 }
 0x614   : > { %v2265_v57 = vrot.slane %v2257_v50, %v3437_v56  ;;  %v2272_v58 = vrot.slane %v2258_v51, %v3437_v56 }
 0x615   : > { %v2097_v59 = vpop.f32.mrf.mxu1  ;;  %v2054_v60 = vpop.f32.mrf.mxu0 }
 0x616   : > { %v2273_v61 = vcombine.low %v2249_v54, %v2265_v57  ;;  %v2274_v62 = vcombine.high %v2249_v54, %v2265_v57  ;;  %v2289_v0 = vcombine.low %v2256_v55, %v2272_v58  ;;  %v2290_v3 = vcombine.high %v2256_v55, %v2272_v58 }
 0x617   : > { %v3120_v5 = vpop.f32.mrf.mxu1  ;;  %v3115_v6 = vpop.f32.mrf.mxu0 }
 0x618   : > { %v2281_v42 = vrot.slane %v2273_v61, %v3450_v4  ;;  %v2288_v44 = vrot.slane %v2274_v62, %v3450_v4  ;;  %v2297_v7 = vrot.slane %v2289_v0, %v3450_v4  ;;  %v2304_v43 = vrot.slane %v2290_v3, %v3450_v4 }
 0x619   : > { %v2100_v8 = vpop.f32.mrf.mxu1  ;;  %v2143_v63 = vpop.f32.mrf.mxu0 }
 0x61a   : > { %v2377_v11 = vcombine.low %v2281_v42, %v2288_v44  ;;  %v2959_v13 = vcombine.high %v2281_v42, %v2288_v44  ;;  %v2393_v14 = vcombine.low %v2297_v7, %v2304_v43  ;;  %v2960_v17 = vcombine.high %v2297_v7, %v2304_v43  ;;  %v3215_v43 = vld [vmem:[%s3873_s5] sm:$0xff]  }
 0x61b   : > { %v3121_v9 = vpop.f32.mrf.mxu1  ;;  %v3126_v19 = vpop.f32.mrf.mxu0 }
 0x61c   : > { %v2384_v21 = vrot.slane %v2377_v11, %v3437_v56  ;;  %v2392_v23 = vrot.slane %v2959_v13, %v3437_v56  ;;  %v2400_v24 = vrot.slane %v2393_v14, %v3437_v56  ;;  %v2408_v25 = vrot.slane %v2960_v17, %v3437_v56 }
 0x61d   : > { %v2189_v39 = vpop.f32.mrf.mxu1  ;;  %v2146_v22 = vpop.f32.mrf.mxu0 }
 0x61e   : > { %v2409_v26 = vcombine.low %v2384_v21, %v2392_v23  ;;  %v2425_v1 = vcombine.low %v2400_v24, %v2408_v25  ;;  %v2309_v53 = vcombine.low %v2097_v59, %v2189_v39  ;;  %v2310_v28 = vcombine.high %v2097_v59, %v2189_v39  ;;  %v3214_v59 = vld [vmem:[%s3873_s5 + $0x8] sm:$0xff]  }
 0x61f   : > { %v3132_v10 = vpop.f32.mrf.mxu1  ;;  %v3127_v16 = vpop.f32.mrf.mxu0  ;;  %v2410_v52 = vcombine.high %v2384_v21, %v2392_v23  ;;  %v2426_v41 = vcombine.high %v2400_v24, %v2408_v25  ;;  %3141 = vmatpush3.bf16.msra.mxu1 %v3214_v59 }
 0x620   : > { %v3745_v33 = vrot.slane %v2409_v26, %v3450_v4  ;;  %v3748_v36 = vrot.slane %v2425_v1, %v3450_v4  ;;  %v2317_v47 = vrot.slane %v2309_v53, %v3437_v56  ;;  %v2324_v48 = vrot.slane %v2310_v28, %v3437_v56  ;;  %3142 = vmatprep.subr.bf16.mxu1 %v3284_v15 }
 0x621   : > { %v2192_v30 = vpop.f32.mrf.mxu1  ;;  %v2235_v38 = vpop.f32.mrf.mxu0  ;;  %v2424_v3 = vrot.slane %v2410_v52, %v3450_v4  ;;  %v2440_v5 = vrot.slane %v2426_v41, %v3450_v4 }
 0x622   : > { %v2325_v40 = vcombine.low %v2143_v63, %v2235_v38  ;;  %v2326_v18 = vcombine.high %v2143_v63, %v2235_v38  ;;  %v2441_v45 = vcombine.low %v3745_v33, %v3748_v36  ;;  %v2442_v17 = vcombine.high %v3745_v33, %v3748_v36  ;;  %v2963_v33 = vld [vmem:[%s3874_s6] ss:$0 sm:$0xff] }
 0x623   : > { %v3133_v12 = vpop.f32.mrf.mxu1  ;;  %v3138_v46 = vpop.f32.mrf.mxu0  ;;  %3143 = vmatpush3.bf16.msra.mxu1 %v3215_v43  ;;  %v2443_v13 = vcombine.low %v2424_v3, %v2440_v5  ;;  %v2444_v25 = vcombine.high %v2424_v3, %v2440_v5 }
 0x624   : > { %v2333_v27 = vrot.slane %v2325_v40, %v3437_v56  ;;  %v2340_v37 = vrot.slane %v2326_v18, %v3437_v56  ;;  %3156 = vmatprep.subr.bf16.mxu1 %v3284_v15 }
 0x625   : > { %v2238_v20 = vpop.f32.mrf.mxu0 }
 0x626   : > { %v2341_v31 = vcombine.low %v2317_v47, %v2333_v27  ;;  %v2342_v34 = vcombine.high %v2317_v47, %v2333_v27  ;;  %v2357_v32 = vcombine.low %v2324_v48, %v2340_v37  ;;  %v2358_v2 = vcombine.high %v2324_v48, %v2340_v37  ;;  %v3274_v37 = vld [vmem:[%s3383_s14] sm:$0xff] }
 0x627   : > { %v3139_v29 = vpop.f32.mrf.mxu0 }
 0x628   : > { %v2349_v35 = vrot.slane %v2341_v31, %v3450_v4  ;;  %v2356_v49 = vrot.slane %v2342_v34, %v3450_v4  ;;  %v2365_v50 = vrot.slane %v2357_v32, %v3450_v4  ;;  %v2372_v51 = vrot.slane %v2358_v2, %v3450_v4  ;;  %v3275_v29 = vld [vmem:[%s3383_s14 + $0x8] sm:$0xff] }
 0x62a   : > { %v2445_v54 = vcombine.low %v2349_v35, %v2356_v49  ;;  %v2961_v55 = vcombine.high %v2349_v35, %v2356_v49  ;;  %v2461_v57 = vcombine.low %v2365_v50, %v2372_v51  ;;  %v2962_v58 = vcombine.high %v2365_v50, %v2372_v51 }
 0x62c   : > { %v2452_v60 = vrot.slane %v2445_v54, %v3437_v56  ;;  %v2460_v61 = vrot.slane %v2961_v55, %v3437_v56  ;;  %v2468_v62 = vrot.slane %v2461_v57, %v3437_v56  ;;  %v2476_v0 = vrot.slane %v2962_v58, %v3437_v56 }
 0x62e   : > { %v2478_v6 = vcombine.high %v2452_v60, %v2460_v61  ;;  %v2494_v42 = vcombine.high %v2468_v62, %v2476_v0  ;;  %v2477_v44 = vcombine.low %v2452_v60, %v2460_v61  ;;  %v2493_v7 = vcombine.low %v2468_v62, %v2476_v0  ;;  %v3216_v61 = vld [vmem:[%s3877_s9 + $0x8] sm:$0xff]   ;;  %v3217_v62 = vld [vmem:[%s3877_s9] sm:$0xff]  }
 0x62f   : > { %3149 = vmatpush3.bf16.msra.mxu0 %v3216_v61 }
 0x630   : > { %v2492_v8 = vrot.slane %v2478_v6, %v3450_v4  ;;  %v2508_v63 = vrot.slane %v2494_v42, %v3450_v4  ;;  %v2485_v56 = vrot.slane %v2477_v44, %v3450_v4  ;;  %v2501_v11 = vrot.slane %v2493_v7, %v3450_v4  ;;  %3150 = vmatprep.subr.bf16.mxu0 %v3284_v15 }
 0x632   : > { %v2511_v14 = vcombine.low %v2492_v8, %v2508_v63  ;;  %v2510_v9 = vcombine.high %v2485_v56, %v2501_v11  ;;  %v2509_v19 = vcombine.low %v2485_v56, %v2501_v11  ;;  %v2512_v24 = vcombine.high %v2492_v8, %v2508_v63  ;;  %v2967_v8 = vld [vmem:[%s3875_s7] ss:$0 sm:$0xff] }
 0x633   : > { %3151 = vmatpush3.bf16.msra.mxu0 %v3217_v62 }
 0x634   : > { %v3202_v21 = vpack.i.bf16 %v2511_v14, %v2443_v13  ;;  %v3197_v23 = vpack.i.bf16 %v2510_v9, %v2442_v17  ;;  %v3207_v39 = vpack.i.bf16 %v2512_v24, %v2444_v25  ;;  %v2968_v13 = vld [vmem:[%s3876_s8] ss:$0 sm:$0xff]  ;;  %v3220_v24 = vld [vmem:[%s3879_s11 + $0x28] sm:$0xff]  }
 0x635   : > { %v3221_v25 = vld [vmem:[%s3879_s11 + $0x20] sm:$0xff]  }
 0x636   : > { %3203 = vrot.lane.b32.xlu0 %v3202_v21, %s3294_s21  ;;  %3198 = vrot.lane.b32.xlu1 %v3197_v23, %s3295_s22  ;;  %v3218_v21 = vld [vmem:[%s3879_s11 + $0x38] sm:$0xff]   ;;  %v3219_v23 = vld [vmem:[%s3879_s11 + $0x30] sm:$0xff]  }
 0x63a   : > { %3208 = vrot.lane.b32.xlu1 %v3207_v39, %s3296_s23  ;;  %v3222_v39 = vld [vmem:[%s3879_s11 + $0x18] sm:$0xff]  }
 0x6a8   : > { %v3204_v4 = vpop.permute.xlu0 %3203  ;;  %v3199_v22 = vpop.permute.xlu1 %3198 }
 0x6a9   : > { %v3201_v10 = vunpack.i.h.bf16 %v3199_v22  ;;  %v3200_v26 = vunpack.i.l.bf16 %v3199_v22  ;;  %v3206_v1 = vunpack.i.h.bf16 %v3204_v4  ;;  %v3205_v16 = vunpack.i.l.bf16 %v3204_v4  ;;  %v3223_v4 = vld [vmem:[%s3879_s11 + $0x10] sm:$0xff]   ;;  %v3224_v22 = vld [vmem:[%s3879_s11 + $0x8] sm:$0xff]  }
 0x6ab   : > { %v2537_v53 = vsel %vm1407_vm2, %v2441_v45, %v3200_v26  ;;  %v2538_v28 = vsel %vm1407_vm2, %v2509_v19, %v3201_v10  ;;  %v3225_v10 = vld [vmem:[%s3879_s11] sm:$0xff]  }
 0x6ac   : > { %v3209_v30 = vpop.permute.xlu1 %3208  ;;  %v2540_v18 = vsel %vm2539_vm4, %v2537_v53, %v3205_v16  ;;  %v2541_v12 = vsel %vm2539_vm4, %v2538_v28, %v3206_v1  ;;  %v2969_v26 = vld [vmem:[%s3878_s10] ss:$0 sm:$0xff] }
 0x6ad   : > { %v3211_v38 = vunpack.i.h.bf16 %v3209_v30  ;;  %v3210_v40 = vunpack.i.l.bf16 %v3209_v30 }
 0x6af   : > { %v2543_v46 = vsel %vm2542_vm5, %v2540_v18, %v3210_v40  ;;  %v2544_v47 = vsel %vm2542_vm5, %v2541_v12, %v3211_v38 }
 0x6b0   : > { %v2545_v48 = vpack.c.bf16 %v2544_v47, %v2543_v46 }
 0x6b2   : > { %3145 = vmatmul.mubr.msk.bf16.vlgmr.msra.gmra.mxu1 %vm449_vm0, %v2545_v48 }
 0x6b3   : > { %3172 = vmatprep.mubr.msk.bf16.mxu1 %vm3285_vm1, %v3284_v15  ;;  %3157 = vmatpush3.bf16.msra.mxu1 %v3218_v21 }
 0x6b4   : > { %3158 = vmatprep.subr.bf16.mxu1 %v3284_v15 }
 0x6b7   : > { %3159 = vmatpush3.bf16.msra.mxu1 %v3219_v23 }
 0x6b8   : > { %3160 = vmatprep.subr.bf16.mxu1 %v3284_v15 }
 0x6bb   : > { %3161 = vmatpush3.bf16.msra.mxu1 %v3220_v24 }
 0x6bc   : > { %3162 = vmatprep.subr.bf16.mxu1 %v3284_v15 }
 0x6bf   : > { %3163 = vmatpush3.bf16.msra.mxu1 %v3221_v25 }
 0x6c0   : > { %3164 = vmatprep.subr.bf16.mxu1 %v3284_v15 }
 0x6c3   : > { %3165 = vmatpush3.bf16.msra.mxu1 %v3222_v39 }
 0x6c4   : > { %3166 = vmatprep.subr.bf16.mxu1 %v3284_v15 }
 0x6c7   : > { %3167 = vmatpush3.bf16.msra.mxu1 %v3223_v4 }
 0x6c8   : > { %3168 = vmatprep.subr.bf16.mxu1 %v3284_v15 }
 0x6cb   : > { %3169 = vmatpush3.bf16.msra.mxu1 %v3224_v22 }
 0x6cc   : > { %3170 = vmatprep.subr.bf16.mxu1 %v3284_v15 }
 0x6cf   : > { %3171 = vmatpush3.bf16.msra.mxu1 %v3225_v10 }
 0x772   : > { %v2606_v36 = vpop.f32.mrf.mxu1 }
 0x773   : > { %v2607_v45 = vadd.f32 %v2963_v33, %v2606_v36 }
 0x774   : > { %v3146_v27 = vpop.f32.mrf.mxu1 }
 0x775   : > { %v3792_v20 = vadd.f32 %v3274_v37, %v2607_v45 }
 0x776   : > { %v2609_v31 = vpop.f32.mrf.mxu1 }
 0x777   : > { %v2610_v34 = vadd.f32 %v2963_v33, %v2609_v31  ;;  %v2617_v32 = vsel %vm449_vm0, %v3792_v20, 0.0 }
 0x778   : > { %2618 = vadd.xlane.f32.xlu1 %v2617_v32  ;;  %v3147_v2 = vpop.f32.mrf.mxu1 }
 0x779   : > { %v3797_v35 = vadd.f32 %v3275_v29, %v2610_v34  ;;  %v2975_v34 = vld [vmem:[%s3880_s12] ss:$0 sm:$0xff] }
 0x77b   : > { %v2620_v49 = vsel %vm449_vm0, %v3797_v35, 0.0 }
 0x77c   : > { %2621 = vadd.xlane.f32.xlu0 %v2620_v49 }
 0x801   : > { %v2619_v50 = vpop.xlane.xlu1 %2618 }
 0x802   : > { %v2623_v51 = vmul.f32 0.03125, %v2619_v50 }
 0x804   : > { %v2625_v52 = vsub.f32 %v3792_v20, %v2623_v51 }
 0x805   : > { %v2622_v41 = vpop.xlane.xlu0 %2621 }
 0x806   : > { %v2624_v54 = vmul.f32 0.03125, %v2622_v41  ;;  %v2627_v55 = vmul.f32 %v2625_v52, %v2625_v52 }
 0x808   : > { %v2626_v57 = vsub.f32 %v3797_v35, %v2624_v54  ;;  %v2629_v58 = vsel %vm449_vm0, %v2627_v55, 0.0 }
 0x809   : > { %2630 = vadd.xlane.f32.xlu0 %v2629_v58 }
 0x80a   : > { %v2628_v59 = vmul.f32 %v2626_v57, %v2626_v57 }
 0x80c   : > { %v2632_v60 = vsel %vm449_vm0, %v2628_v59, 0.0 }
 0x80d   : > { %2633 = vadd.xlane.f32.xlu1 %v2632_v60 }
 0x892   : > { %v2631_v0 = vpop.xlane.xlu0 %2630 }
 0x893   : > { %v2635_v3 = vmul.f32 0.03125, %v2631_v0 }
 0x895   : > { %v2637_v5 = vadd.f32 1e-05, %v2635_v3 }
 0x896   : > { %v2634_v6 = vpop.xlane.xlu1 %2633 }
 0x897   : > { %3262 = vrsqrt.f32 %v2637_v5  ;;  %v2636_v42 = vmul.f32 0.03125, %v2634_v6 }
 0x899   : > { %v2638_v44 = vadd.f32 1e-05, %v2636_v42 }
 0x89b   : > { %3264 = vrsqrt.f32 %v2638_v44 }
 0x8a4   : > { %v3263_v7 = vpop.eup %3262 }
 0x8a5   : > { %v2641_v43 = vmul.f32 %v3263_v7, %v2625_v52 }
 0x8a7   : > { %v2649_v11 = vmul.f32 %v2967_v8, %v2641_v43 }
 0x8a8   : > { %v3265_v63 = vpop.eup %3264 }
 0x8a9   : > { %v2642_v56 = vmul.f32 %v3265_v63, %v2626_v57  ;;  %v2657_v17 = vadd.f32 %v2968_v13, %v2649_v11 }
 0x8ab   : > { %v2650_v14 = vmul.f32 %v2967_v8, %v2642_v56 }
 0x8ad   : > { %v2658_v9 = vadd.f32 %v2968_v13, %v2650_v14 }
 0x8af   : > { %v2659_v19 = vpack.c.bf16 %v2658_v9, %v2657_v17 }
 0x8b1   : > { %3153 = vmatmul.mubr.msk.bf16.vlgmr.msra.gmra.mxu0 %vm449_vm0, %v2659_v19 }
 0x971   : > { %v2720_v1 = vpop.f32.mrf.mxu0 }
 0x972   : > { %v2721_v16 = vadd.f32 %v2969_v26, %v2720_v1 }
 0x973   : > { %v3154_v53 = vpop.f32.mrf.mxu0 }
 0x974   : > { %v2973_v28 = vmul.f32 -1.702, %v2721_v16 }
 0x975   : > { %v2723_v30 = vpop.f32.mrf.mxu0 }
 0x976   : > { %v2731_v38 = vmul.f32 1.442695, %v2973_v28  ;;  %v2724_v40 = vadd.f32 %v2969_v26, %v2723_v30 }
 0x977   : > { %v3155_v18 = vpop.f32.mrf.mxu0 }
 0x978   : > { %3266 = vpow2.f32 %v2731_v38  ;;  %v2974_v12 = vmul.f32 -1.702, %v2724_v40 }
 0x97a   : > { %v2733_v15 = vmul.f32 1.442695, %v2974_v12 }
 0x97c   : > { %3268 = vpow2.f32 %v2733_v15 }
 0x985   : > { %v3267_v46 = vpop.eup %3266 }
 0x986   : > { %v2735_v47 = vadd.f32 1.0, %v3267_v46 }
 0x988   : > { %3270 = vrcp.f32 %v2735_v47 }
 0x989   : > { %v3269_v48 = vpop.eup %3268 }
 0x98a   : > { %v2736_v33 = vadd.f32 1.0, %v3269_v48 }
 0x98c   : > { %3272 = vrcp.f32 %v2736_v33 }
 0x995   : > { %v3271_v36 = vpop.eup %3270 }
 0x996   : > { %v2741_v27 = vmul.f32 %v3271_v36, %v2721_v16 }
 0x999   : > { %v3273_v45 = vpop.eup %3272 }
 0x99a   : > { %v2742_v37 = vmul.f32 %v3273_v45, %v2724_v40 }
 0x99c   : > { %v2743_v31 = vpack.c.bf16 %v2742_v37, %v2741_v27 }
 0x99e   : > { %3173 = vmatmul.mubr.bf16.vlgmr.msra.gmra.mxu1 %v2743_v31 }
 0xa5e   : > { %v2849_v32 = vpop.f32.mrf.mxu1 }
 0xa5f   : > { %v2850_v2 = vadd.f32 %v2975_v34, %v2849_v32 }
 0xa60   : > { %v3174_v29 = vpop.f32.mrf.mxu1 }
 0xa61   : > { %v2856_v49 = vadd.f32 %v2850_v2, %v3792_v20 }
 0xa62   : > { %v2852_v50 = vpop.f32.mrf.mxu1 }
 0xa63   : > { %2858 = vst.msk [vmem:[%s442_s30] sm:$0xff] %vm449_vm0, %v2856_v49  ;;  %v2853_v51 = vadd.f32 %v2975_v34, %v2852_v50 }
 0xa64   : > { %v3175_v52 = vpop.f32.mrf.mxu1 }
 0xa65   : > { %v2857_v41 = vadd.f32 %v2853_v51, %v3797_v35 }
 0xa67   : > { %2859 = vst.msk [vmem:[%s442_s30 + $0x8] sm:$0xff] %vm449_vm0, %v2857_v41 }
 0xa68 PF: > { %s23_s25 = sadd.s32 1, %s3282_s25  }
 0xa69   : > { %p20_p4 = scmp.ge.s32.totalorder %s23_s25, 6  }
 0xa6b   :  { %22 = sbr.rel (!%p20_p4) target bundleno = 1 (0x1), region = 102 }

</bundles_post_ra>
